<compile_context>
chip_gen: v7x
topology: tpu7x:2x2x1
jax: 0.10.0
libtpu: 0.0.40
codegen_flags: <defaults>
</compile_context>

<pallas_src>
import functools

import jax
import jax.numpy as jnp
from jax.experimental import pallas as pl
from jax.experimental.pallas import tpu as pltpu

COMPUTE_DTYPE = jnp.bfloat16   # MXU operand dtype; accumulation & gate math stay fp32.
TIME_BLOCK = 8                 # timesteps folded into one grid step.


def _round_up(x, m):
    return ((x + m - 1) // m) * m


def _vmem_capacity_bytes():
    try:
        return int(pltpu.get_tpu_info().vmem_capacity_bytes)
    except Exception:
        return 64 * 1024 * 1024   # conservative (v7x-sized) fallback


def _lstm_chunk_kernel(Tc, T_total, Hp,
                       x_ref, wi_ref, wh_ref, b_ref, h0_ref, c0_ref,   # inputs
                       h_all_ref, c_last_ref,                           # outputs
                       pre_scr, h_scr, c_scr):                          # scratch
    """One grid step = one (batch-tile, time-chunk). Weights stay VMEM-resident."""
    ti = pl.program_id(1)

    @pl.when(ti == 0)
    def _init():
        h_scr[...] = h0_ref[...].astype(jnp.float32)
        c_scr[...] = c0_ref[...].astype(jnp.float32)

    Tb, Bt, Ep = x_ref.shape

    # Hoisted input projection: ONE large-M GEMM (M = Tc*Bt) for the whole time
    # chunk, folded bias added once. fp32 accumulation.
    x2d = x_ref[...].reshape(Tb * Bt, Ep)
    pre_scr[...] = (
        jnp.dot(x2d, wi_ref[...], preferred_element_type=jnp.float32) + b_ref[...])

    def step(tt, carry):
        @pl.when(ti * Tc + tt < T_total)            # mask time padding
        def _():
            # Serial recurrent GEMM: K is Hp only (input term precomputed above).
            h_bf = h_scr[...].astype(wh_ref.dtype)  # cast operand only; carry is fp32
            row0 = pl.multiple_of(tt * Bt, Bt)
            pre = (pre_scr[pl.ds(row0, Bt), :]
                   + jnp.dot(h_bf, wh_ref[...], preferred_element_type=jnp.float32))

            # Gate math in fp32 (v5e VPU/EUP have no bf16 path).
            sig = jax.nn.sigmoid(pre[:, :3 * Hp])   # one fused EUP pass
            it = sig[:, 0 * Hp:1 * Hp]
            ft = sig[:, 1 * Hp:2 * Hp]
            ot = sig[:, 2 * Hp:3 * Hp]
            maxout = jnp.maximum(pre[:, 3 * Hp:4 * Hp], pre[:, 4 * Hp:5 * Hp])

            ct = it * maxout + ft * c_scr[...]
            ht = ot * jnp.tanh(ct)                  # dropout (eval mode) == identity

            c_scr[...] = ct
            h_scr[...] = ht                         # fp32 carry (no bf16 drift)
            h_all_ref[tt] = ht.astype(h_all_ref.dtype)   # lane-dense (Bt, Hp) store
        return carry

    jax.lax.fori_loop(0, Tc, step, 0, unroll=True)

    @pl.when(ti == pl.num_programs(1) - 1)
    def _finalize():
        c_last_ref[...] = c_scr[...].astype(c_last_ref.dtype)


@functools.partial(jax.jit, static_argnames=("out_dtype",))
def lstm_sequence_pallas(x_seq, h0, c0, w_i2h, b_i2h, w_h2h, b_h2h,
                         out_dtype=None):
    """Run the LSTM cell over a sequence.

    x_seq: (T, B, E); h0/c0: (B, H). Weights in PyTorch nn.Linear layout:
    w_i2h (5H, E), w_h2h (5H, H), b_i2h/b_h2h (5H,).
    Returns (h_all (T,B,H), h_T (B,H), c_T (B,H)).
    """
    T, B, E = x_seq.shape
    H = h0.shape[-1]
    out_dtype = x_seq.dtype if out_dtype is None else jnp.dtype(out_dtype)

    # Lane/sublane-friendly padded sizes (bf16 vreg is (16,128)).
    Hp = _round_up(H, 128)
    Ep = _round_up(E, 128)
    N = 5 * Hp
    Bp = _round_up(max(B, 16), 16)
    if Bp > 256:
        Bp = _round_up(Bp, 256)   # batch tiled across a parallel grid axis
        Bt = 256
    else:
        Bt = Bp
    num_b_tiles = Bp // Bt

    Tc = min(T, TIME_BLOCK)
    Tp = _round_up(T, Tc)
    num_chunks = Tp // Tc

    def pad_gatewise(w, fan_in, fan_in_p):
        # (5H, fan_in) -> per-gate zero-pad H->Hp and fan_in->fan_in_p.
        w = w.reshape(5, H, fan_in)
        w = jnp.pad(w, ((0, 0), (0, Hp - H), (0, fan_in_p - fan_in)))
        return w.reshape(5 * Hp, fan_in_p)

    wi = pad_gatewise(w_i2h, E, Ep).T.astype(COMPUTE_DTYPE)   # (Ep, 5Hp)
    wh = pad_gatewise(w_h2h, H, Hp).T.astype(COMPUTE_DTYPE)   # (Hp, 5Hp)
    b = (b_i2h + b_h2h).reshape(5, H)
    b = jnp.pad(b, ((0, 0), (0, Hp - H))).reshape(1, N).astype(jnp.float32)

    x_p = jnp.pad(x_seq, ((0, Tp - T), (0, Bp - B), (0, Ep - E))).astype(COMPUTE_DTYPE)
    h0_p = jnp.pad(h0, ((0, Bp - B), (0, Hp - H))).astype(jnp.float32)
    c0_p = jnp.pad(c0, ((0, Bp - B), (0, Hp - H))).astype(jnp.float32)

    # Generation-aware VMEM budget, computed with the real output itemsize.
    bfz = jnp.dtype(COMPUTE_DTYPE).itemsize
    outz = jnp.dtype(out_dtype).itemsize
    needed = (Ep * N * bfz + Hp * N * bfz + N * 4        # resident Wi, Wh, bias
              + 2 * Tc * Bt * Ep * bfz                    # double-buffered x chunk
              + 2 * Tc * Bt * Hp * outz                   # double-buffered h_all chunk
              + Bt * Hp * outz                            # resident c_T block
              + 2 * Bt * Hp * 4                           # resident h0/c0 blocks
              + Tc * Bt * N * 4 + 2 * Bt * Hp * 4)        # VMEM scratch
    phys = _vmem_capacity_bytes()
    vmem_limit = int(min(max(needed + (16 << 20), 32 << 20), int(0.75 * phys)))

    kernel = functools.partial(_lstm_chunk_kernel, Tc, T, Hp)

    h_all, c_last = pl.pallas_call(
        kernel,
        out_shape=(jax.ShapeDtypeStruct((Tp, Bp, Hp), out_dtype),   # h_all
                   jax.ShapeDtypeStruct((Bp, Hp), out_dtype)),      # c_T
        grid_spec=pltpu.PrefetchScalarGridSpec(
            num_scalar_prefetch=0,
            grid=(num_b_tiles, num_chunks),
            in_specs=[
                pl.BlockSpec((Tc, Bt, Ep), lambda bi, ti: (ti, bi, 0)),   # x chunk
                pl.BlockSpec((Ep, N), lambda bi, ti: (0, 0)),             # Wi (resident)
                pl.BlockSpec((Hp, N), lambda bi, ti: (0, 0)),             # Wh (resident)
                pl.BlockSpec((1, N), lambda bi, ti: (0, 0)),              # folded bias
                pl.BlockSpec((Bt, Hp), lambda bi, ti: (bi, 0)),           # h0
                pl.BlockSpec((Bt, Hp), lambda bi, ti: (bi, 0)),           # c0
            ],
            out_specs=(
                pl.BlockSpec((Tc, Bt, Hp), lambda bi, ti: (ti, bi, 0)),   # h_all
                pl.BlockSpec((Bt, Hp), lambda bi, ti: (bi, 0)),           # c_T
            ),
            scratch_shapes=[
                pltpu.VMEM((Tc * Bt, N), jnp.float32),   # hoisted input projection
                pltpu.VMEM((Bt, Hp), jnp.float32),       # h carry (fp32)
                pltpu.VMEM((Bt, Hp), jnp.float32),       # c carry (fp32)
            ],
        ),
        compiler_params=pltpu.CompilerParams(
            dimension_semantics=("parallel", "arbitrary"),   # batch tiles ||, time serial
            vmem_limit_bytes=vmem_limit,
        ),
    )(x_p, wi, wh, b, h0_p, c0_p)

    h_seq = h_all[:T, :B, :H]
    return h_seq, h_seq[T - 1], c_last[:B, :H]


def lstm_cell_pallas(xt, state, w_i2h, b_i2h, w_h2h, b_h2h):
    """Single-step forward matching LSTMCell.forward: returns (output, (ht, ct))."""
    h_all, h_t, c_t = lstm_sequence_pallas(xt[None], state[0], state[1],
                                           w_i2h, b_i2h, w_h2h, b_h2h)
    return h_all[0], (h_t, c_t)


def xavier_uniform(key, out_features, in_features, dtype=jnp.float32):
    bound = (6.0 / (in_features + out_features)) ** 0.5
    return jax.random.uniform(key, (out_features, in_features), dtype,
                              minval=-bound, maxval=bound)


if __name__ == "__main__":
    input_encoding_size = 32
    rnn_size = 32
    B = 2
    T = 10   # not a multiple of TIME_BLOCK -> exercises the time-padding mask path
    dtype = jnp.float32
    H = rnn_size

    key = jax.random.PRNGKey(0)
    k_wi, k_wh, k_x, k_h, k_c = jax.random.split(key, 5)

    # Deterministic parameter init (matches module __init__ semantics).
    w_i2h = xavier_uniform(k_wi, 5 * H, input_encoding_size, dtype)
    w_h2h = xavier_uniform(k_wh, 5 * H, H, dtype)
    b_i2h = jnp.zeros((5 * H,), dtype)
    b_h2h = jnp.zeros((5 * H,), dtype)

    x_seq = jax.random.normal(k_x, (T, B, input_encoding_size), dtype)
    h0 = jax.random.normal(k_h, (B, H), dtype)
    c0 = jax.random.normal(k_c, (B, H), dtype)

    # Sequence-mode call (recurrent loop inside the kernel).
    h_all, h_T, c_T = lstm_sequence_pallas(x_seq, h0, c0,
                                           w_i2h, b_i2h, w_h2h, b_h2h)
    jax.block_until_ready((h_all, h_T, c_T))

    # Single-step module-style call.
    output, (ht1, ct1) = lstm_cell_pallas(x_seq[0], (h0, c0),
                                          w_i2h, b_i2h, w_h2h, b_h2h)
    jax.block_until_ready((output, ht1, ct1))

    # Pure-JAX fp32 reference.
    def cell_ref(xt, h, c):
        pre = xt @ w_i2h.T + b_i2h + h @ w_h2h.T + b_h2h
        it = jax.nn.sigmoid(pre[:, :H])
        ft = jax.nn.sigmoid(pre[:, H:2 * H])
        ot = jax.nn.sigmoid(pre[:, 2 * H:3 * H])
        mx = jnp.maximum(pre[:, 3 * H:4 * H], pre[:, 4 * H:])
        c2 = it * mx + ft * c
        h2 = ot * jnp.tanh(c2)
        return h2, c2

    h_r, c_r = h0, c0
    h_all_ref = []
    for t in range(T):
        h_r, c_r = cell_ref(x_seq[t], h_r, c_r)
        h_all_ref.append(h_r)
    h_all_ref = jnp.stack(h_all_ref)

    # bf16 matmul operands -> loosened tolerance vs fp32 reference.
    tol = dict(atol=5e-2, rtol=5e-2)
    assert jnp.allclose(h_all, h_all_ref, **tol), "h sequence mismatch"
    assert jnp.allclose(h_T, h_r, **tol), "final h mismatch"
    assert jnp.allclose(c_T, c_r, **tol), "final c mismatch"

    h1_ref, c1_ref = cell_ref(x_seq[0], h0, c0)
    assert jnp.allclose(output, h1_ref, **tol), "single-step output mismatch"
    assert jnp.allclose(ct1, c1_ref, **tol), "single-step c mismatch"

    print("KERNEL_OK")
</pallas_src>

<mosaic_0001>
module attributes {stable_mosaic.version = 11 : i64} {
  func.func @_lstm_chunk_kernel(%arg0: i32, %arg1: i32, %arg2: memref<8x16x128xbf16, #tpu.memory_space<vmem>>, %arg3: memref<128x640xbf16, #tpu.memory_space<vmem>>, %arg4: memref<128x640xbf16, #tpu.memory_space<vmem>>, %arg5: memref<1x640xf32, #tpu.memory_space<vmem>>, %arg6: memref<16x128xf32, #tpu.memory_space<vmem>>, %arg7: memref<16x128xf32, #tpu.memory_space<vmem>>, %arg8: memref<8x16x128xf32, #tpu.memory_space<vmem>>, %arg9: memref<16x128xf32, #tpu.memory_space<vmem>>, %arg10: memref<128x640xf32, #tpu.memory_space<vmem>>, %arg11: memref<16x128xf32, #tpu.memory_space<vmem>>, %arg12: memref<16x128xf32, #tpu.memory_space<vmem>>) attributes {dimension_semantics = [#tpu.dimension_semantics<parallel>, #tpu.dimension_semantics<arbitrary>], iteration_bounds = array<i64: 1, 2>, scalar_prefetch = 0 : i64, scratch_operands = 3 : i64, tpu.core_type = #tpu.core_type<tc>, window_params = [{transform_indices = @transform_0, window_bounds = array<i64: 8, 16, 128>}, {pipeline_mode = #tpu.pipeline_mode<synchronous>, transform_indices = @transform_1, window_bounds = array<i64: 128, 640>}, {pipeline_mode = #tpu.pipeline_mode<synchronous>, transform_indices = @transform_2, window_bounds = array<i64: 128, 640>}, {pipeline_mode = #tpu.pipeline_mode<synchronous>, transform_indices = @transform_3, window_bounds = array<i64: 1, 640>}, {transform_indices = @transform_4, window_bounds = array<i64: 16, 128>}, {transform_indices = @transform_5, window_bounds = array<i64: 16, 128>}, {transform_indices = @transform_6, window_bounds = array<i64: 8, 16, 128>}, {transform_indices = @transform_7, window_bounds = array<i64: 16, 128>}]} {
    %c0_i32 = arith.constant 0 : i32
    %0 = arith.cmpi eq, %arg1, %c0_i32 : i32
    %1 = arith.extui %0 : i1 to i32
    %c0_i32_0 = arith.constant 0 : i32
    %2 = arith.cmpi ne, %1, %c0_i32_0 : i32
    scf.if %2 {
      %c0_35 = arith.constant 0 : index
      %c0_36 = arith.constant 0 : index
      %54 = vector.load %arg6[%c0_35, %c0_36] : memref<16x128xf32, #tpu.memory_space<vmem>>, vector<16x128xf32>
      %c0_37 = arith.constant 0 : index
      %c0_38 = arith.constant 0 : index
      %55 = vector.load %arg11[%c0_37, %c0_38] : memref<16x128xf32, #tpu.memory_space<vmem>>, vector<16x128xf32>
      tpu.vector_store %arg11[%c0_37, %c0_38], %54 {strides = array<i32>} : memref<16x128xf32, #tpu.memory_space<vmem>>, vector<16x128xf32>,
      %c0_39 = arith.constant 0 : index
      %c0_40 = arith.constant 0 : index
      %56 = vector.load %arg7[%c0_39, %c0_40] : memref<16x128xf32, #tpu.memory_space<vmem>>, vector<16x128xf32>
      %c0_41 = arith.constant 0 : index
      %c0_42 = arith.constant 0 : index
      %57 = vector.load %arg12[%c0_41, %c0_42] : memref<16x128xf32, #tpu.memory_space<vmem>>, vector<16x128xf32>
      tpu.vector_store %arg12[%c0_41, %c0_42], %56 {strides = array<i32>} : memref<16x128xf32, #tpu.memory_space<vmem>>, vector<16x128xf32>,
    } else {
    }
    %c0 = arith.constant 0 : index
    %c0_1 = arith.constant 0 : index
    %c0_2 = arith.constant 0 : index
    %3 = vector.load %arg2[%c0, %c0_1, %c0_2] : memref<8x16x128xbf16, #tpu.memory_space<vmem>>, vector<8x16x128xbf16>
    %4 = vector.shape_cast %3 : vector<8x16x128xbf16> to vector<128x128xbf16>
    %c0_3 = arith.constant 0 : index
    %c0_4 = arith.constant 0 : index
    %5 = vector.load %arg3[%c0_3, %c0_4] : memref<128x640xbf16, #tpu.memory_space<vmem>>, vector<128x640xbf16>
    %cst = arith.constant dense<0.000000e+00> : vector<128x640xf32>
    %6 = tpu.matmul %4, %5, %cst {dimension_numbers = #tpu.dot_dimension_numbers<[1], [0], [0], [1], [0, 0, 1, 1], [], []>} : vector<128x128xbf16>, vector<128x640xbf16>, vector<128x640xf32> -> vector<128x640xf32>
    %c0_5 = arith.constant 0 : index
    %c0_6 = arith.constant 0 : index
    %7 = vector.load %arg5[%c0_5, %c0_6] : memref<1x640xf32, #tpu.memory_space<vmem>>, vector<1x640xf32>
    %8 = vector.broadcast %7 : vector<1x640xf32> to vector<128x640xf32>
    %9 = arith.addf %6, %8 : vector<128x640xf32>
    %c0_7 = arith.constant 0 : index
    %c0_8 = arith.constant 0 : index
    %10 = vector.load %arg10[%c0_7, %c0_8] : memref<128x640xf32, #tpu.memory_space<vmem>>, vector<128x640xf32>
    tpu.vector_store %arg10[%c0_7, %c0_8], %9 {strides = array<i32>} : memref<128x640xf32, #tpu.memory_space<vmem>>, vector<128x640xf32>,
    %c0_i32_9 = arith.constant 0 : i32
    %c8_i32 = arith.constant 8 : i32
    %11 = arith.muli %arg1, %c8_i32 : i32
    %12 = arith.addi %11, %c0_i32_9 : i32
    %c10_i32 = arith.constant 10 : i32
    %13 = arith.cmpi slt, %12, %c10_i32 : i32
    %14 = arith.extui %13 : i1 to i32
    %c0_i32_10 = arith.constant 0 : i32
    %15 = arith.cmpi ne, %14, %c0_i32_10 : i32
    scf.if %15 {
      %c0_35 = arith.constant 0 : index
      %c0_36 = arith.constant 0 : index
      %54 = vector.load %arg11[%c0_35, %c0_36] : memref<16x128xf32, #tpu.memory_space<vmem>>, vector<16x128xf32>
      %55 = arith.truncf %54 : vector<16x128xf32> to vector<16x128xbf16>
      %c16_i32 = arith.constant 16 : i32
      %56 = arith.muli %c0_i32_9, %c16_i32 : i32
      %57 = tpu.assume_multiple %56, 16 : i32
      %58 = arith.index_cast %57 : i32 to index
      %c0_37 = arith.constant 0 : index
      %59 = vector.load %arg10[%58, %c0_37] : memref<128x640xf32, #tpu.memory_space<vmem>>, vector<16x640xf32>
      %c0_38 = arith.constant 0 : index
      %c0_39 = arith.constant 0 : index
      %60 = vector.load %arg4[%c0_38, %c0_39] : memref<128x640xbf16, #tpu.memory_space<vmem>>, vector<128x640xbf16>
      %cst_40 = arith.constant dense<0.000000e+00> : vector<16x640xf32>
      %61 = tpu.matmul %55, %60, %cst_40 {dimension_numbers = #tpu.dot_dimension_numbers<[1], [0], [0], [1], [0, 0, 1, 1], [], []>} : vector<16x128xbf16>, vector<128x640xbf16>, vector<16x640xf32> -> vector<16x640xf32>
      %62 = arith.addf %59, %61 : vector<16x640xf32>
      %63 = vector.extract_strided_slice %62 {offsets = [0, 0], sizes = [16, 384], strides = [1, 1]} : vector<16x640xf32> to vector<16x384xf32>
      %64 = arith.negf %63 : vector<16x384xf32>
      %65 = math.exp %64 : vector<16x384xf32>
      %cst_41 = arith.constant 1.000000e+00 : f32
      %66 = vector.broadcast %cst_41 : f32 to vector<16x384xf32>
      %67 = arith.addf %66, %65 : vector<16x384xf32>
      %68 = arith.divf %66, %67 : vector<16x384xf32>
      %69 = vector.extract_strided_slice %68 {offsets = [0, 0], sizes = [16, 128], strides = [1, 1]} : vector<16x384xf32> to vector<16x128xf32>
      %70 = vector.extract_strided_slice %68 {offsets = [0, 128], sizes = [16, 128], strides = [1, 1]} : vector<16x384xf32> to vector<16x128xf32>
      %71 = vector.extract_strided_slice %68 {offsets = [0, 256], sizes = [16, 128], strides = [1, 1]} : vector<16x384xf32> to vector<16x128xf32>
      %72 = vector.extract_strided_slice %62 {offsets = [0, 384], sizes = [16, 128], strides = [1, 1]} : vector<16x640xf32> to vector<16x128xf32>
      %73 = vector.extract_strided_slice %62 {offsets = [0, 512], sizes = [16, 128], strides = [1, 1]} : vector<16x640xf32> to vector<16x128xf32>
      %74 = arith.maximumf %72, %73 : vector<16x128xf32>
      %75 = arith.mulf %69, %74 : vector<16x128xf32>
      %c0_42 = arith.constant 0 : index
      %c0_43 = arith.constant 0 : index
      %76 = vector.load %arg12[%c0_42, %c0_43] : memref<16x128xf32, #tpu.memory_space<vmem>>, vector<16x128xf32>
      %77 = arith.mulf %70, %76 : vector<16x128xf32>
      %78 = arith.addf %75, %77 : vector<16x128xf32>
      %79 = math.tanh %78 : vector<16x128xf32>
      %80 = arith.mulf %71, %79 : vector<16x128xf32>
      %c0_44 = arith.constant 0 : index
      %c0_45 = arith.constant 0 : index
      %81 = vector.load %arg12[%c0_44, %c0_45] : memref<16x128xf32, #tpu.memory_space<vmem>>, vector<16x128xf32>
      tpu.vector_store %arg12[%c0_44, %c0_45], %78 {strides = array<i32>} : memref<16x128xf32, #tpu.memory_space<vmem>>, vector<16x128xf32>,
      %c0_46 = arith.constant 0 : index
      %c0_47 = arith.constant 0 : index
      %82 = vector.load %arg11[%c0_46, %c0_47] : memref<16x128xf32, #tpu.memory_space<vmem>>, vector<16x128xf32>
      tpu.vector_store %arg11[%c0_46, %c0_47], %80 {strides = array<i32>} : memref<16x128xf32, #tpu.memory_space<vmem>>, vector<16x128xf32>,
      %83 = arith.index_cast %c0_i32_9 : i32 to index
      %c0_48 = arith.constant 0 : index
      %c0_49 = arith.constant 0 : index
      %84 = vector.load %arg8[%83, %c0_48, %c0_49] : memref<8x16x128xf32, #tpu.memory_space<vmem>>, vector<1x16x128xf32>
      %85 = vector.shape_cast %84 : vector<1x16x128xf32> to vector<16x128xf32>
      %86 = vector.shape_cast %80 : vector<16x128xf32> to vector<1x16x128xf32>
      tpu.vector_store %arg8[%83, %c0_48, %c0_49], %86 {strides = array<i32>} : memref<8x16x128xf32, #tpu.memory_space<vmem>>, vector<1x16x128xf32>,
    } else {
    }
    %c1_i32 = arith.constant 1 : i32
    %c8_i32_11 = arith.constant 8 : i32
    %16 = arith.muli %arg1, %c8_i32_11 : i32
    %17 = arith.addi %16, %c1_i32 : i32
    %c10_i32_12 = arith.constant 10 : i32
    %18 = arith.cmpi slt, %17, %c10_i32_12 : i32
    %19 = arith.extui %18 : i1 to i32
    %c0_i32_13 = arith.constant 0 : i32
    %20 = arith.cmpi ne, %19, %c0_i32_13 : i32
    scf.if %20 {
      %c0_35 = arith.constant 0 : index
      %c0_36 = arith.constant 0 : index
      %54 = vector.load %arg11[%c0_35, %c0_36] : memref<16x128xf32, #tpu.memory_space<vmem>>, vector<16x128xf32>
      %55 = arith.truncf %54 : vector<16x128xf32> to vector<16x128xbf16>
      %c16_i32 = arith.constant 16 : i32
      %56 = arith.muli %c1_i32, %c16_i32 : i32
      %57 = tpu.assume_multiple %56, 16 : i32
      %58 = arith.index_cast %57 : i32 to index
      %c0_37 = arith.constant 0 : index
      %59 = vector.load %arg10[%58, %c0_37] : memref<128x640xf32, #tpu.memory_space<vmem>>, vector<16x640xf32>
      %c0_38 = arith.constant 0 : index
      %c0_39 = arith.constant 0 : index
      %60 = vector.load %arg4[%c0_38, %c0_39] : memref<128x640xbf16, #tpu.memory_space<vmem>>, vector<128x640xbf16>
      %cst_40 = arith.constant dense<0.000000e+00> : vector<16x640xf32>
      %61 = tpu.matmul %55, %60, %cst_40 {dimension_numbers = #tpu.dot_dimension_numbers<[1], [0], [0], [1], [0, 0, 1, 1], [], []>} : vector<16x128xbf16>, vector<128x640xbf16>, vector<16x640xf32> -> vector<16x640xf32>
      %62 = arith.addf %59, %61 : vector<16x640xf32>
      %63 = vector.extract_strided_slice %62 {offsets = [0, 0], sizes = [16, 384], strides = [1, 1]} : vector<16x640xf32> to vector<16x384xf32>
      %64 = arith.negf %63 : vector<16x384xf32>
      %65 = math.exp %64 : vector<16x384xf32>
      %cst_41 = arith.constant 1.000000e+00 : f32
      %66 = vector.broadcast %cst_41 : f32 to vector<16x384xf32>
      %67 = arith.addf %66, %65 : vector<16x384xf32>
      %68 = arith.divf %66, %67 : vector<16x384xf32>
      %69 = vector.extract_strided_slice %68 {offsets = [0, 0], sizes = [16, 128], strides = [1, 1]} : vector<16x384xf32> to vector<16x128xf32>
      %70 = vector.extract_strided_slice %68 {offsets = [0, 128], sizes = [16, 128], strides = [1, 1]} : vector<16x384xf32> to vector<16x128xf32>
      %71 = vector.extract_strided_slice %68 {offsets = [0, 256], sizes = [16, 128], strides = [1, 1]} : vector<16x384xf32> to vector<16x128xf32>
      %72 = vector.extract_strided_slice %62 {offsets = [0, 384], sizes = [16, 128], strides = [1, 1]} : vector<16x640xf32> to vector<16x128xf32>
      %73 = vector.extract_strided_slice %62 {offsets = [0, 512], sizes = [16, 128], strides = [1, 1]} : vector<16x640xf32> to vector<16x128xf32>
      %74 = arith.maximumf %72, %73 : vector<16x128xf32>
      %75 = arith.mulf %69, %74 : vector<16x128xf32>
      %c0_42 = arith.constant 0 : index
      %c0_43 = arith.constant 0 : index
      %76 = vector.load %arg12[%c0_42, %c0_43] : memref<16x128xf32, #tpu.memory_space<vmem>>, vector<16x128xf32>
      %77 = arith.mulf %70, %76 : vector<16x128xf32>
      %78 = arith.addf %75, %77 : vector<16x128xf32>
      %79 = math.tanh %78 : vector<16x128xf32>
      %80 = arith.mulf %71, %79 : vector<16x128xf32>
      %c0_44 = arith.constant 0 : index
      %c0_45 = arith.constant 0 : index
      %81 = vector.load %arg12[%c0_44, %c0_45] : memref<16x128xf32, #tpu.memory_space<vmem>>, vector<16x128xf32>
      tpu.vector_store %arg12[%c0_44, %c0_45], %78 {strides = array<i32>} : memref<16x128xf32, #tpu.memory_space<vmem>>, vector<16x128xf32>,
      %c0_46 = arith.constant 0 : index
      %c0_47 = arith.constant 0 : index
      %82 = vector.load %arg11[%c0_46, %c0_47] : memref<16x128xf32, #tpu.memory_space<vmem>>, vector<16x128xf32>
      tpu.vector_store %arg11[%c0_46, %c0_47], %80 {strides = array<i32>} : memref<16x128xf32, #tpu.memory_space<vmem>>, vector<16x128xf32>,
      %83 = arith.index_cast %c1_i32 : i32 to index
      %c0_48 = arith.constant 0 : index
      %c0_49 = arith.constant 0 : index
      %84 = vector.load %arg8[%83, %c0_48, %c0_49] : memref<8x16x128xf32, #tpu.memory_space<vmem>>, vector<1x16x128xf32>
      %85 = vector.shape_cast %84 : vector<1x16x128xf32> to vector<16x128xf32>
      %86 = vector.shape_cast %80 : vector<16x128xf32> to vector<1x16x128xf32>
      tpu.vector_store %arg8[%83, %c0_48, %c0_49], %86 {strides = array<i32>} : memref<8x16x128xf32, #tpu.memory_space<vmem>>, vector<1x16x128xf32>,
    } else {
    }
    %c2_i32 = arith.constant 2 : i32
    %c8_i32_14 = arith.constant 8 : i32
    %21 = arith.muli %arg1, %c8_i32_14 : i32
    %22 = arith.addi %21, %c2_i32 : i32
    %c10_i32_15 = arith.constant 10 : i32
    %23 = arith.cmpi slt, %22, %c10_i32_15 : i32
    %24 = arith.extui %23 : i1 to i32
    %c0_i32_16 = arith.constant 0 : i32
    %25 = arith.cmpi ne, %24, %c0_i32_16 : i32
    scf.if %25 {
      %c0_35 = arith.constant 0 : index
      %c0_36 = arith.constant 0 : index
      %54 = vector.load %arg11[%c0_35, %c0_36] : memref<16x128xf32, #tpu.memory_space<vmem>>, vector<16x128xf32>
      %55 = arith.truncf %54 : vector<16x128xf32> to vector<16x128xbf16>
      %c16_i32 = arith.constant 16 : i32
      %56 = arith.muli %c2_i32, %c16_i32 : i32
      %57 = tpu.assume_multiple %56, 16 : i32
      %58 = arith.index_cast %57 : i32 to index
      %c0_37 = arith.constant 0 : index
      %59 = vector.load %arg10[%58, %c0_37] : memref<128x640xf32, #tpu.memory_space<vmem>>, vector<16x640xf32>
      %c0_38 = arith.constant 0 : index
      %c0_39 = arith.constant 0 : index
      %60 = vector.load %arg4[%c0_38, %c0_39] : memref<128x640xbf16, #tpu.memory_space<vmem>>, vector<128x640xbf16>
      %cst_40 = arith.constant dense<0.000000e+00> : vector<16x640xf32>
      %61 = tpu.matmul %55, %60, %cst_40 {dimension_numbers = #tpu.dot_dimension_numbers<[1], [0], [0], [1], [0, 0, 1, 1], [], []>} : vector<16x128xbf16>, vector<128x640xbf16>, vector<16x640xf32> -> vector<16x640xf32>
      %62 = arith.addf %59, %61 : vector<16x640xf32>
      %63 = vector.extract_strided_slice %62 {offsets = [0, 0], sizes = [16, 384], strides = [1, 1]} : vector<16x640xf32> to vector<16x384xf32>
      %64 = arith.negf %63 : vector<16x384xf32>
      %65 = math.exp %64 : vector<16x384xf32>
      %cst_41 = arith.constant 1.000000e+00 : f32
      %66 = vector.broadcast %cst_41 : f32 to vector<16x384xf32>
      %67 = arith.addf %66, %65 : vector<16x384xf32>
      %68 = arith.divf %66, %67 : vector<16x384xf32>
      %69 = vector.extract_strided_slice %68 {offsets = [0, 0], sizes = [16, 128], strides = [1, 1]} : vector<16x384xf32> to vector<16x128xf32>
      %70 = vector.extract_strided_slice %68 {offsets = [0, 128], sizes = [16, 128], strides = [1, 1]} : vector<16x384xf32> to vector<16x128xf32>
      %71 = vector.extract_strided_slice %68 {offsets = [0, 256], sizes = [16, 128], strides = [1, 1]} : vector<16x384xf32> to vector<16x128xf32>
      %72 = vector.extract_strided_slice %62 {offsets = [0, 384], sizes = [16, 128], strides = [1, 1]} : vector<16x640xf32> to vector<16x128xf32>
      %73 = vector.extract_strided_slice %62 {offsets = [0, 512], sizes = [16, 128], strides = [1, 1]} : vector<16x640xf32> to vector<16x128xf32>
      %74 = arith.maximumf %72, %73 : vector<16x128xf32>
      %75 = arith.mulf %69, %74 : vector<16x128xf32>
      %c0_42 = arith.constant 0 : index
      %c0_43 = arith.constant 0 : index
      %76 = vector.load %arg12[%c0_42, %c0_43] : memref<16x128xf32, #tpu.memory_space<vmem>>, vector<16x128xf32>
      %77 = arith.mulf %70, %76 : vector<16x128xf32>
      %78 = arith.addf %75, %77 : vector<16x128xf32>
      %79 = math.tanh %78 : vector<16x128xf32>
      %80 = arith.mulf %71, %79 : vector<16x128xf32>
      %c0_44 = arith.constant 0 : index
      %c0_45 = arith.constant 0 : index
      %81 = vector.load %arg12[%c0_44, %c0_45] : memref<16x128xf32, #tpu.memory_space<vmem>>, vector<16x128xf32>
      tpu.vector_store %arg12[%c0_44, %c0_45], %78 {strides = array<i32>} : memref<16x128xf32, #tpu.memory_space<vmem>>, vector<16x128xf32>,
      %c0_46 = arith.constant 0 : index
      %c0_47 = arith.constant 0 : index
      %82 = vector.load %arg11[%c0_46, %c0_47] : memref<16x128xf32, #tpu.memory_space<vmem>>, vector<16x128xf32>
      tpu.vector_store %arg11[%c0_46, %c0_47], %80 {strides = array<i32>} : memref<16x128xf32, #tpu.memory_space<vmem>>, vector<16x128xf32>,
      %83 = arith.index_cast %c2_i32 : i32 to index
      %c0_48 = arith.constant 0 : index
      %c0_49 = arith.constant 0 : index
      %84 = vector.load %arg8[%83, %c0_48, %c0_49] : memref<8x16x128xf32, #tpu.memory_space<vmem>>, vector<1x16x128xf32>
      %85 = vector.shape_cast %84 : vector<1x16x128xf32> to vector<16x128xf32>
      %86 = vector.shape_cast %80 : vector<16x128xf32> to vector<1x16x128xf32>
      tpu.vector_store %arg8[%83, %c0_48, %c0_49], %86 {strides = array<i32>} : memref<8x16x128xf32, #tpu.memory_space<vmem>>, vector<1x16x128xf32>,
    } else {
    }
    %c3_i32 = arith.constant 3 : i32
    %c8_i32_17 = arith.constant 8 : i32
    %26 = arith.muli %arg1, %c8_i32_17 : i32
    %27 = arith.addi %26, %c3_i32 : i32
    %c10_i32_18 = arith.constant 10 : i32
    %28 = arith.cmpi slt, %27, %c10_i32_18 : i32
    %29 = arith.extui %28 : i1 to i32
    %c0_i32_19 = arith.constant 0 : i32
    %30 = arith.cmpi ne, %29, %c0_i32_19 : i32
    scf.if %30 {
      %c0_35 = arith.constant 0 : index
      %c0_36 = arith.constant 0 : index
      %54 = vector.load %arg11[%c0_35, %c0_36] : memref<16x128xf32, #tpu.memory_space<vmem>>, vector<16x128xf32>
      %55 = arith.truncf %54 : vector<16x128xf32> to vector<16x128xbf16>
      %c16_i32 = arith.constant 16 : i32
      %56 = arith.muli %c3_i32, %c16_i32 : i32
      %57 = tpu.assume_multiple %56, 16 : i32
      %58 = arith.index_cast %57 : i32 to index
      %c0_37 = arith.constant 0 : index
      %59 = vector.load %arg10[%58, %c0_37] : memref<128x640xf32, #tpu.memory_space<vmem>>, vector<16x640xf32>
      %c0_38 = arith.constant 0 : index
      %c0_39 = arith.constant 0 : index
      %60 = vector.load %arg4[%c0_38, %c0_39] : memref<128x640xbf16, #tpu.memory_space<vmem>>, vector<128x640xbf16>
      %cst_40 = arith.constant dense<0.000000e+00> : vector<16x640xf32>
      %61 = tpu.matmul %55, %60, %cst_40 {dimension_numbers = #tpu.dot_dimension_numbers<[1], [0], [0], [1], [0, 0, 1, 1], [], []>} : vector<16x128xbf16>, vector<128x640xbf16>, vector<16x640xf32> -> vector<16x640xf32>
      %62 = arith.addf %59, %61 : vector<16x640xf32>
      %63 = vector.extract_strided_slice %62 {offsets = [0, 0], sizes = [16, 384], strides = [1, 1]} : vector<16x640xf32> to vector<16x384xf32>
      %64 = arith.negf %63 : vector<16x384xf32>
      %65 = math.exp %64 : vector<16x384xf32>
      %cst_41 = arith.constant 1.000000e+00 : f32
      %66 = vector.broadcast %cst_41 : f32 to vector<16x384xf32>
      %67 = arith.addf %66, %65 : vector<16x384xf32>
      %68 = arith.divf %66, %67 : vector<16x384xf32>
      %69 = vector.extract_strided_slice %68 {offsets = [0, 0], sizes = [16, 128], strides = [1, 1]} : vector<16x384xf32> to vector<16x128xf32>
      %70 = vector.extract_strided_slice %68 {offsets = [0, 128], sizes = [16, 128], strides = [1, 1]} : vector<16x384xf32> to vector<16x128xf32>
      %71 = vector.extract_strided_slice %68 {offsets = [0, 256], sizes = [16, 128], strides = [1, 1]} : vector<16x384xf32> to vector<16x128xf32>
      %72 = vector.extract_strided_slice %62 {offsets = [0, 384], sizes = [16, 128], strides = [1, 1]} : vector<16x640xf32> to vector<16x128xf32>
      %73 = vector.extract_strided_slice %62 {offsets = [0, 512], sizes = [16, 128], strides = [1, 1]} : vector<16x640xf32> to vector<16x128xf32>
      %74 = arith.maximumf %72, %73 : vector<16x128xf32>
      %75 = arith.mulf %69, %74 : vector<16x128xf32>
      %c0_42 = arith.constant 0 : index
      %c0_43 = arith.constant 0 : index
      %76 = vector.load %arg12[%c0_42, %c0_43] : memref<16x128xf32, #tpu.memory_space<vmem>>, vector<16x128xf32>
      %77 = arith.mulf %70, %76 : vector<16x128xf32>
      %78 = arith.addf %75, %77 : vector<16x128xf32>
      %79 = math.tanh %78 : vector<16x128xf32>
      %80 = arith.mulf %71, %79 : vector<16x128xf32>
      %c0_44 = arith.constant 0 : index
      %c0_45 = arith.constant 0 : index
      %81 = vector.load %arg12[%c0_44, %c0_45] : memref<16x128xf32, #tpu.memory_space<vmem>>, vector<16x128xf32>
      tpu.vector_store %arg12[%c0_44, %c0_45], %78 {strides = array<i32>} : memref<16x128xf32, #tpu.memory_space<vmem>>, vector<16x128xf32>,
      %c0_46 = arith.constant 0 : index
      %c0_47 = arith.constant 0 : index
      %82 = vector.load %arg11[%c0_46, %c0_47] : memref<16x128xf32, #tpu.memory_space<vmem>>, vector<16x128xf32>
      tpu.vector_store %arg11[%c0_46, %c0_47], %80 {strides = array<i32>} : memref<16x128xf32, #tpu.memory_space<vmem>>, vector<16x128xf32>,
      %83 = arith.index_cast %c3_i32 : i32 to index
      %c0_48 = arith.constant 0 : index
      %c0_49 = arith.constant 0 : index
      %84 = vector.load %arg8[%83, %c0_48, %c0_49] : memref<8x16x128xf32, #tpu.memory_space<vmem>>, vector<1x16x128xf32>
      %85 = vector.shape_cast %84 : vector<1x16x128xf32> to vector<16x128xf32>
      %86 = vector.shape_cast %80 : vector<16x128xf32> to vector<1x16x128xf32>
      tpu.vector_store %arg8[%83, %c0_48, %c0_49], %86 {strides = array<i32>} : memref<8x16x128xf32, #tpu.memory_space<vmem>>, vector<1x16x128xf32>,
    } else {
    }
    %c4_i32 = arith.constant 4 : i32
    %c8_i32_20 = arith.constant 8 : i32
    %31 = arith.muli %arg1, %c8_i32_20 : i32
    %32 = arith.addi %31, %c4_i32 : i32
    %c10_i32_21 = arith.constant 10 : i32
    %33 = arith.cmpi slt, %32, %c10_i32_21 : i32
    %34 = arith.extui %33 : i1 to i32
    %c0_i32_22 = arith.constant 0 : i32
    %35 = arith.cmpi ne, %34, %c0_i32_22 : i32
    scf.if %35 {
      %c0_35 = arith.constant 0 : index
      %c0_36 = arith.constant 0 : index
      %54 = vector.load %arg11[%c0_35, %c0_36] : memref<16x128xf32, #tpu.memory_space<vmem>>, vector<16x128xf32>
      %55 = arith.truncf %54 : vector<16x128xf32> to vector<16x128xbf16>
      %c16_i32 = arith.constant 16 : i32
      %56 = arith.muli %c4_i32, %c16_i32 : i32
      %57 = tpu.assume_multiple %56, 16 : i32
      %58 = arith.index_cast %57 : i32 to index
      %c0_37 = arith.constant 0 : index
      %59 = vector.load %arg10[%58, %c0_37] : memref<128x640xf32, #tpu.memory_space<vmem>>, vector<16x640xf32>
      %c0_38 = arith.constant 0 : index
      %c0_39 = arith.constant 0 : index
      %60 = vector.load %arg4[%c0_38, %c0_39] : memref<128x640xbf16, #tpu.memory_space<vmem>>, vector<128x640xbf16>
      %cst_40 = arith.constant dense<0.000000e+00> : vector<16x640xf32>
      %61 = tpu.matmul %55, %60, %cst_40 {dimension_numbers = #tpu.dot_dimension_numbers<[1], [0], [0], [1], [0, 0, 1, 1], [], []>} : vector<16x128xbf16>, vector<128x640xbf16>, vector<16x640xf32> -> vector<16x640xf32>
      %62 = arith.addf %59, %61 : vector<16x640xf32>
      %63 = vector.extract_strided_slice %62 {offsets = [0, 0], sizes = [16, 384], strides = [1, 1]} : vector<16x640xf32> to vector<16x384xf32>
      %64 = arith.negf %63 : vector<16x384xf32>
      %65 = math.exp %64 : vector<16x384xf32>
      %cst_41 = arith.constant 1.000000e+00 : f32
      %66 = vector.broadcast %cst_41 : f32 to vector<16x384xf32>
      %67 = arith.addf %66, %65 : vector<16x384xf32>
      %68 = arith.divf %66, %67 : vector<16x384xf32>
      %69 = vector.extract_strided_slice %68 {offsets = [0, 0], sizes = [16, 128], strides = [1, 1]} : vector<16x384xf32> to vector<16x128xf32>
      %70 = vector.extract_strided_slice %68 {offsets = [0, 128], sizes = [16, 128], strides = [1, 1]} : vector<16x384xf32> to vector<16x128xf32>
      %71 = vector.extract_strided_slice %68 {offsets = [0, 256], sizes = [16, 128], strides = [1, 1]} : vector<16x384xf32> to vector<16x128xf32>
      %72 = vector.extract_strided_slice %62 {offsets = [0, 384], sizes = [16, 128], strides = [1, 1]} : vector<16x640xf32> to vector<16x128xf32>
      %73 = vector.extract_strided_slice %62 {offsets = [0, 512], sizes = [16, 128], strides = [1, 1]} : vector<16x640xf32> to vector<16x128xf32>
      %74 = arith.maximumf %72, %73 : vector<16x128xf32>
      %75 = arith.mulf %69, %74 : vector<16x128xf32>
      %c0_42 = arith.constant 0 : index
      %c0_43 = arith.constant 0 : index
      %76 = vector.load %arg12[%c0_42, %c0_43] : memref<16x128xf32, #tpu.memory_space<vmem>>, vector<16x128xf32>
      %77 = arith.mulf %70, %76 : vector<16x128xf32>
      %78 = arith.addf %75, %77 : vector<16x128xf32>
      %79 = math.tanh %78 : vector<16x128xf32>
      %80 = arith.mulf %71, %79 : vector<16x128xf32>
      %c0_44 = arith.constant 0 : index
      %c0_45 = arith.constant 0 : index
      %81 = vector.load %arg12[%c0_44, %c0_45] : memref<16x128xf32, #tpu.memory_space<vmem>>, vector<16x128xf32>
      tpu.vector_store %arg12[%c0_44, %c0_45], %78 {strides = array<i32>} : memref<16x128xf32, #tpu.memory_space<vmem>>, vector<16x128xf32>,
      %c0_46 = arith.constant 0 : index
      %c0_47 = arith.constant 0 : index
      %82 = vector.load %arg11[%c0_46, %c0_47] : memref<16x128xf32, #tpu.memory_space<vmem>>, vector<16x128xf32>
      tpu.vector_store %arg11[%c0_46, %c0_47], %80 {strides = array<i32>} : memref<16x128xf32, #tpu.memory_space<vmem>>, vector<16x128xf32>,
      %83 = arith.index_cast %c4_i32 : i32 to index
      %c0_48 = arith.constant 0 : index
      %c0_49 = arith.constant 0 : index
      %84 = vector.load %arg8[%83, %c0_48, %c0_49] : memref<8x16x128xf32, #tpu.memory_space<vmem>>, vector<1x16x128xf32>
      %85 = vector.shape_cast %84 : vector<1x16x128xf32> to vector<16x128xf32>
      %86 = vector.shape_cast %80 : vector<16x128xf32> to vector<1x16x128xf32>
      tpu.vector_store %arg8[%83, %c0_48, %c0_49], %86 {strides = array<i32>} : memref<8x16x128xf32, #tpu.memory_space<vmem>>, vector<1x16x128xf32>,
    } else {
    }
    %c5_i32 = arith.constant 5 : i32
    %c8_i32_23 = arith.constant 8 : i32
    %36 = arith.muli %arg1, %c8_i32_23 : i32
    %37 = arith.addi %36, %c5_i32 : i32
    %c10_i32_24 = arith.constant 10 : i32
    %38 = arith.cmpi slt, %37, %c10_i32_24 : i32
    %39 = arith.extui %38 : i1 to i32
    %c0_i32_25 = arith.constant 0 : i32
    %40 = arith.cmpi ne, %39, %c0_i32_25 : i32
    scf.if %40 {
      %c0_35 = arith.constant 0 : index
      %c0_36 = arith.constant 0 : index
      %54 = vector.load %arg11[%c0_35, %c0_36] : memref<16x128xf32, #tpu.memory_space<vmem>>, vector<16x128xf32>
      %55 = arith.truncf %54 : vector<16x128xf32> to vector<16x128xbf16>
      %c16_i32 = arith.constant 16 : i32
      %56 = arith.muli %c5_i32, %c16_i32 : i32
      %57 = tpu.assume_multiple %56, 16 : i32
      %58 = arith.index_cast %57 : i32 to index
      %c0_37 = arith.constant 0 : index
      %59 = vector.load %arg10[%58, %c0_37] : memref<128x640xf32, #tpu.memory_space<vmem>>, vector<16x640xf32>
      %c0_38 = arith.constant 0 : index
      %c0_39 = arith.constant 0 : index
      %60 = vector.load %arg4[%c0_38, %c0_39] : memref<128x640xbf16, #tpu.memory_space<vmem>>, vector<128x640xbf16>
      %cst_40 = arith.constant dense<0.000000e+00> : vector<16x640xf32>
      %61 = tpu.matmul %55, %60, %cst_40 {dimension_numbers = #tpu.dot_dimension_numbers<[1], [0], [0], [1], [0, 0, 1, 1], [], []>} : vector<16x128xbf16>, vector<128x640xbf16>, vector<16x640xf32> -> vector<16x640xf32>
      %62 = arith.addf %59, %61 : vector<16x640xf32>
      %63 = vector.extract_strided_slice %62 {offsets = [0, 0], sizes = [16, 384], strides = [1, 1]} : vector<16x640xf32> to vector<16x384xf32>
      %64 = arith.negf %63 : vector<16x384xf32>
      %65 = math.exp %64 : vector<16x384xf32>
      %cst_41 = arith.constant 1.000000e+00 : f32
      %66 = vector.broadcast %cst_41 : f32 to vector<16x384xf32>
      %67 = arith.addf %66, %65 : vector<16x384xf32>
      %68 = arith.divf %66, %67 : vector<16x384xf32>
      %69 = vector.extract_strided_slice %68 {offsets = [0, 0], sizes = [16, 128], strides = [1, 1]} : vector<16x384xf32> to vector<16x128xf32>
      %70 = vector.extract_strided_slice %68 {offsets = [0, 128], sizes = [16, 128], strides = [1, 1]} : vector<16x384xf32> to vector<16x128xf32>
      %71 = vector.extract_strided_slice %68 {offsets = [0, 256], sizes = [16, 128], strides = [1, 1]} : vector<16x384xf32> to vector<16x128xf32>
      %72 = vector.extract_strided_slice %62 {offsets = [0, 384], sizes = [16, 128], strides = [1, 1]} : vector<16x640xf32> to vector<16x128xf32>
      %73 = vector.extract_strided_slice %62 {offsets = [0, 512], sizes = [16, 128], strides = [1, 1]} : vector<16x640xf32> to vector<16x128xf32>
      %74 = arith.maximumf %72, %73 : vector<16x128xf32>
      %75 = arith.mulf %69, %74 : vector<16x128xf32>
      %c0_42 = arith.constant 0 : index
      %c0_43 = arith.constant 0 : index
      %76 = vector.load %arg12[%c0_42, %c0_43] : memref<16x128xf32, #tpu.memory_space<vmem>>, vector<16x128xf32>
      %77 = arith.mulf %70, %76 : vector<16x128xf32>
      %78 = arith.addf %75, %77 : vector<16x128xf32>
      %79 = math.tanh %78 : vector<16x128xf32>
      %80 = arith.mulf %71, %79 : vector<16x128xf32>
      %c0_44 = arith.constant 0 : index
      %c0_45 = arith.constant 0 : index
      %81 = vector.load %arg12[%c0_44, %c0_45] : memref<16x128xf32, #tpu.memory_space<vmem>>, vector<16x128xf32>
      tpu.vector_store %arg12[%c0_44, %c0_45], %78 {strides = array<i32>} : memref<16x128xf32, #tpu.memory_space<vmem>>, vector<16x128xf32>,
      %c0_46 = arith.constant 0 : index
      %c0_47 = arith.constant 0 : index
      %82 = vector.load %arg11[%c0_46, %c0_47] : memref<16x128xf32, #tpu.memory_space<vmem>>, vector<16x128xf32>
      tpu.vector_store %arg11[%c0_46, %c0_47], %80 {strides = array<i32>} : memref<16x128xf32, #tpu.memory_space<vmem>>, vector<16x128xf32>,
      %83 = arith.index_cast %c5_i32 : i32 to index
      %c0_48 = arith.constant 0 : index
      %c0_49 = arith.constant 0 : index
      %84 = vector.load %arg8[%83, %c0_48, %c0_49] : memref<8x16x128xf32, #tpu.memory_space<vmem>>, vector<1x16x128xf32>
      %85 = vector.shape_cast %84 : vector<1x16x128xf32> to vector<16x128xf32>
      %86 = vector.shape_cast %80 : vector<16x128xf32> to vector<1x16x128xf32>
      tpu.vector_store %arg8[%83, %c0_48, %c0_49], %86 {strides = array<i32>} : memref<8x16x128xf32, #tpu.memory_space<vmem>>, vector<1x16x128xf32>,
    } else {
    }
    %c6_i32 = arith.constant 6 : i32
    %c8_i32_26 = arith.constant 8 : i32
    %41 = arith.muli %arg1, %c8_i32_26 : i32
    %42 = arith.addi %41, %c6_i32 : i32
    %c10_i32_27 = arith.constant 10 : i32
    %43 = arith.cmpi slt, %42, %c10_i32_27 : i32
    %44 = arith.extui %43 : i1 to i32
    %c0_i32_28 = arith.constant 0 : i32
    %45 = arith.cmpi ne, %44, %c0_i32_28 : i32
    scf.if %45 {
      %c0_35 = arith.constant 0 : index
      %c0_36 = arith.constant 0 : index
      %54 = vector.load %arg11[%c0_35, %c0_36] : memref<16x128xf32, #tpu.memory_space<vmem>>, vector<16x128xf32>
      %55 = arith.truncf %54 : vector<16x128xf32> to vector<16x128xbf16>
      %c16_i32 = arith.constant 16 : i32
      %56 = arith.muli %c6_i32, %c16_i32 : i32
      %57 = tpu.assume_multiple %56, 16 : i32
      %58 = arith.index_cast %57 : i32 to index
      %c0_37 = arith.constant 0 : index
      %59 = vector.load %arg10[%58, %c0_37] : memref<128x640xf32, #tpu.memory_space<vmem>>, vector<16x640xf32>
      %c0_38 = arith.constant 0 : index
      %c0_39 = arith.constant 0 : index
      %60 = vector.load %arg4[%c0_38, %c0_39] : memref<128x640xbf16, #tpu.memory_space<vmem>>, vector<128x640xbf16>
      %cst_40 = arith.constant dense<0.000000e+00> : vector<16x640xf32>
      %61 = tpu.matmul %55, %60, %cst_40 {dimension_numbers = #tpu.dot_dimension_numbers<[1], [0], [0], [1], [0, 0, 1, 1], [], []>} : vector<16x128xbf16>, vector<128x640xbf16>, vector<16x640xf32> -> vector<16x640xf32>
      %62 = arith.addf %59, %61 : vector<16x640xf32>
      %63 = vector.extract_strided_slice %62 {offsets = [0, 0], sizes = [16, 384], strides = [1, 1]} : vector<16x640xf32> to vector<16x384xf32>
      %64 = arith.negf %63 : vector<16x384xf32>
      %65 = math.exp %64 : vector<16x384xf32>
      %cst_41 = arith.constant 1.000000e+00 : f32
      %66 = vector.broadcast %cst_41 : f32 to vector<16x384xf32>
      %67 = arith.addf %66, %65 : vector<16x384xf32>
      %68 = arith.divf %66, %67 : vector<16x384xf32>
      %69 = vector.extract_strided_slice %68 {offsets = [0, 0], sizes = [16, 128], strides = [1, 1]} : vector<16x384xf32> to vector<16x128xf32>
      %70 = vector.extract_strided_slice %68 {offsets = [0, 128], sizes = [16, 128], strides = [1, 1]} : vector<16x384xf32> to vector<16x128xf32>
      %71 = vector.extract_strided_slice %68 {offsets = [0, 256], sizes = [16, 128], strides = [1, 1]} : vector<16x384xf32> to vector<16x128xf32>
      %72 = vector.extract_strided_slice %62 {offsets = [0, 384], sizes = [16, 128], strides = [1, 1]} : vector<16x640xf32> to vector<16x128xf32>
      %73 = vector.extract_strided_slice %62 {offsets = [0, 512], sizes = [16, 128], strides = [1, 1]} : vector<16x640xf32> to vector<16x128xf32>
      %74 = arith.maximumf %72, %73 : vector<16x128xf32>
      %75 = arith.mulf %69, %74 : vector<16x128xf32>
      %c0_42 = arith.constant 0 : index
      %c0_43 = arith.constant 0 : index
      %76 = vector.load %arg12[%c0_42, %c0_43] : memref<16x128xf32, #tpu.memory_space<vmem>>, vector<16x128xf32>
      %77 = arith.mulf %70, %76 : vector<16x128xf32>
      %78 = arith.addf %75, %77 : vector<16x128xf32>
      %79 = math.tanh %78 : vector<16x128xf32>
      %80 = arith.mulf %71, %79 : vector<16x128xf32>
      %c0_44 = arith.constant 0 : index
      %c0_45 = arith.constant 0 : index
      %81 = vector.load %arg12[%c0_44, %c0_45] : memref<16x128xf32, #tpu.memory_space<vmem>>, vector<16x128xf32>
      tpu.vector_store %arg12[%c0_44, %c0_45], %78 {strides = array<i32>} : memref<16x128xf32, #tpu.memory_space<vmem>>, vector<16x128xf32>,
      %c0_46 = arith.constant 0 : index
      %c0_47 = arith.constant 0 : index
      %82 = vector.load %arg11[%c0_46, %c0_47] : memref<16x128xf32, #tpu.memory_space<vmem>>, vector<16x128xf32>
      tpu.vector_store %arg11[%c0_46, %c0_47], %80 {strides = array<i32>} : memref<16x128xf32, #tpu.memory_space<vmem>>, vector<16x128xf32>,
      %83 = arith.index_cast %c6_i32 : i32 to index
      %c0_48 = arith.constant 0 : index
      %c0_49 = arith.constant 0 : index
      %84 = vector.load %arg8[%83, %c0_48, %c0_49] : memref<8x16x128xf32, #tpu.memory_space<vmem>>, vector<1x16x128xf32>
      %85 = vector.shape_cast %84 : vector<1x16x128xf32> to vector<16x128xf32>
      %86 = vector.shape_cast %80 : vector<16x128xf32> to vector<1x16x128xf32>
      tpu.vector_store %arg8[%83, %c0_48, %c0_49], %86 {strides = array<i32>} : memref<8x16x128xf32, #tpu.memory_space<vmem>>, vector<1x16x128xf32>,
    } else {
    }
    %c7_i32 = arith.constant 7 : i32
    %c8_i32_29 = arith.constant 8 : i32
    %46 = arith.muli %arg1, %c8_i32_29 : i32
    %47 = arith.addi %46, %c7_i32 : i32
    %c10_i32_30 = arith.constant 10 : i32
    %48 = arith.cmpi slt, %47, %c10_i32_30 : i32
    %49 = arith.extui %48 : i1 to i32
    %c0_i32_31 = arith.constant 0 : i32
    %50 = arith.cmpi ne, %49, %c0_i32_31 : i32
    scf.if %50 {
      %c0_35 = arith.constant 0 : index
      %c0_36 = arith.constant 0 : index
      %54 = vector.load %arg11[%c0_35, %c0_36] : memref<16x128xf32, #tpu.memory_space<vmem>>, vector<16x128xf32>
      %55 = arith.truncf %54 : vector<16x128xf32> to vector<16x128xbf16>
      %c16_i32 = arith.constant 16 : i32
      %56 = arith.muli %c7_i32, %c16_i32 : i32
      %57 = tpu.assume_multiple %56, 16 : i32
      %58 = arith.index_cast %57 : i32 to index
      %c0_37 = arith.constant 0 : index
      %59 = vector.load %arg10[%58, %c0_37] : memref<128x640xf32, #tpu.memory_space<vmem>>, vector<16x640xf32>
      %c0_38 = arith.constant 0 : index
      %c0_39 = arith.constant 0 : index
      %60 = vector.load %arg4[%c0_38, %c0_39] : memref<128x640xbf16, #tpu.memory_space<vmem>>, vector<128x640xbf16>
      %cst_40 = arith.constant dense<0.000000e+00> : vector<16x640xf32>
      %61 = tpu.matmul %55, %60, %cst_40 {dimension_numbers = #tpu.dot_dimension_numbers<[1], [0], [0], [1], [0, 0, 1, 1], [], []>} : vector<16x128xbf16>, vector<128x640xbf16>, vector<16x640xf32> -> vector<16x640xf32>
      %62 = arith.addf %59, %61 : vector<16x640xf32>
      %63 = vector.extract_strided_slice %62 {offsets = [0, 0], sizes = [16, 384], strides = [1, 1]} : vector<16x640xf32> to vector<16x384xf32>
      %64 = arith.negf %63 : vector<16x384xf32>
      %65 = math.exp %64 : vector<16x384xf32>
      %cst_41 = arith.constant 1.000000e+00 : f32
      %66 = vector.broadcast %cst_41 : f32 to vector<16x384xf32>
      %67 = arith.addf %66, %65 : vector<16x384xf32>
      %68 = arith.divf %66, %67 : vector<16x384xf32>
      %69 = vector.extract_strided_slice %68 {offsets = [0, 0], sizes = [16, 128], strides = [1, 1]} : vector<16x384xf32> to vector<16x128xf32>
      %70 = vector.extract_strided_slice %68 {offsets = [0, 128], sizes = [16, 128], strides = [1, 1]} : vector<16x384xf32> to vector<16x128xf32>
      %71 = vector.extract_strided_slice %68 {offsets = [0, 256], sizes = [16, 128], strides = [1, 1]} : vector<16x384xf32> to vector<16x128xf32>
      %72 = vector.extract_strided_slice %62 {offsets = [0, 384], sizes = [16, 128], strides = [1, 1]} : vector<16x640xf32> to vector<16x128xf32>
      %73 = vector.extract_strided_slice %62 {offsets = [0, 512], sizes = [16, 128], strides = [1, 1]} : vector<16x640xf32> to vector<16x128xf32>
      %74 = arith.maximumf %72, %73 : vector<16x128xf32>
      %75 = arith.mulf %69, %74 : vector<16x128xf32>
      %c0_42 = arith.constant 0 : index
      %c0_43 = arith.constant 0 : index
      %76 = vector.load %arg12[%c0_42, %c0_43] : memref<16x128xf32, #tpu.memory_space<vmem>>, vector<16x128xf32>
      %77 = arith.mulf %70, %76 : vector<16x128xf32>
      %78 = arith.addf %75, %77 : vector<16x128xf32>
      %79 = math.tanh %78 : vector<16x128xf32>
      %80 = arith.mulf %71, %79 : vector<16x128xf32>
      %c0_44 = arith.constant 0 : index
      %c0_45 = arith.constant 0 : index
      %81 = vector.load %arg12[%c0_44, %c0_45] : memref<16x128xf32, #tpu.memory_space<vmem>>, vector<16x128xf32>
      tpu.vector_store %arg12[%c0_44, %c0_45], %78 {strides = array<i32>} : memref<16x128xf32, #tpu.memory_space<vmem>>, vector<16x128xf32>,
      %c0_46 = arith.constant 0 : index
      %c0_47 = arith.constant 0 : index
      %82 = vector.load %arg11[%c0_46, %c0_47] : memref<16x128xf32, #tpu.memory_space<vmem>>, vector<16x128xf32>
      tpu.vector_store %arg11[%c0_46, %c0_47], %80 {strides = array<i32>} : memref<16x128xf32, #tpu.memory_space<vmem>>, vector<16x128xf32>,
      %83 = arith.index_cast %c7_i32 : i32 to index
      %c0_48 = arith.constant 0 : index
      %c0_49 = arith.constant 0 : index
      %84 = vector.load %arg8[%83, %c0_48, %c0_49] : memref<8x16x128xf32, #tpu.memory_space<vmem>>, vector<1x16x128xf32>
      %85 = vector.shape_cast %84 : vector<1x16x128xf32> to vector<16x128xf32>
      %86 = vector.shape_cast %80 : vector<16x128xf32> to vector<1x16x128xf32>
      tpu.vector_store %arg8[%83, %c0_48, %c0_49], %86 {strides = array<i32>} : memref<8x16x128xf32, #tpu.memory_space<vmem>>, vector<1x16x128xf32>,
    } else {
    }
    %c8_i32_32 = arith.constant 8 : i32
    %c1_i32_33 = arith.constant 1 : i32
    %51 = arith.cmpi eq, %arg1, %c1_i32_33 : i32
    %52 = arith.extui %51 : i1 to i32
    %c0_i32_34 = arith.constant 0 : i32
    %53 = arith.cmpi ne, %52, %c0_i32_34 : i32
    scf.if %53 {
      %c0_35 = arith.constant 0 : index
      %c0_36 = arith.constant 0 : index
      %54 = vector.load %arg12[%c0_35, %c0_36] : memref<16x128xf32, #tpu.memory_space<vmem>>, vector<16x128xf32>
      %c0_37 = arith.constant 0 : index
      %c0_38 = arith.constant 0 : index
      %55 = vector.load %arg9[%c0_37, %c0_38] : memref<16x128xf32, #tpu.memory_space<vmem>>, vector<16x128xf32>
      tpu.vector_store %arg9[%c0_37, %c0_38], %54 {strides = array<i32>} : memref<16x128xf32, #tpu.memory_space<vmem>>, vector<16x128xf32>,
    } else {
    }
    return
  }
  func.func @transform_0(%arg0: i32, %arg1: i32) -> (i32, i32, i32) {
    %c0_i32 = arith.constant 0 : i32
    %c0_i32_0 = arith.constant 0 : i32
    return %arg1, %arg0, %c0_i32 : i32, i32, i32
  }
  func.func @transform_1(%arg0: i32, %arg1: i32) -> (i32, i32) {
    %c0_i32 = arith.constant 0 : i32
    %c0_i32_0 = arith.constant 0 : i32
    %c0_i32_1 = arith.constant 0 : i32
    return %c0_i32, %c0_i32_0 : i32, i32
  }
  func.func @transform_2(%arg0: i32, %arg1: i32) -> (i32, i32) {
    %c0_i32 = arith.constant 0 : i32
    %c0_i32_0 = arith.constant 0 : i32
    %c0_i32_1 = arith.constant 0 : i32
    return %c0_i32, %c0_i32_0 : i32, i32
  }
  func.func @transform_3(%arg0: i32, %arg1: i32) -> (i32, i32) {
    %c0_i32 = arith.constant 0 : i32
    %c0_i32_0 = arith.constant 0 : i32
    %c0_i32_1 = arith.constant 0 : i32
    return %c0_i32, %c0_i32_0 : i32, i32
  }
  func.func @transform_4(%arg0: i32, %arg1: i32) -> (i32, i32) {
    %c0_i32 = arith.constant 0 : i32
    %c0_i32_0 = arith.constant 0 : i32
    return %arg0, %c0_i32 : i32, i32
  }
  func.func @transform_5(%arg0: i32, %arg1: i32) -> (i32, i32) {
    %c0_i32 = arith.constant 0 : i32
    %c0_i32_0 = arith.constant 0 : i32
    return %arg0, %c0_i32 : i32, i32
  }
  func.func @transform_6(%arg0: i32, %arg1: i32) -> (i32, i32, i32) {
    %c0_i32 = arith.constant 0 : i32
    %c0_i32_0 = arith.constant 0 : i32
    return %arg1, %arg0, %c0_i32 : i32, i32, i32
  }
  func.func @transform_7(%arg0: i32, %arg1: i32) -> (i32, i32) {
    %c0_i32 = arith.constant 0 : i32
    %c0_i32_0 = arith.constant 0 : i32
    return %arg0, %c0_i32 : i32, i32
  }
}

</mosaic_0001>

<bundles_post_ra>
// kernel: lstm_sequence_pallas.1
= control target key start
LH: loop header
LB: loop body
LE: loop exit
PB: predicated region body
PF: predicated region fallthrough
CT: control target
= control target key end

     0   :  { %s6710_s24 = smov 0   ;;  %s6712_s25 = smov 0   ;;  %s8005_s0 = inlined_call_operand.vmem [shape: bf16[16,16,128], index: 0, kind: input, shape index: {}]   ;;  %s8006_s1 = inlined_call_operand.vmem [shape: bf16[128,640], index: 1, kind: input, shape index: {}]   ;;  %s8007_s2 = inlined_call_operand.vmem [shape: bf16[128,640], index: 2, kind: input, shape index: {}]   ;;  %s8008_s3 = inlined_call_operand.vmem [shape: f32[1,640], index: 3, kind: input, shape index: {}]   ;;  %s8009_s4 = inlined_call_operand.vmem [shape: f32[16,128], index: 4, kind: input, shape index: {}]   ;;  %s8010_s5 = inlined_call_operand.vmem [shape: f32[16,128], index: 5, kind: input, shape index: {}]   ;;  %s8011_s6 = inlined_call_operand.vmem [shape: f32[16,16,128], index: 6, kind: output, shape index: {0}]   ;;  %s8012_s7 = inlined_call_operand.vmem [shape: f32[16,128], index: 7, kind: output, shape index: {1}]  }
   0x1   :  { %s6714_s26 = smov 0  }
   0x2 LB: > { %s27_s27 = sadd.s32 1, %s6639_s25  ;;  %p5086_p0 = scmp.ge.s32.totalorder %s6643_s26, 1  ;;  %s6643_s26 = sphi %s6714_s26, %s18_s26   ;;  %s6639_s25 = sphi %s6712_s25, %s8014_s25   ;;  %s6635_s24 = sphi %s6710_s24, %s8013_s24  }
   0x3   : > { %p28_p1 = scmp.ge.s32.totalorder %s27_s27, 2  ;;  %p285_p2 = scmp.lt.s32.totalorder %s6643_s26, 3 }
   0x5   : > { %s8016_s27 = smov (%p28_p1, %s27_s27), 0  ;;  %p286_p3 = pnand %p5086_p0, %p285_p2 }
   0x6   : > { %s6731_s28 = sshll.u32 (!%p286_p3), %s6635_s24, 3  ;;  %p5093_p5 = scmp.ne.s32.totalorder (!%p286_p3), %s6635_s24, 0 }
   0x7   : > { %289 = sbr.rel (%p286_p3) target bundleno = 2777 (0xad9), region = 44  ;;  %p344_p4 = scmp.lt.s32.totalorder (!%p286_p3), %s6731_s28, 15 }
   0xe   : > { %s345_s29 = scalar_select %p344_p4, %s6731_s28, 15 }
   0xf   : > { %388 = sbr.rel (%p5093_p5) target bundleno = 22 (0x16), region = 48  ;;  %v389_v0 = vld [vmem:[%s8009_s4] sm:$0xff] (!%p5093_p5)  ;;  %v390_v1 = vld [vmem:[%s8009_s4 + $0x8] sm:$0xff] (!%p5093_p5) }
  0x10   : > { %s5538_s30 = sshll.u32 %s345_s29, 3  ;;  %s5539_s8 = sshll.u32 %s345_s29, 4  ;;  %v393_v2 = vld [vmem:[%s8010_s5] sm:$0xff] (!%p5093_p5)  ;;  %391 = vst [vmem:[#allocation3] sm:$0xff] (!%p5093_p5), %v389_v0  ;;  %392 = vst [vmem:[#allocation3 + $0x8] sm:$0xff] (!%p5093_p5), %v390_v1  ;;  %v394_v3 = vld [vmem:[%s8010_s5 + $0x8] sm:$0xff] (!%p5093_p5) }
  0x11   : > { %s6738_s11 = scalar_lea.vmem %s8005_s0, %s5538_s30  ;;  %s6743_s14 = scalar_lea.vmem %s8011_s6, %s5539_s8  ;;  %395 = vst [vmem:[#allocation4] sm:$0xff] (!%p5093_p5), %v393_v2  ;;  %396 = vst [vmem:[#allocation4 + $0x8] sm:$0xff] (!%p5093_p5), %v394_v3 }
  0x16 PF: > { %v5885_v4 = vld [vmem:[%s8006_s1 + $0x4] ss:$20 sps:$4 sm:$0xff]   ;;  %v5887_v5 = vld [vmem:[%s8006_s1 + $0xc] ss:$20 sps:$4 sm:$0xff]   ;;  %v6645_v6 = vmov 0   ;;  %v5937_v44 = vld [vmem:[%s6738_s11 + $0x10] sm:$0xff]   ;;  %v463_v53 = vlaneseq }
  0x17   : > { %776 = vmatprep.mubr.bf16.mxu0 %v6645_v6  ;;  %889 = vmatprep.mubr.bf16.mxu1 %v6645_v6  ;;  %v5889_v7 = vld [vmem:[%s8006_s1] ss:$20 sps:$4 sm:$0xff]   ;;  %v5890_v8 = vld [vmem:[%s8006_s1 + $0x8] ss:$20 sps:$4 sm:$0xff]   ;;  %v5896_v12 = vld [vmem:[%s8006_s1 + $0x30] ss:$20 sps:$4 sm:$0xff]  }
  0x18   : > { %744 = vmatprep.subr.bf16.mxu0 %v5885_v4  ;;  %857 = vmatprep.subr.bf16.mxu1 %v5887_v5  ;;  %v5891_v9 = vld [vmem:[%s8006_s1 + $0x2c] ss:$20 sps:$4 sm:$0xff]   ;;  %v5893_v10 = vld [vmem:[%s8006_s1 + $0x34] ss:$20 sps:$4 sm:$0xff]   ;;  %v5899_v14 = vld [vmem:[%s8006_s1 + $0x5c] ss:$20 sps:$4 sm:$0xff]  }
  0x19   : > { %745 = vmatpush1.bf16.msra.mxu0 %v5889_v7  ;;  %858 = vmatpush1.bf16.msra.mxu1 %v5890_v8  ;;  %v5895_v11 = vld [vmem:[%s8006_s1 + $0x28] ss:$20 sps:$4 sm:$0xff]   ;;  %v5901_v15 = vld [vmem:[%s8006_s1 + $0x50] ss:$20 sps:$4 sm:$0xff]   ;;  %v5902_v16 = vld [vmem:[%s8006_s1 + $0x58] ss:$20 sps:$4 sm:$0xff]  }
  0x1a   : > { %746 = vmatprep.subr.bf16.mxu0 %v5891_v9  ;;  %859 = vmatprep.subr.bf16.mxu1 %v5893_v10  ;;  %v5897_v13 = vld [vmem:[%s8006_s1 + $0x54] ss:$20 sps:$4 sm:$0xff]   ;;  %v5903_v17 = vld [vmem:[%s8006_s1 + $0x7c] ss:$20 sps:$4 sm:$0xff]   ;;  %v5905_v18 = vld [vmem:[%s8006_s1 + $0x84] ss:$20 sps:$4 sm:$0xff]  }
  0x1b   : > { %v5907_v19 = vld [vmem:[%s8006_s1 + $0x78] ss:$20 sps:$4 sm:$0xff]   ;;  %v5908_v20 = vld [vmem:[%s8006_s1 + $0x80] ss:$20 sps:$4 sm:$0xff]   ;;  %v5914_v24 = vld [vmem:[%s8006_s1 + $0xa8] ss:$20 sps:$4 sm:$0xff]  }
  0x1c   : > { %v5909_v21 = vld [vmem:[%s8006_s1 + $0xa4] ss:$20 sps:$4 sm:$0xff]   ;;  %v5911_v22 = vld [vmem:[%s8006_s1 + $0xac] ss:$20 sps:$4 sm:$0xff]   ;;  %v5917_v26 = vld [vmem:[%s8006_s1 + $0xd4] ss:$20 sps:$4 sm:$0xff]  }
  0x1d   : > { %747 = vmatpush1.bf16.msra.mxu0 %v5895_v11  ;;  %860 = vmatpush1.bf16.msra.mxu1 %v5896_v12  ;;  %v5913_v23 = vld [vmem:[%s8006_s1 + $0xa0] ss:$20 sps:$4 sm:$0xff]   ;;  %v5919_v27 = vld [vmem:[%s8006_s1 + $0xc8] ss:$20 sps:$4 sm:$0xff]   ;;  %v5920_v28 = vld [vmem:[%s8006_s1 + $0xd0] ss:$20 sps:$4 sm:$0xff]  }
  0x1e   : > { %748 = vmatprep.subr.bf16.mxu0 %v5897_v13  ;;  %861 = vmatprep.subr.bf16.mxu1 %v5899_v14  ;;  %v5915_v25 = vld [vmem:[%s8006_s1 + $0xcc] ss:$20 sps:$4 sm:$0xff]   ;;  %v5921_v29 = vld [vmem:[%s8006_s1 + $0xf4] ss:$20 sps:$4 sm:$0xff]   ;;  %v5923_v30 = vld [vmem:[%s8006_s1 + $0xfc] ss:$20 sps:$4 sm:$0xff]  }
  0x1f   : > { %v5925_v31 = vld [vmem:[%s8006_s1 + $0xf0] ss:$20 sps:$4 sm:$0xff]   ;;  %v5926_v32 = vld [vmem:[%s8006_s1 + $0xf8] ss:$20 sps:$4 sm:$0xff]   ;;  %v5932_v36 = vld [vmem:[%s8006_s1 + $0x120] ss:$20 sps:$4 sm:$0xff]  }
  0x20   : > { %v5927_v33 = vld [vmem:[%s8006_s1 + $0x11c] ss:$20 sps:$4 sm:$0xff]   ;;  %v5929_v34 = vld [vmem:[%s8006_s1 + $0x124] ss:$20 sps:$4 sm:$0xff]   ;;  %v5938_v40 = vld [vmem:[%s8006_s1 + $0x60] ss:$20 sps:$4 sm:$0xff]  }
  0x21   : > { %749 = vmatpush1.bf16.msra.mxu0 %v5901_v15  ;;  %862 = vmatpush1.bf16.msra.mxu1 %v5902_v16  ;;  %v5931_v35 = vld [vmem:[%s8006_s1 + $0x118] ss:$20 sps:$4 sm:$0xff]   ;;  %v5934_v37 = vld [vmem:[%s8006_s1 + $0x10] ss:$20 sps:$4 sm:$0xff]   ;;  %v5940_v42 = vld [vmem:[%s8006_s1 + $0x88] ss:$20 sps:$4 sm:$0xff]  }
  0x22   : > { %750 = vmatprep.subr.bf16.mxu0 %v5903_v17  ;;  %863 = vmatprep.subr.bf16.mxu1 %v5905_v18  ;;  %v6860_v38 = vld [vmem:[%s6738_s11] sm:$0xff]   ;;  %v5936_v39 = vld [vmem:[%s8006_s1 + $0x38] ss:$20 sps:$4 sm:$0xff]   ;;  %v5948_v48 = vld [vmem:[%s8006_s1 + $0x128] ss:$20 sps:$4 sm:$0xff]   ;;  %v464_v54 = vshrl.u32 %v463_v53, 7 }
  0x23   : > { %v6873_v41 = vld [vmem:[%s6738_s11 + $0x8] sm:$0xff]   ;;  %v5942_v43 = vld [vmem:[%s8006_s1 + $0xb0] ss:$20 sps:$4 sm:$0xff]   ;;  %v5946_v46 = vld [vmem:[%s8006_s1 + $0x100] ss:$20 sps:$4 sm:$0xff]   ;;  %p5143_p6 = scmp.ge.s32.totalorder %s6731_s28, 10 }
  0x24   : > { %v5944_v45 = vld [vmem:[%s8006_s1 + $0xd8] ss:$20 sps:$4 sm:$0xff]   ;;  %v5941_v49 = vld [vmem:[%s6738_s11 + $0x20] sm:$0xff]   ;;  %v5945_v51 = vld [vmem:[%s6738_s11 + $0x30] sm:$0xff]   ;;  %v481_v55 = vsub.s32 4, %v464_v54  ;;  %v465_v58 = vsub.s32 0, %v464_v54 }
  0x25   : > { %751 = vmatpush1.bf16.msra.mxu0 %v5907_v19  ;;  %864 = vmatpush1.bf16.msra.mxu1 %v5908_v20  ;;  %v5939_v47 = vld [vmem:[%s6738_s11 + $0x18] sm:$0xff]   ;;  %v5943_v50 = vld [vmem:[%s6738_s11 + $0x28] sm:$0xff]   ;;  %v461_v56 = vld [vmem:[%s8008_s3] sm:$0x1f]  ;;  %v473_v59 = vsub.s32 2, %v464_v54  ;;  %v469_v60 = vsub.s32 1, %v464_v54 }
  0x26   : > { %752 = vmatprep.subr.bf16.mxu0 %v5909_v21  ;;  %865 = vmatprep.subr.bf16.mxu1 %v5911_v22  ;;  %v5947_v52 = vld [vmem:[%s6738_s11 + $0x38] sm:$0xff]   ;;  %v6915_v57 = vrot.slane %v461_v56, %v481_v55  ;;  %v477_v61 = vsub.s32 3, %v464_v54  ;;  %v6917_v62 = vrot.slane %v461_v56, %v465_v58  ;;  %vm6648_vm0 = vmmov (!%p5143_p6), 0  }
  0x27   : > { %v6919_v63 = vrot.slane %v461_v56, %v473_v59  ;;  %v6921_v0 = vrot.slane %v461_v56, %v469_v60 }
  0x28   : > { %v6923_v1 = vrot.slane %v461_v56, %v477_v61 }
  0x29   : > { %753 = vmatpush1.bf16.msra.mxu0 %v5913_v23  ;;  %866 = vmatpush1.bf16.msra.mxu1 %v5914_v24 }
  0x2a   : > { %754 = vmatprep.subr.bf16.mxu0 %v5915_v25  ;;  %867 = vmatprep.subr.bf16.mxu1 %v5917_v26 }
  0x2d   : > { %755 = vmatpush1.bf16.msra.mxu0 %v5919_v27  ;;  %868 = vmatpush1.bf16.msra.mxu1 %v5920_v28 }
  0x2e   : > { %756 = vmatprep.subr.bf16.mxu0 %v5921_v29  ;;  %869 = vmatprep.subr.bf16.mxu1 %v5923_v30 }
  0x31   : > { %757 = vmatpush1.bf16.msra.mxu0 %v5925_v31  ;;  %870 = vmatpush1.bf16.msra.mxu1 %v5926_v32 }
  0x32   : > { %758 = vmatprep.subr.bf16.mxu0 %v5927_v33  ;;  %871 = vmatprep.subr.bf16.mxu1 %v5929_v34 }
  0x35   : > { %759 = vmatpush1.bf16.msra.mxu0 %v5931_v35  ;;  %872 = vmatpush1.bf16.msra.mxu1 %v5932_v36 }
  0x36   : > { %5628 = vmatprep.subr.bf16.mxu0 %v5934_v37  ;;  %5820 = vmatprep.subr.bf16.mxu1 %v5934_v37 }
  0x38   : > { %777 = vmatmul.mubr.bf16.vlgmr.msra.gmra.mrb[0].mxu0 %v6860_v38  ;;  %890 = vmatmul.mubr.bf16.vlgmr.msra.gmra.mrb[0].mxu1 %v6860_v38 }
  0x39   : > { %5629 = vmatpush3.bf16.msra.mxu0 %v5934_v37  ;;  %5828 = vmatpush3.bf16.msra.mxu1 %v5934_v37 }
  0x3a   : > { %786 = vmatprep.mubr.bf16.mxu0 %v6645_v6  ;;  %899 = vmatprep.mubr.bf16.mxu1 %v6645_v6 }
  0x3b   : > { %5630 = vmatprep.subr.bf16.mxu0 %v5936_v39  ;;  %5821 = vmatprep.subr.bf16.mxu1 %v5936_v39 }
  0x3d   : > { %5631 = vmatpush3.bf16.msra.mxu0 %v5936_v39  ;;  %5829 = vmatpush3.bf16.msra.mxu1 %v5936_v39 }
  0x3e   : > { %5632 = vmatprep.subr.bf16.mxu0 %v5938_v40  ;;  %5822 = vmatprep.subr.bf16.mxu1 %v5938_v40 }
  0x40   : > { %787 = vmatmul.mubr.bf16.gmra.mrb[4].mxu0 %v6873_v41  ;;  %900 = vmatmul.mubr.bf16.gmra.mrb[4].mxu1 %v6873_v41 }
  0x41   : > { %796 = vmatprep.mubr.bf16.mxu0 %v6645_v6  ;;  %909 = vmatprep.mubr.bf16.mxu1 %v6645_v6 }
  0x42   : > { %5633 = vmatpush3.bf16.msra.mxu0 %v5938_v40  ;;  %5830 = vmatpush3.bf16.msra.mxu1 %v5938_v40 }
  0x43   : > { %5634 = vmatprep.subr.bf16.mxu0 %v5940_v42  ;;  %5823 = vmatprep.subr.bf16.mxu1 %v5940_v42 }
  0x46   : > { %5635 = vmatpush3.bf16.msra.mxu0 %v5940_v42  ;;  %5831 = vmatpush3.bf16.msra.mxu1 %v5940_v42 }
  0x47   : > { %5636 = vmatprep.subr.bf16.mxu0 %v5942_v43  ;;  %5824 = vmatprep.subr.bf16.mxu1 %v5942_v43 }
  0x48   : > { %797 = vmatmul.mubr.bf16.gmra.mrb[8].mxu0 %v5937_v44  ;;  %910 = vmatmul.mubr.bf16.gmra.mrb[8].mxu1 %v5937_v44 }
  0x49   : > { %806 = vmatprep.mubr.bf16.mxu0 %v6645_v6  ;;  %919 = vmatprep.mubr.bf16.mxu1 %v6645_v6 }
  0x4a   : > { %5637 = vmatpush3.bf16.msra.mxu0 %v5942_v43  ;;  %5832 = vmatpush3.bf16.msra.mxu1 %v5942_v43 }
  0x4b   : > { %5638 = vmatprep.subr.bf16.mxu0 %v5944_v45  ;;  %5825 = vmatprep.subr.bf16.mxu1 %v5944_v45 }
  0x4e   : > { %5639 = vmatpush3.bf16.msra.mxu0 %v5944_v45  ;;  %5833 = vmatpush3.bf16.msra.mxu1 %v5944_v45 }
  0x4f   : > { %5640 = vmatprep.subr.bf16.mxu0 %v5946_v46  ;;  %5826 = vmatprep.subr.bf16.mxu1 %v5946_v46 }
  0x50   : > { %807 = vmatmul.mubr.bf16.gmra.mrb[12].mxu0 %v5939_v47  ;;  %920 = vmatmul.mubr.bf16.gmra.mrb[12].mxu1 %v5939_v47 }
  0x51   : > { %816 = vmatprep.mubr.bf16.mxu0 %v6645_v6  ;;  %929 = vmatprep.mubr.bf16.mxu1 %v6645_v6 }
  0x52   : > { %5641 = vmatpush3.bf16.msra.mxu0 %v5946_v46  ;;  %5834 = vmatpush3.bf16.msra.mxu1 %v5946_v46 }
  0x53   : > { %5642 = vmatprep.subr.bf16.mxu0 %v5948_v48  ;;  %5827 = vmatprep.subr.bf16.mxu1 %v5948_v48 }
  0x56   : > { %5643 = vmatpush3.bf16.msra.mxu0 %v5948_v48  ;;  %5835 = vmatpush3.bf16.msra.mxu1 %v5948_v48 }
  0x58   : > { %817 = vmatmul.mubr.bf16.gmra.mrb[16].mxu0 %v5941_v49  ;;  %930 = vmatmul.mubr.bf16.gmra.mrb[16].mxu1 %v5941_v49 }
  0x59   : > { %826 = vmatprep.mubr.bf16.mxu0 %v6645_v6  ;;  %939 = vmatprep.mubr.bf16.mxu1 %v6645_v6 }
  0x60   : > { %827 = vmatmul.mubr.bf16.gmra.mrb[20].mxu0 %v5943_v50  ;;  %940 = vmatmul.mubr.bf16.gmra.mrb[20].mxu1 %v5943_v50 }
  0x61   : > { %836 = vmatprep.mubr.bf16.mxu0 %v6645_v6  ;;  %949 = vmatprep.mubr.bf16.mxu1 %v6645_v6 }
  0x68   : > { %837 = vmatmul.mubr.bf16.gmra.mrb[24].mxu0 %v5945_v51  ;;  %950 = vmatmul.mubr.bf16.gmra.mrb[24].mxu1 %v5945_v51 }
  0x69   : > { %846 = vmatprep.mubr.bf16.mxu0 %v6645_v6  ;;  %959 = vmatprep.mubr.bf16.mxu1 %v6645_v6 }
  0x70   : > { %847 = vmatmul.mubr.bf16.gmra.mrb[28].mxu0 %v5947_v52  ;;  %960 = vmatmul.mubr.bf16.gmra.mrb[28].mxu1 %v5947_v52 }
  0x71   : > { %5644 = vmatprep.mubr.bf16.mxu0 %v6860_v38  ;;  %5652 = vmatprep.mubr.bf16.mxu1 %v5941_v49 }
  0x78   : > { %5645 = vmatmul.mubr.bf16.vlgmr.msra.gmra.mrb[32].mxu0 %v6873_v41  ;;  %5653 = vmatmul.mubr.bf16.vlgmr.msra.gmra.mrb[32].mxu1 %v5943_v50 }
  0x79   : > { %5648 = vmatprep.mubr.bf16.mxu0 %v5937_v44  ;;  %5656 = vmatprep.mubr.bf16.mxu1 %v5945_v51 }
  0x80   : > { %5649 = vmatmul.mubr.bf16.gmra.mrb[36].mxu0 %v5939_v47  ;;  %5657 = vmatmul.mubr.bf16.gmra.mrb[36].mxu1 %v5947_v52 }
 0x10b   : > { %v778_v2 = vpop.f32.mrb[0].mxu0  ;;  %v891_v3 = vpop.f32.mrb[0].mxu1 }
 0x10c   : > { %v779_v4 = vadd.f32 %v778_v2, %v6917_v62  ;;  %v892_v5 = vadd.f32 %v891_v3, %v6919_v63  ;;  %v780_v6 = vpop.f32.mrb[1].mxu0  ;;  %v893_v7 = vpop.f32.mrb[1].mxu1 }
 0x10d   : > { %v781_v8 = vadd.f32 %v780_v6, %v6921_v0  ;;  %v894_v9 = vadd.f32 %v893_v7, %v6923_v1  ;;  %v782_v10 = vpop.f32.mrb[2].mxu0  ;;  %v895_v11 = vpop.f32.mrb[2].mxu1 }
 0x10e   : > { %1067 = vst [vmem:[#allocation2] sm:$0xff] %v779_v4  ;;  %1069 = vst [vmem:[#allocation2 + $0x10] sm:$0xff] %v892_v5  ;;  %v783_v12 = vadd.f32 %v782_v10, %v6917_v62  ;;  %v896_v13 = vadd.f32 %v895_v11, %v6919_v63  ;;  %v784_v14 = vpop.f32.mrb[3].mxu0  ;;  %v897_v15 = vpop.f32.mrb[3].mxu1 }
 0x10f   : > { %1068 = vst [vmem:[#allocation2 + $0x8] sm:$0xff] %v781_v8  ;;  %1070 = vst [vmem:[#allocation2 + $0x18] sm:$0xff] %v894_v9  ;;  %v785_v16 = vadd.f32 %v784_v14, %v6921_v0  ;;  %v898_v17 = vadd.f32 %v897_v15, %v6923_v1 }
 0x110   : > { %1072 = vst [vmem:[#allocation2 + $0x28] sm:$0xff] %v783_v12  ;;  %1074 = vst [vmem:[#allocation2 + $0x38] sm:$0xff] %v896_v13 }
 0x111   : > { %1073 = vst [vmem:[#allocation2 + $0x30] sm:$0xff] %v785_v16  ;;  %1075 = vst [vmem:[#allocation2 + $0x40] sm:$0xff] %v898_v17 }
 0x113   : > { %v788_v18 = vpop.f32.mrb[4].mxu0  ;;  %v901_v19 = vpop.f32.mrb[4].mxu1 }
 0x114   : > { %v789_v20 = vadd.f32 %v788_v18, %v6917_v62  ;;  %v902_v21 = vadd.f32 %v901_v19, %v6919_v63  ;;  %v790_v22 = vpop.f32.mrb[5].mxu0  ;;  %v903_v23 = vpop.f32.mrb[5].mxu1 }
 0x115   : > { %v791_v24 = vadd.f32 %v790_v22, %v6921_v0  ;;  %v904_v25 = vadd.f32 %v903_v23, %v6923_v1  ;;  %v792_v26 = vpop.f32.mrb[6].mxu0  ;;  %v905_v27 = vpop.f32.mrb[6].mxu1 }
 0x116   : > { %1077 = vst [vmem:[#allocation2 + $0x50] sm:$0xff] %v789_v20  ;;  %1079 = vst [vmem:[#allocation2 + $0x60] sm:$0xff] %v902_v21  ;;  %v793_v28 = vadd.f32 %v792_v26, %v6917_v62  ;;  %v906_v29 = vadd.f32 %v905_v27, %v6919_v63  ;;  %v794_v30 = vpop.f32.mrb[7].mxu0  ;;  %v907_v31 = vpop.f32.mrb[7].mxu1 }
 0x117   : > { %1078 = vst [vmem:[#allocation2 + $0x58] sm:$0xff] %v791_v24  ;;  %1080 = vst [vmem:[#allocation2 + $0x68] sm:$0xff] %v904_v25  ;;  %v795_v32 = vadd.f32 %v794_v30, %v6921_v0  ;;  %v908_v33 = vadd.f32 %v907_v31, %v6923_v1 }
 0x118   : > { %1082 = vst [vmem:[#allocation2 + $0x78] sm:$0xff] %v793_v28  ;;  %1084 = vst [vmem:[#allocation2 + $0x88] sm:$0xff] %v906_v29 }
 0x119   : > { %1083 = vst [vmem:[#allocation2 + $0x80] sm:$0xff] %v795_v32  ;;  %1085 = vst [vmem:[#allocation2 + $0x90] sm:$0xff] %v908_v33 }
 0x11b   : > { %v798_v34 = vpop.f32.mrb[8].mxu0  ;;  %v911_v35 = vpop.f32.mrb[8].mxu1 }
 0x11c   : > { %v799_v36 = vadd.f32 %v798_v34, %v6917_v62  ;;  %v912_v37 = vadd.f32 %v911_v35, %v6919_v63  ;;  %v800_v38 = vpop.f32.mrb[9].mxu0  ;;  %v913_v39 = vpop.f32.mrb[9].mxu1 }
 0x11d   : > { %v801_v40 = vadd.f32 %v800_v38, %v6921_v0  ;;  %v914_v41 = vadd.f32 %v913_v39, %v6923_v1  ;;  %v802_v42 = vpop.f32.mrb[10].mxu0  ;;  %v915_v43 = vpop.f32.mrb[10].mxu1 }
 0x11e   : > { %1087 = vst [vmem:[#allocation2 + $0xa0] sm:$0xff] %v799_v36  ;;  %1089 = vst [vmem:[#allocation2 + $0xb0] sm:$0xff] %v912_v37  ;;  %v803_v44 = vadd.f32 %v802_v42, %v6917_v62  ;;  %v916_v45 = vadd.f32 %v915_v43, %v6919_v63  ;;  %v804_v46 = vpop.f32.mrb[11].mxu0  ;;  %v917_v47 = vpop.f32.mrb[11].mxu1 }
 0x11f   : > { %1088 = vst [vmem:[#allocation2 + $0xa8] sm:$0xff] %v801_v40  ;;  %1090 = vst [vmem:[#allocation2 + $0xb8] sm:$0xff] %v914_v41  ;;  %v805_v48 = vadd.f32 %v804_v46, %v6921_v0  ;;  %v918_v49 = vadd.f32 %v917_v47, %v6923_v1 }
 0x120   : > { %1092 = vst [vmem:[#allocation2 + $0xc8] sm:$0xff] %v803_v44  ;;  %1094 = vst [vmem:[#allocation2 + $0xd8] sm:$0xff] %v916_v45 }
 0x121   : > { %1093 = vst [vmem:[#allocation2 + $0xd0] sm:$0xff] %v805_v48  ;;  %1095 = vst [vmem:[#allocation2 + $0xe0] sm:$0xff] %v918_v49 }
 0x123   : > { %v808_v50 = vpop.f32.mrb[12].mxu0  ;;  %v921_v51 = vpop.f32.mrb[12].mxu1 }
 0x124   : > { %v809_v52 = vadd.f32 %v808_v50, %v6917_v62  ;;  %v922_v53 = vadd.f32 %v921_v51, %v6919_v63  ;;  %v810_v54 = vpop.f32.mrb[13].mxu0  ;;  %v923_v55 = vpop.f32.mrb[13].mxu1 }
 0x125   : > { %v811_v56 = vadd.f32 %v810_v54, %v6921_v0  ;;  %v924_v58 = vadd.f32 %v923_v55, %v6923_v1  ;;  %v812_v59 = vpop.f32.mrb[14].mxu0  ;;  %v925_v60 = vpop.f32.mrb[14].mxu1 }
 0x126   : > { %1097 = vst [vmem:[#allocation2 + $0xf0] sm:$0xff] %v809_v52  ;;  %1099 = vst [vmem:[#allocation2 + $0x100] sm:$0xff] %v922_v53  ;;  %v813_v61 = vadd.f32 %v812_v59, %v6917_v62  ;;  %v926_v2 = vadd.f32 %v925_v60, %v6919_v63  ;;  %v814_v3 = vpop.f32.mrb[15].mxu0  ;;  %v927_v4 = vpop.f32.mrb[15].mxu1 }
 0x127   : > { %1098 = vst [vmem:[#allocation2 + $0xf8] sm:$0xff] %v811_v56  ;;  %1100 = vst [vmem:[#allocation2 + $0x108] sm:$0xff] %v924_v58  ;;  %v815_v5 = vadd.f32 %v814_v3, %v6921_v0  ;;  %v928_v6 = vadd.f32 %v927_v4, %v6923_v1 }
 0x128   : > { %1102 = vst [vmem:[#allocation2 + $0x118] sm:$0xff] %v813_v61  ;;  %1104 = vst [vmem:[#allocation2 + $0x128] sm:$0xff] %v926_v2 }
 0x129   : > { %1103 = vst [vmem:[#allocation2 + $0x120] sm:$0xff] %v815_v5  ;;  %1105 = vst [vmem:[#allocation2 + $0x130] sm:$0xff] %v928_v6 }
 0x12b   : > { %v818_v7 = vpop.f32.mrb[16].mxu0  ;;  %v931_v8 = vpop.f32.mrb[16].mxu1 }
 0x12c   : > { %v819_v9 = vadd.f32 %v818_v7, %v6917_v62  ;;  %v932_v10 = vadd.f32 %v931_v8, %v6919_v63  ;;  %v820_v11 = vpop.f32.mrb[17].mxu0  ;;  %v933_v12 = vpop.f32.mrb[17].mxu1 }
 0x12d   : > { %v821_v13 = vadd.f32 %v820_v11, %v6921_v0  ;;  %v934_v14 = vadd.f32 %v933_v12, %v6923_v1  ;;  %v822_v15 = vpop.f32.mrb[18].mxu0  ;;  %v935_v16 = vpop.f32.mrb[18].mxu1 }
 0x12e   : > { %1107 = vst [vmem:[#allocation2 + $0x140] sm:$0xff] %v819_v9  ;;  %1109 = vst [vmem:[#allocation2 + $0x150] sm:$0xff] %v932_v10  ;;  %v823_v17 = vadd.f32 %v822_v15, %v6917_v62  ;;  %v936_v18 = vadd.f32 %v935_v16, %v6919_v63  ;;  %v824_v19 = vpop.f32.mrb[19].mxu0  ;;  %v937_v20 = vpop.f32.mrb[19].mxu1 }
 0x12f   : > { %1108 = vst [vmem:[#allocation2 + $0x148] sm:$0xff] %v821_v13  ;;  %1110 = vst [vmem:[#allocation2 + $0x158] sm:$0xff] %v934_v14  ;;  %v825_v21 = vadd.f32 %v824_v19, %v6921_v0  ;;  %v938_v22 = vadd.f32 %v937_v20, %v6923_v1 }
 0x130   : > { %1112 = vst [vmem:[#allocation2 + $0x168] sm:$0xff] %v823_v17  ;;  %1114 = vst [vmem:[#allocation2 + $0x178] sm:$0xff] %v936_v18 }
 0x131   : > { %1113 = vst [vmem:[#allocation2 + $0x170] sm:$0xff] %v825_v21  ;;  %1115 = vst [vmem:[#allocation2 + $0x180] sm:$0xff] %v938_v22 }
 0x133   : > { %v828_v23 = vpop.f32.mrb[20].mxu0  ;;  %v941_v24 = vpop.f32.mrb[20].mxu1 }
 0x134   : > { %v829_v25 = vadd.f32 %v828_v23, %v6917_v62  ;;  %v942_v26 = vadd.f32 %v941_v24, %v6919_v63  ;;  %v830_v27 = vpop.f32.mrb[21].mxu0  ;;  %v943_v28 = vpop.f32.mrb[21].mxu1 }
 0x135   : > { %v831_v29 = vadd.f32 %v830_v27, %v6921_v0  ;;  %v944_v30 = vadd.f32 %v943_v28, %v6923_v1  ;;  %v832_v31 = vpop.f32.mrb[22].mxu0  ;;  %v945_v32 = vpop.f32.mrb[22].mxu1 }
 0x136   : > { %1117 = vst [vmem:[#allocation2 + $0x190] sm:$0xff] %v829_v25  ;;  %1119 = vst [vmem:[#allocation2 + $0x1a0] sm:$0xff] %v942_v26  ;;  %v833_v33 = vadd.f32 %v832_v31, %v6917_v62  ;;  %v946_v34 = vadd.f32 %v945_v32, %v6919_v63  ;;  %v834_v35 = vpop.f32.mrb[23].mxu0  ;;  %v947_v36 = vpop.f32.mrb[23].mxu1 }
 0x137   : > { %1118 = vst [vmem:[#allocation2 + $0x198] sm:$0xff] %v831_v29  ;;  %1120 = vst [vmem:[#allocation2 + $0x1a8] sm:$0xff] %v944_v30  ;;  %v835_v37 = vadd.f32 %v834_v35, %v6921_v0  ;;  %v948_v38 = vadd.f32 %v947_v36, %v6923_v1 }
 0x138   : > { %1122 = vst [vmem:[#allocation2 + $0x1b8] sm:$0xff] %v833_v33  ;;  %1124 = vst [vmem:[#allocation2 + $0x1c8] sm:$0xff] %v946_v34 }
 0x139   : > { %1123 = vst [vmem:[#allocation2 + $0x1c0] sm:$0xff] %v835_v37  ;;  %1125 = vst [vmem:[#allocation2 + $0x1d0] sm:$0xff] %v948_v38 }
 0x13b   : > { %v838_v39 = vpop.f32.mrb[24].mxu0  ;;  %v951_v40 = vpop.f32.mrb[24].mxu1 }
 0x13c   : > { %v839_v41 = vadd.f32 %v838_v39, %v6917_v62  ;;  %v952_v42 = vadd.f32 %v951_v40, %v6919_v63  ;;  %v840_v43 = vpop.f32.mrb[25].mxu0  ;;  %v953_v44 = vpop.f32.mrb[25].mxu1  ;;  %v5949_v40 = vld [vmem:[%s8007_s2 + $0x4] ss:$20 sps:$4 sm:$0xff] (!%p5143_p6)  }
 0x13d   : > { %v841_v45 = vadd.f32 %v840_v43, %v6921_v0  ;;  %v954_v46 = vadd.f32 %v953_v44, %v6923_v1  ;;  %v842_v47 = vpop.f32.mrb[26].mxu0  ;;  %v955_v48 = vpop.f32.mrb[26].mxu1  ;;  %1424 = vmatprep.subr.bf16.mxu0 (!%p5143_p6), %v5949_v40  ;;  %v5954_v43 = vld [vmem:[%s8007_s2 + $0x28] ss:$20 sps:$4 sm:$0xff] (!%p5143_p6)   ;;  %v1160_v40 = vld [vmem:[#allocation2 + $0x10] sm:$0xff] (!%p5143_p6) }
 0x13e   : > { %1127 = vst [vmem:[#allocation2 + $0x1e0] sm:$0xff] %v839_v41  ;;  %1129 = vst [vmem:[#allocation2 + $0x1f0] sm:$0xff] %v952_v42  ;;  %v843_v49 = vadd.f32 %v842_v47, %v6917_v62  ;;  %v956_v50 = vadd.f32 %v955_v48, %v6919_v63  ;;  %v844_v51 = vpop.f32.mrb[27].mxu0  ;;  %v957_v52 = vpop.f32.mrb[27].mxu1  ;;  %v5951_v41 = vld [vmem:[%s8007_s2] ss:$20 sps:$4 sm:$0xff] (!%p5143_p6)  }
 0x13f   : > { %1128 = vst [vmem:[#allocation2 + $0x1e8] sm:$0xff] %v841_v45  ;;  %1130 = vst [vmem:[#allocation2 + $0x1f8] sm:$0xff] %v954_v46  ;;  %v845_v53 = vadd.f32 %v844_v51, %v6921_v0  ;;  %v958_v54 = vadd.f32 %v957_v52, %v6923_v1  ;;  %v6646_v42 = vmov (!%p5143_p6), 0   ;;  %1425 = vmatpush1.bf16.msra.mxu0 (!%p5143_p6), %v5951_v41  ;;  %v5955_v44 = vld [vmem:[%s8007_s2 + $0x54] ss:$20 sps:$4 sm:$0xff] (!%p5143_p6)  }
 0x140   : > { %1132 = vst [vmem:[#allocation2 + $0x208] sm:$0xff] %v843_v49  ;;  %1134 = vst [vmem:[#allocation2 + $0x218] sm:$0xff] %v956_v50  ;;  %1456 = vmatprep.mubr.bf16.mxu0 (!%p5143_p6), %v6646_v42  ;;  %1499 = vmatprep.mubr.bf16.mxu1 (!%p5143_p6), %v6646_v42  ;;  %v5957_v45 = vld [vmem:[%s8007_s2 + $0x50] ss:$20 sps:$4 sm:$0xff] (!%p5143_p6)   ;;  %v5966_v47 = vld [vmem:[%s8007_s2 + $0xc] ss:$20 sps:$4 sm:$0xff] (!%p5143_p6)  }
 0x141   : > { %1133 = vst [vmem:[#allocation2 + $0x210] sm:$0xff] %v845_v53  ;;  %1135 = vst [vmem:[#allocation2 + $0x220] sm:$0xff] %v958_v54  ;;  %v5958_v46 = vld [vmem:[%s8007_s2 + $0x7c] ss:$20 sps:$4 sm:$0xff] (!%p5143_p6)   ;;  %1467 = vmatprep.subr.bf16.mxu1 (!%p5143_p6), %v5966_v47  ;;  %v5960_v49 = vld [vmem:[%s8007_s2 + $0x78] ss:$20 sps:$4 sm:$0xff] (!%p5143_p6)  }
 0x142   : > { %v5969_v48 = vld [vmem:[%s8007_s2 + $0x8] ss:$20 sps:$4 sm:$0xff] (!%p5143_p6)   ;;  %v5975_v51 = vld [vmem:[%s8007_s2 + $0x30] ss:$20 sps:$4 sm:$0xff] (!%p5143_p6)   ;;  %v5963_v54 = vld [vmem:[%s8007_s2 + $0xa0] ss:$20 sps:$4 sm:$0xff] (!%p5143_p6)  }
 0x143   : > { %v848_v55 = vpop.f32.mrb[28].mxu0  ;;  %v961_v56 = vpop.f32.mrb[28].mxu1  ;;  %1468 = vmatpush1.bf16.msra.mxu1 (!%p5143_p6), %v5969_v48  ;;  %v5972_v50 = vld [vmem:[%s8007_s2 + $0x34] ss:$20 sps:$4 sm:$0xff] (!%p5143_p6)   ;;  %v5961_v52 = vld [vmem:[%s8007_s2 + $0xa4] ss:$20 sps:$4 sm:$0xff] (!%p5143_p6)  }
 0x144   : > { %v849_v58 = vadd.f32 %v848_v55, %v6917_v62  ;;  %v962_v59 = vadd.f32 %v961_v56, %v6919_v63  ;;  %v850_v60 = vpop.f32.mrb[29].mxu0  ;;  %v963_v61 = vpop.f32.mrb[29].mxu1  ;;  %1469 = vmatprep.subr.bf16.mxu1 (!%p5143_p6), %v5972_v50  ;;  %v5978_v53 = vld [vmem:[%s8007_s2 + $0x5c] ss:$20 sps:$4 sm:$0xff] (!%p5143_p6)   ;;  %v5981_v55 = vld [vmem:[%s8007_s2 + $0x58] ss:$20 sps:$4 sm:$0xff] (!%p5143_p6)  }
 0x145   : > { %v851_v2 = vadd.f32 %v850_v60, %v6921_v0  ;;  %v964_v3 = vadd.f32 %v963_v61, %v6923_v1  ;;  %v852_v4 = vpop.f32.mrb[30].mxu0  ;;  %v965_v5 = vpop.f32.mrb[30].mxu1  ;;  %v5964_v56 = vld [vmem:[%s8007_s2 + $0xcc] ss:$20 sps:$4 sm:$0xff] (!%p5143_p6)   ;;  %v5970_v60 = vld [vmem:[%s8007_s2 + $0xf4] ss:$20 sps:$4 sm:$0xff] (!%p5143_p6)  }
 0x146   : > { %1137 = vst [vmem:[#allocation2 + $0x230] sm:$0xff] %v849_v58  ;;  %1139 = vst [vmem:[#allocation2 + $0x240] sm:$0xff] %v962_v59  ;;  %v853_v6 = vadd.f32 %v852_v4, %v6917_v62  ;;  %v966_v7 = vadd.f32 %v965_v5, %v6919_v63  ;;  %v854_v8 = vpop.f32.mrb[31].mxu0  ;;  %v967_v9 = vpop.f32.mrb[31].mxu1  ;;  %v5982_v58 = vld [vmem:[%s8007_s2 + $0x84] ss:$20 sps:$4 sm:$0xff] (!%p5143_p6)  }
 0x147   : > { %1138 = vst [vmem:[#allocation2 + $0x238] sm:$0xff] %v851_v2  ;;  %1140 = vst [vmem:[#allocation2 + $0x248] sm:$0xff] %v964_v3  ;;  %v855_v10 = vadd.f32 %v854_v8, %v6921_v0  ;;  %v968_v11 = vadd.f32 %v967_v9, %v6923_v1  ;;  %1470 = vmatpush1.bf16.msra.mxu1 (!%p5143_p6), %v5975_v51  ;;  %v5968_v59 = vld [vmem:[%s8007_s2 + $0xc8] ss:$20 sps:$4 sm:$0xff] (!%p5143_p6)   ;;  %v5984_v61 = vld [vmem:[%s8007_s2 + $0x80] ss:$20 sps:$4 sm:$0xff] (!%p5143_p6)  }
 0x148   : > { %1142 = vst [vmem:[#allocation2 + $0x258] sm:$0xff] %v853_v6  ;;  %1144 = vst [vmem:[#allocation2 + $0x268] sm:$0xff] %v966_v7  ;;  %1471 = vmatprep.subr.bf16.mxu1 (!%p5143_p6), %v5978_v53  ;;  %v5986_v2 = vld [vmem:[%s8007_s2 + $0xac] ss:$20 sps:$4 sm:$0xff] (!%p5143_p6)   ;;  %v5974_v3 = vld [vmem:[%s8007_s2 + $0xf0] ss:$20 sps:$4 sm:$0xff] (!%p5143_p6)  }
 0x149   : > { %1143 = vst [vmem:[#allocation2 + $0x260] sm:$0xff] %v855_v10  ;;  %1145 = vst [vmem:[#allocation2 + $0x270] sm:$0xff] %v968_v11  ;;  %v5976_v4 = vld [vmem:[%s8007_s2 + $0x11c] ss:$20 sps:$4 sm:$0xff] (!%p5143_p6)   ;;  %v5990_v6 = vld [vmem:[%s8007_s2 + $0xd4] ss:$20 sps:$4 sm:$0xff] (!%p5143_p6)  }
 0x14a   : > { %v5988_v5 = vld [vmem:[%s8007_s2 + $0xa8] ss:$20 sps:$4 sm:$0xff] (!%p5143_p6)   ;;  %v5980_v7 = vld [vmem:[%s8007_s2 + $0x118] ss:$20 sps:$4 sm:$0xff] (!%p5143_p6)   ;;  %v1152_v8 = vld [vmem:[#allocation3] sm:$0xff] (!%p5143_p6) }
 0x14b   : > { %v5646_v12 = vpop.f32.mrb[32].mxu0  ;;  %v5654_v13 = vpop.f32.mrb[32].mxu1  ;;  %1472 = vmatpush1.bf16.msra.mxu1 (!%p5143_p6), %v5981_v55  ;;  %v1153_v9 = vld [vmem:[#allocation3 + $0x8] sm:$0xff] (!%p5143_p6)  ;;  %v5992_v10 = vld [vmem:[%s8007_s2 + $0xd0] ss:$20 sps:$4 sm:$0xff] (!%p5143_p6)   ;;  %v1165_v42 = vld [vmem:[#allocation2 + $0x38] sm:$0xff] (!%p5143_p6) }
 0x14c   : > { %v1013_v14 = vadd.f32 %v5646_v12, %v6915_v57  ;;  %v1045_v62 = vadd.f32 %v5654_v13, %v6915_v57  ;;  %v1004_v15 = vpop.f32.mrb[33].mxu0  ;;  %v1036_v63 = vpop.f32.mrb[33].mxu1  ;;  %1473 = vmatprep.subr.bf16.mxu1 (!%p5143_p6), %v5982_v58  ;;  %v5994_v11 = vld [vmem:[%s8007_s2 + $0xfc] ss:$20 sps:$4 sm:$0xff] (!%p5143_p6)   ;;  %v1154_v12 = vpack.c.bf16 (!%p5143_p6), %v1153_v9, %v1152_v8  ;;  %v1166_v58 = vld [vmem:[#allocation2 + $0x40] sm:$0xff] (!%p5143_p6) }
 0x14d   : > { %v1005_v16 = vadd.f32 %v1004_v15, %v6915_v57  ;;  %v1037_v17 = vadd.f32 %v1036_v63, %v6915_v57  ;;  %v5647_v18 = vpop.f32.mrb[34].mxu0  ;;  %v5655_v0 = vpop.f32.mrb[34].mxu1  ;;  %v5985_v13 = vld [vmem:[%s8007_s2 + $0x10] ss:$20 sps:$4 sm:$0xff] (!%p5143_p6)   ;;  %v5989_v63 = vld [vmem:[%s8007_s2 + $0x38] ss:$20 sps:$4 sm:$0xff] (!%p5143_p6)  }
 0x14e   : > { %1081 = vst [vmem:[#allocation2 + $0x70] sm:$0xff] %v1013_v14  ;;  %1121 = vst [vmem:[#allocation2 + $0x1b0] sm:$0xff] %v1045_v62  ;;  %v1016_v1 = vadd.f32 %v5647_v18, %v6915_v57  ;;  %v1048_v19 = vadd.f32 %v5655_v0, %v6915_v57  ;;  %v1007_v20 = vpop.f32.mrb[35].mxu0  ;;  %v1039_v21 = vpop.f32.mrb[35].mxu1  ;;  %v5996_v14 = vld [vmem:[%s8007_s2 + $0xf8] ss:$20 sps:$4 sm:$0xff] (!%p5143_p6)  }
 0x14f   : > { %1071 = vst [vmem:[#allocation2 + $0x20] sm:$0xff] %v1005_v16  ;;  %1111 = vst [vmem:[#allocation2 + $0x160] sm:$0xff] %v1037_v17  ;;  %v1008_v22 = vadd.f32 %v1007_v20, %v6915_v57  ;;  %v1040_v23 = vadd.f32 %v1039_v21, %v6915_v57  ;;  %1474 = vmatpush1.bf16.msra.mxu1 (!%p5143_p6), %v5984_v61  ;;  %v6647_v62 = vmov (!%p5143_p6), 0.0   ;;  %v5998_v15 = vld [vmem:[%s8007_s2 + $0x124] ss:$20 sps:$4 sm:$0xff] (!%p5143_p6)  }
 0x150   : > { %1086 = vst [vmem:[#allocation2 + $0x98] sm:$0xff] %v1016_v1  ;;  %1126 = vst [vmem:[#allocation2 + $0x1d8] sm:$0xff] %v1048_v19  ;;  %1475 = vmatprep.subr.bf16.mxu1 (!%p5143_p6), %v5986_v2  ;;  %v6000_v16 = vld [vmem:[%s8007_s2 + $0x120] ss:$20 sps:$4 sm:$0xff] (!%p5143_p6)   ;;  %v5997_v18 = vld [vmem:[%s8007_s2 + $0x88] ss:$20 sps:$4 sm:$0xff] (!%p5143_p6)  }
 0x151   : > { %1076 = vst [vmem:[#allocation2 + $0x48] sm:$0xff] %v1008_v22  ;;  %1116 = vst [vmem:[#allocation2 + $0x188] sm:$0xff] %v1040_v23  ;;  %v5993_v17 = vld [vmem:[%s8007_s2 + $0x60] ss:$20 sps:$4 sm:$0xff] (!%p5143_p6)   ;;  %v6001_v0 = vld [vmem:[%s8007_s2 + $0xb0] ss:$20 sps:$4 sm:$0xff] (!%p5143_p6)  }
 0x152   : > { %v6002_v1 = vld [vmem:[%s8007_s2 + $0xd8] ss:$20 sps:$4 sm:$0xff] (!%p5143_p6)   ;;  %v6003_v19 = vld [vmem:[%s8007_s2 + $0x100] ss:$20 sps:$4 sm:$0xff] (!%p5143_p6)   ;;  %v6004_v20 = vld [vmem:[%s8007_s2 + $0x128] ss:$20 sps:$4 sm:$0xff] (!%p5143_p6)  }
 0x153   : > { %v5650_v24 = vpop.f32.mrb[36].mxu0  ;;  %v5658_v25 = vpop.f32.mrb[36].mxu1  ;;  %1151 = sbr.rel (%p5143_p6) target bundleno = 640 (0x280), region = 52  ;;  %1476 = vmatpush1.bf16.msra.mxu1 (!%p5143_p6), %v5988_v5  ;;  %v1158_v21 = vld [vmem:[#allocation2] sm:$0xff] (!%p5143_p6)  ;;  %v1159_v22 = vld [vmem:[#allocation2 + $0x8] sm:$0xff] (!%p5143_p6) }
 0x154   : > { %v1029_v26 = vadd.f32 %v5650_v24, %v6915_v57  ;;  %v1061_v27 = vadd.f32 %v5658_v25, %v6915_v57  ;;  %v1020_v28 = vpop.f32.mrb[37].mxu0  ;;  %v1052_v29 = vpop.f32.mrb[37].mxu1  ;;  %1477 = vmatprep.subr.bf16.mxu1 (!%p5143_p6), %v5990_v6  ;;  %v1163_v24 = vld [vmem:[#allocation2 + $0x28] sm:$0xff] (!%p5143_p6)  ;;  %v1601_v6 = vld [vmem:[#allocation4] sm:$0xff] (!%p5143_p6) }
 0x155   : > { %v1021_v30 = vadd.f32 %v1020_v28, %v6915_v57  ;;  %v1053_v31 = vadd.f32 %v1052_v29, %v6915_v57  ;;  %v5651_v32 = vpop.f32.mrb[38].mxu0  ;;  %v5659_v33 = vpop.f32.mrb[38].mxu1 }
 0x156   : > { %1101 = vst [vmem:[#allocation2 + $0x110] sm:$0xff] %v1029_v26  ;;  %1141 = vst [vmem:[#allocation2 + $0x250] sm:$0xff] %v1061_v27  ;;  %v1032_v34 = vadd.f32 %v5651_v32, %v6915_v57  ;;  %v1064_v35 = vadd.f32 %v5659_v33, %v6915_v57  ;;  %v1023_v36 = vpop.f32.mrb[39].mxu0  ;;  %v1055_v37 = vpop.f32.mrb[39].mxu1  ;;  %v1164_v27 = vld [vmem:[#allocation2 + $0x30] sm:$0xff] (!%p5143_p6)  ;;  %v1162_v55 = vld [vmem:[#allocation2 + $0x20] sm:$0xff] (!%p5143_p6) }
 0x157   : > { %1091 = vst [vmem:[#allocation2 + $0xc0] sm:$0xff] %v1021_v30  ;;  %1131 = vst [vmem:[#allocation2 + $0x200] sm:$0xff] %v1053_v31  ;;  %v1024_v38 = vadd.f32 %v1023_v36, %v6915_v57  ;;  %v1056_v39 = vadd.f32 %v1055_v37, %v6915_v57  ;;  %v5952_v57 = vld [vmem:[%s8007_s2 + $0x2c] ss:$20 sps:$4 sm:$0xff] (!%p5143_p6)   ;;  %1478 = vmatpush1.bf16.msra.mxu1 (!%p5143_p6), %v5992_v10 }
 0x158   : > { %1106 = vst [vmem:[#allocation2 + $0x138] sm:$0xff] %v1032_v34  ;;  %1146 = vst [vmem:[#allocation2 + $0x278] sm:$0xff] %v1064_v35  ;;  %1426 = vmatprep.subr.bf16.mxu0 (!%p5143_p6), %v5952_v57  ;;  %1479 = vmatprep.subr.bf16.mxu1 (!%p5143_p6), %v5994_v11 }
 0x159   : > { %1096 = vst [vmem:[#allocation2 + $0xe8] sm:$0xff] %v1024_v38  ;;  %1136 = vst [vmem:[#allocation2 + $0x228] sm:$0xff] %v1056_v39  ;;  %1427 = vmatpush1.bf16.msra.mxu0 (!%p5143_p6), %v5954_v43 }
 0x15a   : > { %1428 = vmatprep.subr.bf16.mxu0 %v5955_v44 }
 0x15b   : > { %1480 = vmatpush1.bf16.msra.mxu1 %v5996_v14 }
 0x15c   : > { %1481 = vmatprep.subr.bf16.mxu1 %v5998_v15 }
 0x15d   : > { %1429 = vmatpush1.bf16.msra.mxu0 %v5957_v45 }
 0x15e   : > { %1430 = vmatprep.subr.bf16.mxu0 %v5958_v46 }
 0x15f   : > { %1482 = vmatpush1.bf16.msra.mxu1 %v6000_v16 }
 0x161   : > { %1431 = vmatpush1.bf16.msra.mxu0 %v5960_v49 }
 0x162   : > { %1432 = vmatprep.subr.bf16.mxu0 %v5961_v52  ;;  %1500 = vmatmul.mubr.bf16.vlgmr.msra.gmra.mrb[0].mxu1 %v1154_v12 }
 0x165   : > { %1433 = vmatpush1.bf16.msra.mxu0 %v5963_v54  ;;  %v1161_v54 = vld [vmem:[#allocation2 + $0x18] sm:$0xff] }
 0x166   : > { %1434 = vmatprep.subr.bf16.mxu0 %v5964_v56 }
 0x169   : > { %1435 = vmatpush1.bf16.msra.mxu0 %v5968_v59 }
 0x16a   : > { %1436 = vmatprep.subr.bf16.mxu0 %v5970_v60  ;;  %v1167_v60 = vld [vmem:[#allocation2 + $0x48] sm:$0xff] }
 0x16d   : > { %1437 = vmatpush1.bf16.msra.mxu0 %v5974_v3 }
 0x16e   : > { %1438 = vmatprep.subr.bf16.mxu0 %v5976_v4 }
 0x171   : > { %1439 = vmatpush1.bf16.msra.mxu0 %v5980_v7 }
 0x172   : > { %5660 = vmatprep.subr.bf16.mxu0 %v6647_v62 }
 0x174   : > { %1457 = vmatmul.mubr.bf16.vlgmr.msra.gmra.mrb[0].mxu0 %v1154_v12 }
 0x175   : > { %5661 = vmatpush3.bf16.msra.mxu0 %v5985_v13  ;;  %5676 = vmatprep.mubr.msk.bf16.mxu0 %vm6648_vm0, %v6647_v62 }
 0x176   : > { %5662 = vmatprep.subr.bf16.mxu0 %v6647_v62 }
 0x179   : > { %5663 = vmatpush3.bf16.msra.mxu0 %v5989_v63 }
 0x17a   : > { %5664 = vmatprep.subr.bf16.mxu0 %v6647_v62 }
 0x17d   : > { %5665 = vmatpush3.bf16.msra.mxu0 %v5993_v17 }
 0x17e   : > { %5666 = vmatprep.subr.bf16.mxu0 %v6647_v62 }
 0x181   : > { %5667 = vmatpush3.bf16.msra.mxu0 %v5997_v18 }
 0x182   : > { %5668 = vmatprep.subr.bf16.mxu0 %v6647_v62 }
 0x185   : > { %5669 = vmatpush3.bf16.msra.mxu0 %v6001_v0 }
 0x186   : > { %5670 = vmatprep.subr.bf16.mxu0 %v6647_v62 }
 0x189   : > { %5671 = vmatpush3.bf16.msra.mxu0 %v6002_v1 }
 0x18a   : > { %5672 = vmatprep.subr.bf16.mxu0 %v6647_v62 }
 0x18d   : > { %5673 = vmatpush3.bf16.msra.mxu0 %v6003_v19 }
 0x18e   : > { %5674 = vmatprep.subr.bf16.mxu0 %v6647_v62  ;;  %v1602_v62 = vld [vmem:[#allocation4 + $0x8] sm:$0xff] }
 0x191   : > { %5675 = vmatpush3.bf16.msra.mxu0 %v6004_v20 }
 0x194   : > { %5677 = vmatmul.mubr.bf16.vlgmr.msra.gmra.mrb[4].mxu0 %v1154_v12 }
 0x235   : > { %v1501_v37 = vpop.f32.mrb[0].mxu1 }
 0x236   : > { %v1503_v38 = vpop.f32.mrb[1].mxu1  ;;  %v1553_v57 = vadd.f32 %v1501_v37, %v1160_v40 }
 0x237   : > { %v1505_v39 = vpop.f32.mrb[2].mxu1  ;;  %v1554_v2 = vadd.f32 %v1503_v38, %v1161_v54 }
 0x238   : > { %v1507_v41 = vpop.f32.mrb[3].mxu1  ;;  %v1558_v43 = vadd.f32 %v1505_v39, %v1165_v42  ;;  %v5186_v46 = vmul.f32 -1.442695, %v1553_v57 }
 0x239   : > { %v1559_v10 = vadd.f32 %v1507_v41, %v1166_v58 }
 0x23a   : > { %v5189_v48 = vmul.f32 -1.442695, %v1558_v43 }
 0x247   : > { %v1458_v23 = vpop.f32.mrb[0].mxu0 }
 0x248   : > { %v1551_v25 = vadd.f32 %v1458_v23, %v1158_v21  ;;  %v1460_v26 = vpop.f32.mrb[1].mxu0 }
 0x249   : > { %v1552_v28 = vadd.f32 %v1460_v26, %v1159_v22  ;;  %v1462_v29 = vpop.f32.mrb[2].mxu0 }
 0x24a   : > { %v1556_v30 = vadd.f32 %v1462_v29, %v1163_v24  ;;  %v1464_v31 = vpop.f32.mrb[3].mxu0  ;;  %v5184_v32 = vmul.f32 -1.442695, %v1551_v25 }
 0x24b   : > { %v5185_v33 = vmul.f32 -1.442695, %v1552_v28  ;;  %v1557_v34 = vadd.f32 %v1464_v31, %v1164_v27 }
 0x24c   : > { %v5187_v36 = vmul.f32 -1.442695, %v1556_v30 }
 0x24d   : > { %v5188_v35 = vmul.f32 -1.442695, %v1557_v34  ;;  %6005 = vpow2.f32 %v5185_v33 }
 0x24e   : > { %6007 = vpow2.f32 %v5184_v32 }
 0x24f   : > { %6009 = vpow2.f32 %v5188_v35 }
 0x250   : > { %6011 = vpow2.f32 %v5187_v36 }
 0x251   : > { %6013 = vpow2.f32 %v5186_v46 }
 0x252   : > { %6015 = vpow2.f32 %v5189_v48 }
 0x257   : > { %v6006_v44 = vpop.eup %6005 }
 0x258   : > { %v6008_v45 = vpop.eup %6007  ;;  %v1580_v49 = vadd.f32 1.0, %v6006_v44 }
 0x259   : > { %v6010_v47 = vpop.eup %6009  ;;  %v1579_v51 = vadd.f32 1.0, %v6008_v45 }
 0x25a   : > { %v6012_v50 = vpop.eup %6011  ;;  %v1583_v52 = vadd.f32 1.0, %v6010_v47  ;;  %6017 = vrcp.f32 %v1580_v49 }
 0x25b   : > { %v1582_v53 = vadd.f32 1.0, %v6012_v50  ;;  %6019 = vrcp.f32 %v1579_v51  ;;  %v6014_v56 = vpop.eup %6013 }
 0x25c   : > { %6021 = vrcp.f32 %v1583_v52  ;;  %v6016_v61 = vpop.eup %6015  ;;  %v1581_v9 = vadd.f32 1.0, %v6014_v56 }
 0x25d   : > { %6023 = vrcp.f32 %v1582_v53  ;;  %v1584_v18 = vadd.f32 1.0, %v6016_v61 }
 0x25e   : > { %6025 = vrcp.f32 %v1581_v9 }
 0x264   : > { %v6018_v5 = vpop.eup %6017 }
 0x265   : > { %v6020_v8 = vpop.eup %6019  ;;  %v1603_v63 = vmul.f32 %v6018_v5, %v1601_v6 }
 0x266   : > { %v6022_v14 = vpop.eup %6021 }
 0x267   : > { %v1544_v59 = vpop.f32.mrb[4].mxu0  ;;  %v6024_v17 = vpop.eup %6023  ;;  %v1604_v19 = vmul.f32 %v6022_v14, %v1602_v62 }
 0x268   : > { %v1555_v3 = vadd.f32 %v1544_v59, %v1162_v55  ;;  %v5678_v4 = vpop.f32.mrb[5].mxu0  ;;  %v6026_v21 = vpop.eup %6025 }
 0x269   : > { %v1547_v7 = vpop.f32.mrb[6].mxu0 }
 0x26a   : > { %v1597_v11 = vmax.f32 %v1554_v2, %v1555_v3  ;;  %v1560_v12 = vadd.f32 %v1547_v7, %v1167_v60  ;;  %v5679_v13 = vpop.f32.mrb[7].mxu0 }
 0x26c   : > { %v1599_v15 = vmul.f32 %v6020_v8, %v1597_v11  ;;  %v1598_v16 = vmax.f32 %v1559_v10, %v1560_v12 }
 0x26e   : > { %v1605_v0 = vadd.f32 %v1603_v63, %v1599_v15  ;;  %v1600_v1 = vmul.f32 %v6024_v17, %v1598_v16 }
 0x270   : > { %6027 = vtanh.f32 %v1605_v0  ;;  %1611 = vst [vmem:[#allocation4] sm:$0xff] %v1605_v0  ;;  %v1606_v20 = vadd.f32 %v1604_v19, %v1600_v1 }
 0x271   : > { %6029 = vrcp.f32 %v1584_v18 }
 0x272   : > { %6031 = vtanh.f32 %v1606_v20  ;;  %1612 = vst [vmem:[#allocation4 + $0x8] sm:$0xff] %v1606_v20 }
 0x27a   : > { %v6028_v22 = vpop.eup %6027 }
 0x27b   : > { %v6030_v23 = vpop.eup %6029  ;;  %v1609_v24 = vmul.f32 %v6028_v22, %v6026_v21 }
 0x27c   : > { %v6032_v25 = vpop.eup %6031 }
 0x27d   : > { %1613 = vst [vmem:[#allocation3] sm:$0xff] %v1609_v24  ;;  %1615 = vst [vmem:[%s6743_s14] sm:$0xff] %v1609_v24  ;;  %v1610_v26 = vmul.f32 %v6032_v25, %v6030_v23 }
 0x27f   : > { %1614 = vst [vmem:[#allocation3 + $0x8] sm:$0xff] %v1610_v26  ;;  %1616 = vst [vmem:[%s6743_s14 + $0x8] sm:$0xff] %v1610_v26 }
 0x280 PF: > { %s1617_s20 = sadd.s32 1, %s6731_s28 }
 0x281   : > { %p5190_p7 = scmp.ge.s32.totalorder %s1617_s20, 10 }
 0x282   : > { %v6033_v27 = vld [vmem:[%s8007_s2 + $0x4] ss:$20 sps:$4 sm:$0xff] (!%p5190_p7)   ;;  %v6035_v28 = vld [vmem:[%s8007_s2] ss:$20 sps:$4 sm:$0xff] (!%p5190_p7)   ;;  %v6649_v29 = vmov (!%p5190_p7), 0   ;;  %v6650_v2 = vmov (!%p5190_p7), 0.0  }
 0x283   : > { %1621 = sbr.rel (%p5190_p7) target bundleno = 944 (0x3b0), region = 56  ;;  %1926 = vmatprep.mubr.bf16.mxu0 (!%p5190_p7), %v6649_v29  ;;  %1969 = vmatprep.mubr.bf16.mxu1 (!%p5190_p7), %v6649_v29  ;;  %v6036_v30 = vld [vmem:[%s8007_s2 + $0x2c] ss:$20 sps:$4 sm:$0xff] (!%p5190_p7)   ;;  %v6038_v31 = vld [vmem:[%s8007_s2 + $0x28] ss:$20 sps:$4 sm:$0xff] (!%p5190_p7)   ;;  %vm6651_vm1 = vmmov (!%p5190_p7), 0  }
 0x284   : > { %1894 = vmatprep.subr.bf16.mxu0 (!%p5190_p7), %v6033_v27  ;;  %v6039_v32 = vld [vmem:[%s8007_s2 + $0x54] ss:$20 sps:$4 sm:$0xff] (!%p5190_p7)   ;;  %v6041_v33 = vld [vmem:[%s8007_s2 + $0x50] ss:$20 sps:$4 sm:$0xff] (!%p5190_p7)   ;;  %v6050_v35 = vld [vmem:[%s8007_s2 + $0xc] ss:$20 sps:$4 sm:$0xff] (!%p5190_p7)  }
 0x285   : > { %1895 = vmatpush1.bf16.msra.mxu0 (!%p5190_p7), %v6035_v28  ;;  %v6042_v34 = vld [vmem:[%s8007_s2 + $0x7c] ss:$20 sps:$4 sm:$0xff] (!%p5190_p7)   ;;  %1937 = vmatprep.subr.bf16.mxu1 (!%p5190_p7), %v6050_v35  ;;  %v6044_v37 = vld [vmem:[%s8007_s2 + $0x78] ss:$20 sps:$4 sm:$0xff] (!%p5190_p7)   ;;  %v6056_v38 = vld [vmem:[%s8007_s2 + $0x34] ss:$20 sps:$4 sm:$0xff] (!%p5190_p7)  }
 0x286   : > { %1896 = vmatprep.subr.bf16.mxu0 (!%p5190_p7), %v6036_v30  ;;  %v6053_v36 = vld [vmem:[%s8007_s2 + $0x8] ss:$20 sps:$4 sm:$0xff] (!%p5190_p7)   ;;  %v6059_v39 = vld [vmem:[%s8007_s2 + $0x30] ss:$20 sps:$4 sm:$0xff] (!%p5190_p7)   ;;  %v6047_v42 = vld [vmem:[%s8007_s2 + $0xa0] ss:$20 sps:$4 sm:$0xff] (!%p5190_p7)  }
 0x287   : > { %1938 = vmatpush1.bf16.msra.mxu1 (!%p5190_p7), %v6053_v36  ;;  %v6045_v40 = vld [vmem:[%s8007_s2 + $0xa4] ss:$20 sps:$4 sm:$0xff] (!%p5190_p7)   ;;  %v6062_v41 = vld [vmem:[%s8007_s2 + $0x5c] ss:$20 sps:$4 sm:$0xff] (!%p5190_p7)   ;;  %v6048_v43 = vld [vmem:[%s8007_s2 + $0xcc] ss:$20 sps:$4 sm:$0xff] (!%p5190_p7)  }
 0x288   : > { %1939 = vmatprep.subr.bf16.mxu1 (!%p5190_p7), %v6056_v38  ;;  %v6065_v57 = vld [vmem:[%s8007_s2 + $0x58] ss:$20 sps:$4 sm:$0xff] (!%p5190_p7)   ;;  %v6052_v45 = vld [vmem:[%s8007_s2 + $0xc8] ss:$20 sps:$4 sm:$0xff] (!%p5190_p7)   ;;  %v6068_v47 = vld [vmem:[%s8007_s2 + $0x80] ss:$20 sps:$4 sm:$0xff] (!%p5190_p7)  }
 0x289   : > { %1897 = vmatpush1.bf16.msra.mxu0 (!%p5190_p7), %v6038_v31  ;;  %v6066_v44 = vld [vmem:[%s8007_s2 + $0x84] ss:$20 sps:$4 sm:$0xff] (!%p5190_p7)   ;;  %v6054_v46 = vld [vmem:[%s8007_s2 + $0xf4] ss:$20 sps:$4 sm:$0xff] (!%p5190_p7)   ;;  %v6070_v48 = vld [vmem:[%s8007_s2 + $0xac] ss:$20 sps:$4 sm:$0xff] (!%p5190_p7)  }
 0x28a   : > { %1898 = vmatprep.subr.bf16.mxu0 %v6039_v32  ;;  %v6058_v49 = vld [vmem:[%s8007_s2 + $0xf0] ss:$20 sps:$4 sm:$0xff]   ;;  %v6072_v51 = vld [vmem:[%s8007_s2 + $0xa8] ss:$20 sps:$4 sm:$0xff]   ;;  %v6064_v53 = vld [vmem:[%s8007_s2 + $0x118] ss:$20 sps:$4 sm:$0xff]  }
 0x28b   : > { %1940 = vmatpush1.bf16.msra.mxu1 %v6059_v39  ;;  %v6060_v50 = vld [vmem:[%s8007_s2 + $0x11c] ss:$20 sps:$4 sm:$0xff]   ;;  %v6074_v52 = vld [vmem:[%s8007_s2 + $0xd4] ss:$20 sps:$4 sm:$0xff]   ;;  %v1622_v54 = vld [vmem:[#allocation3] sm:$0xff] }
 0x28c   : > { %1941 = vmatprep.subr.bf16.mxu1 %v6062_v41  ;;  %v1623_v55 = vld [vmem:[#allocation3 + $0x8] sm:$0xff]  ;;  %v6076_v56 = vld [vmem:[%s8007_s2 + $0xd0] ss:$20 sps:$4 sm:$0xff]   ;;  %v6084_v5 = vld [vmem:[%s8007_s2 + $0x120] ss:$20 sps:$4 sm:$0xff]  }
 0x28d   : > { %1899 = vmatpush1.bf16.msra.mxu0 %v6041_v33  ;;  %v6078_v58 = vld [vmem:[%s8007_s2 + $0xfc] ss:$20 sps:$4 sm:$0xff]   ;;  %v1624_v59 = vpack.c.bf16 %v1623_v55, %v1622_v54  ;;  %v6080_v61 = vld [vmem:[%s8007_s2 + $0xf8] ss:$20 sps:$4 sm:$0xff]   ;;  %v6077_v6 = vld [vmem:[%s8007_s2 + $0x60] ss:$20 sps:$4 sm:$0xff]  }
 0x28e   : > { %1900 = vmatprep.subr.bf16.mxu0 %v6042_v34  ;;  %v6069_v60 = vld [vmem:[%s8007_s2 + $0x10] ss:$20 sps:$4 sm:$0xff]   ;;  %v6073_v4 = vld [vmem:[%s8007_s2 + $0x38] ss:$20 sps:$4 sm:$0xff]   ;;  %v6081_v7 = vld [vmem:[%s8007_s2 + $0x88] ss:$20 sps:$4 sm:$0xff]  }
 0x28f   : > { %1942 = vmatpush1.bf16.msra.mxu1 %v6065_v57  ;;  %v6082_v3 = vld [vmem:[%s8007_s2 + $0x124] ss:$20 sps:$4 sm:$0xff]   ;;  %v6087_v10 = vld [vmem:[%s8007_s2 + $0x100] ss:$20 sps:$4 sm:$0xff]   ;;  %v6088_v11 = vld [vmem:[%s8007_s2 + $0x128] ss:$20 sps:$4 sm:$0xff]  }
 0x290   : > { %1943 = vmatprep.subr.bf16.mxu1 %v6066_v44  ;;  %v6085_v8 = vld [vmem:[%s8007_s2 + $0xb0] ss:$20 sps:$4 sm:$0xff]   ;;  %v6086_v9 = vld [vmem:[%s8007_s2 + $0xd8] ss:$20 sps:$4 sm:$0xff]  }
 0x291   : > { %1901 = vmatpush1.bf16.msra.mxu0 %v6044_v37  ;;  %v1628_v12 = vld [vmem:[#allocation2 + $0x50] sm:$0xff]  ;;  %v1629_v13 = vld [vmem:[#allocation2 + $0x58] sm:$0xff]  ;;  %v1634_v16 = vld [vmem:[#allocation2 + $0x80] sm:$0xff] }
 0x292   : > { %1902 = vmatprep.subr.bf16.mxu0 %v6045_v40  ;;  %v1633_v62 = vld [vmem:[#allocation2 + $0x78] sm:$0xff]  ;;  %v1630_v27 = vld [vmem:[#allocation2 + $0x60] sm:$0xff]  ;;  %v1635_v29 = vld [vmem:[#allocation2 + $0x88] sm:$0xff] }
 0x293   : > { %1944 = vmatpush1.bf16.msra.mxu1 %v6068_v47  ;;  %v1632_v57 = vld [vmem:[#allocation2 + $0x70] sm:$0xff] }
 0x294   : > { %1945 = vmatprep.subr.bf16.mxu1 %v6070_v48  ;;  %v1636_v44 = vld [vmem:[#allocation2 + $0x90] sm:$0xff] }
 0x295   : > { %1903 = vmatpush1.bf16.msra.mxu0 %v6047_v42  ;;  %v1631_v42 = vld [vmem:[#allocation2 + $0x68] sm:$0xff] }
 0x296   : > { %1904 = vmatprep.subr.bf16.mxu0 %v6048_v43 }
 0x297   : > { %1946 = vmatpush1.bf16.msra.mxu1 %v6072_v51 }
 0x298   : > { %1947 = vmatprep.subr.bf16.mxu1 %v6074_v52  ;;  %v2071_v52 = vld [vmem:[#allocation4] sm:$0xff] }
 0x299   : > { %1905 = vmatpush1.bf16.msra.mxu0 %v6052_v45 }
 0x29a   : > { %1906 = vmatprep.subr.bf16.mxu0 %v6054_v46  ;;  %v1637_v46 = vld [vmem:[#allocation2 + $0x98] sm:$0xff] }
 0x29b   : > { %1948 = vmatpush1.bf16.msra.mxu1 %v6076_v56 }
 0x29c   : > { %1949 = vmatprep.subr.bf16.mxu1 %v6078_v58 }
 0x29d   : > { %1907 = vmatpush1.bf16.msra.mxu0 %v6058_v49 }
 0x29e   : > { %1908 = vmatprep.subr.bf16.mxu0 %v6060_v50 }
 0x29f   : > { %1950 = vmatpush1.bf16.msra.mxu1 %v6080_v61 }
 0x2a0   : > { %1951 = vmatprep.subr.bf16.mxu1 %v6082_v3 }
 0x2a1   : > { %1909 = vmatpush1.bf16.msra.mxu0 %v6064_v53 }
 0x2a2   : > { %5680 = vmatprep.subr.bf16.mxu0 %v6650_v2 }
 0x2a3   : > { %1952 = vmatpush1.bf16.msra.mxu1 %v6084_v5 }
 0x2a4   : > { %1927 = vmatmul.mubr.bf16.vlgmr.msra.gmra.mrb[0].mxu0 %v1624_v59 }
 0x2a5   : > { %5681 = vmatpush3.bf16.msra.mxu0 %v6069_v60  ;;  %5696 = vmatprep.mubr.msk.bf16.mxu0 %vm6651_vm1, %v6650_v2 }
 0x2a6   : > { %5682 = vmatprep.subr.bf16.mxu0 %v6650_v2  ;;  %1970 = vmatmul.mubr.bf16.vlgmr.msra.gmra.mrb[0].mxu1 %v1624_v59 }
 0x2a9   : > { %5683 = vmatpush3.bf16.msra.mxu0 %v6073_v4 }
 0x2aa   : > { %5684 = vmatprep.subr.bf16.mxu0 %v6650_v2 }
 0x2ad   : > { %5685 = vmatpush3.bf16.msra.mxu0 %v6077_v6 }
 0x2ae   : > { %5686 = vmatprep.subr.bf16.mxu0 %v6650_v2 }
 0x2b1   : > { %5687 = vmatpush3.bf16.msra.mxu0 %v6081_v7 }
 0x2b2   : > { %5688 = vmatprep.subr.bf16.mxu0 %v6650_v2 }
 0x2b5   : > { %5689 = vmatpush3.bf16.msra.mxu0 %v6085_v8 }
 0x2b6   : > { %5690 = vmatprep.subr.bf16.mxu0 %v6650_v2 }
 0x2b9   : > { %5691 = vmatpush3.bf16.msra.mxu0 %v6086_v9 }
 0x2ba   : > { %5692 = vmatprep.subr.bf16.mxu0 %v6650_v2 }
 0x2bd   : > { %5693 = vmatpush3.bf16.msra.mxu0 %v6087_v10 }
 0x2be   : > { %5694 = vmatprep.subr.bf16.mxu0 %v6650_v2  ;;  %v2072_v2 = vld [vmem:[#allocation4 + $0x8] sm:$0xff] }
 0x2c1   : > { %5695 = vmatpush3.bf16.msra.mxu0 %v6088_v11 }
 0x2c4   : > { %5697 = vmatmul.mubr.bf16.vlgmr.msra.gmra.mrb[4].mxu0 %v1624_v59 }
 0x377   : > { %v1928_v14 = vpop.f32.mrb[0].mxu0 }
 0x378   : > { %v2021_v15 = vadd.f32 %v1928_v14, %v1628_v12  ;;  %v1930_v63 = vpop.f32.mrb[1].mxu0 }
 0x379   : > { %v2022_v17 = vadd.f32 %v1930_v63, %v1629_v13  ;;  %v1932_v18 = vpop.f32.mrb[2].mxu0  ;;  %v1971_v24 = vpop.f32.mrb[0].mxu1 }
 0x37a   : > { %v2026_v0 = vadd.f32 %v1932_v18, %v1633_v62  ;;  %v1934_v1 = vpop.f32.mrb[3].mxu0  ;;  %v5231_v19 = vmul.f32 -1.442695, %v2021_v15  ;;  %v1973_v25 = vpop.f32.mrb[1].mxu1  ;;  %v2023_v30 = vadd.f32 %v1971_v24, %v1630_v27 }
 0x37b   : > { %v5232_v20 = vmul.f32 -1.442695, %v2022_v17  ;;  %v2027_v21 = vadd.f32 %v1934_v1, %v1634_v16  ;;  %v1975_v26 = vpop.f32.mrb[2].mxu1  ;;  %v2024_v48 = vadd.f32 %v1973_v25, %v1631_v42 }
 0x37c   : > { %v5234_v23 = vmul.f32 -1.442695, %v2026_v0  ;;  %v1977_v28 = vpop.f32.mrb[3].mxu1  ;;  %v2028_v31 = vadd.f32 %v1975_v26, %v1635_v29  ;;  %v5233_v34 = vmul.f32 -1.442695, %v2023_v30 }
 0x37d   : > { %v5235_v22 = vmul.f32 -1.442695, %v2027_v21  ;;  %6089 = vpow2.f32 %v5232_v20  ;;  %v2029_v56 = vadd.f32 %v1977_v28, %v1636_v44 }
 0x37e   : > { %6091 = vpow2.f32 %v5231_v19  ;;  %v5236_v36 = vmul.f32 -1.442695, %v2028_v31 }
 0x37f   : > { %6093 = vpow2.f32 %v5235_v22 }
 0x380   : > { %6095 = vpow2.f32 %v5234_v23 }
 0x381   : > { %6097 = vpow2.f32 %v5233_v34 }
 0x382   : > { %6099 = vpow2.f32 %v5236_v36 }
 0x387   : > { %v6090_v32 = vpop.eup %6089 }
 0x388   : > { %v6092_v33 = vpop.eup %6091  ;;  %v2050_v37 = vadd.f32 1.0, %v6090_v32 }
 0x389   : > { %v6094_v35 = vpop.eup %6093  ;;  %v2049_v39 = vadd.f32 1.0, %v6092_v33 }
 0x38a   : > { %v6096_v38 = vpop.eup %6095  ;;  %v2053_v40 = vadd.f32 1.0, %v6094_v35  ;;  %6101 = vrcp.f32 %v2050_v37 }
 0x38b   : > { %v2052_v41 = vadd.f32 1.0, %v6096_v38  ;;  %6103 = vrcp.f32 %v2049_v39  ;;  %v6098_v43 = vpop.eup %6097 }
 0x38c   : > { %6105 = vrcp.f32 %v2053_v40  ;;  %v6100_v47 = vpop.eup %6099  ;;  %v2051_v55 = vadd.f32 1.0, %v6098_v43 }
 0x38d   : > { %6107 = vrcp.f32 %v2052_v41  ;;  %v2054_v7 = vadd.f32 1.0, %v6100_v47 }
 0x38e   : > { %6109 = vrcp.f32 %v2051_v55 }
 0x394   : > { %v6102_v51 = vpop.eup %6101 }
 0x395   : > { %v6104_v54 = vpop.eup %6103  ;;  %v2073_v4 = vmul.f32 %v6102_v51, %v2071_v52 }
 0x396   : > { %v6106_v61 = vpop.eup %6105 }
 0x397   : > { %v2014_v45 = vpop.f32.mrb[4].mxu0  ;;  %v6108_v6 = vpop.eup %6107  ;;  %v2074_v10 = vmul.f32 %v6106_v61, %v2072_v2 }
 0x398   : > { %v2025_v49 = vadd.f32 %v2014_v45, %v1632_v57  ;;  %v5698_v50 = vpop.f32.mrb[5].mxu0  ;;  %v6110_v12 = vpop.eup %6109 }
 0x399   : > { %v2017_v53 = vpop.f32.mrb[6].mxu0 }
 0x39a   : > { %v2067_v58 = vmax.f32 %v2024_v48, %v2025_v49  ;;  %v2030_v59 = vadd.f32 %v2017_v53, %v1637_v46  ;;  %v5699_v60 = vpop.f32.mrb[7].mxu0 }
 0x39c   : > { %v2069_v3 = vmul.f32 %v6104_v54, %v2067_v58  ;;  %v2068_v5 = vmax.f32 %v2029_v56, %v2030_v59 }
 0x39e   : > { %v2075_v8 = vadd.f32 %v2073_v4, %v2069_v3  ;;  %v2070_v9 = vmul.f32 %v6108_v6, %v2068_v5 }
 0x3a0   : > { %6111 = vtanh.f32 %v2075_v8  ;;  %2081 = vst [vmem:[#allocation4] sm:$0xff] %v2075_v8  ;;  %v2076_v11 = vadd.f32 %v2074_v10, %v2070_v9 }
 0x3a1   : > { %6113 = vrcp.f32 %v2054_v7 }
 0x3a2   : > { %6115 = vtanh.f32 %v2076_v11  ;;  %2082 = vst [vmem:[#allocation4 + $0x8] sm:$0xff] %v2076_v11 }
 0x3aa   : > { %v6112_v13 = vpop.eup %6111 }
 0x3ab   : > { %v6114_v14 = vpop.eup %6113  ;;  %v2079_v62 = vmul.f32 %v6112_v13, %v6110_v12 }
 0x3ac   : > { %v6116_v15 = vpop.eup %6115 }
 0x3ad   : > { %2083 = vst [vmem:[#allocation3] sm:$0xff] %v2079_v62  ;;  %5237 = vst [vmem:[%s6743_s14 + $0x10] sm:$0xff] %v2079_v62  ;;  %v2080_v63 = vmul.f32 %v6116_v15, %v6114_v14 }
 0x3af   : > { %2084 = vst [vmem:[#allocation3 + $0x8] sm:$0xff] %v2080_v63  ;;  %5238 = vst [vmem:[%s6743_s14 + $0x18] sm:$0xff] %v2080_v63 }
 0x3b0 PF: > { %s2088_s16 = sadd.s32 2, %s6731_s28 }
 0x3b1   : > { %p5239_p8 = scmp.ge.s32.totalorder %s2088_s16, 10 }
 0x3b2   : > { %v6117_v16 = vld [vmem:[%s8007_s2 + $0x4] ss:$20 sps:$4 sm:$0xff] (!%p5239_p8)   ;;  %v6119_v17 = vld [vmem:[%s8007_s2] ss:$20 sps:$4 sm:$0xff] (!%p5239_p8)   ;;  %v6652_v18 = vmov (!%p5239_p8), 0   ;;  %v6653_v48 = vmov (!%p5239_p8), 0.0  }
 0x3b3   : > { %2092 = sbr.rel (%p5239_p8) target bundleno = 1248 (0x4e0), region = 60  ;;  %2397 = vmatprep.mubr.bf16.mxu0 (!%p5239_p8), %v6652_v18  ;;  %2440 = vmatprep.mubr.bf16.mxu1 (!%p5239_p8), %v6652_v18  ;;  %v6120_v0 = vld [vmem:[%s8007_s2 + $0x2c] ss:$20 sps:$4 sm:$0xff] (!%p5239_p8)   ;;  %v6122_v1 = vld [vmem:[%s8007_s2 + $0x28] ss:$20 sps:$4 sm:$0xff] (!%p5239_p8)   ;;  %vm6654_vm2 = vmmov (!%p5239_p8), 0  }
 0x3b4   : > { %2365 = vmatprep.subr.bf16.mxu0 (!%p5239_p8), %v6117_v16  ;;  %v6123_v19 = vld [vmem:[%s8007_s2 + $0x54] ss:$20 sps:$4 sm:$0xff] (!%p5239_p8)   ;;  %v6125_v20 = vld [vmem:[%s8007_s2 + $0x50] ss:$20 sps:$4 sm:$0xff] (!%p5239_p8)   ;;  %v6134_v22 = vld [vmem:[%s8007_s2 + $0xc] ss:$20 sps:$4 sm:$0xff] (!%p5239_p8)  }
 0x3b5   : > { %2366 = vmatpush1.bf16.msra.mxu0 (!%p5239_p8), %v6119_v17  ;;  %v6126_v21 = vld [vmem:[%s8007_s2 + $0x7c] ss:$20 sps:$4 sm:$0xff] (!%p5239_p8)   ;;  %2408 = vmatprep.subr.bf16.mxu1 (!%p5239_p8), %v6134_v22  ;;  %v6128_v24 = vld [vmem:[%s8007_s2 + $0x78] ss:$20 sps:$4 sm:$0xff] (!%p5239_p8)   ;;  %v6140_v25 = vld [vmem:[%s8007_s2 + $0x34] ss:$20 sps:$4 sm:$0xff] (!%p5239_p8)  }
 0x3b6   : > { %2367 = vmatprep.subr.bf16.mxu0 (!%p5239_p8), %v6120_v0  ;;  %v6137_v23 = vld [vmem:[%s8007_s2 + $0x8] ss:$20 sps:$4 sm:$0xff] (!%p5239_p8)   ;;  %v6143_v26 = vld [vmem:[%s8007_s2 + $0x30] ss:$20 sps:$4 sm:$0xff] (!%p5239_p8)   ;;  %v6131_v29 = vld [vmem:[%s8007_s2 + $0xa0] ss:$20 sps:$4 sm:$0xff] (!%p5239_p8)  }
 0x3b7   : > { %2409 = vmatpush1.bf16.msra.mxu1 (!%p5239_p8), %v6137_v23  ;;  %v6129_v27 = vld [vmem:[%s8007_s2 + $0xa4] ss:$20 sps:$4 sm:$0xff] (!%p5239_p8)   ;;  %v6146_v28 = vld [vmem:[%s8007_s2 + $0x5c] ss:$20 sps:$4 sm:$0xff] (!%p5239_p8)   ;;  %v6132_v31 = vld [vmem:[%s8007_s2 + $0xcc] ss:$20 sps:$4 sm:$0xff] (!%p5239_p8)  }
 0x3b8   : > { %2410 = vmatprep.subr.bf16.mxu1 (!%p5239_p8), %v6140_v25  ;;  %v6149_v30 = vld [vmem:[%s8007_s2 + $0x58] ss:$20 sps:$4 sm:$0xff] (!%p5239_p8)   ;;  %v6136_v33 = vld [vmem:[%s8007_s2 + $0xc8] ss:$20 sps:$4 sm:$0xff] (!%p5239_p8)   ;;  %v6152_v35 = vld [vmem:[%s8007_s2 + $0x80] ss:$20 sps:$4 sm:$0xff] (!%p5239_p8)  }
 0x3b9   : > { %2368 = vmatpush1.bf16.msra.mxu0 (!%p5239_p8), %v6122_v1  ;;  %v6150_v32 = vld [vmem:[%s8007_s2 + $0x84] ss:$20 sps:$4 sm:$0xff] (!%p5239_p8)   ;;  %v6138_v34 = vld [vmem:[%s8007_s2 + $0xf4] ss:$20 sps:$4 sm:$0xff] (!%p5239_p8)   ;;  %v6154_v36 = vld [vmem:[%s8007_s2 + $0xac] ss:$20 sps:$4 sm:$0xff] (!%p5239_p8)  }
 0x3ba   : > { %2369 = vmatprep.subr.bf16.mxu0 %v6123_v19  ;;  %v6142_v37 = vld [vmem:[%s8007_s2 + $0xf0] ss:$20 sps:$4 sm:$0xff]   ;;  %v6156_v39 = vld [vmem:[%s8007_s2 + $0xa8] ss:$20 sps:$4 sm:$0xff]   ;;  %v6148_v41 = vld [vmem:[%s8007_s2 + $0x118] ss:$20 sps:$4 sm:$0xff]  }
 0x3bb   : > { %2411 = vmatpush1.bf16.msra.mxu1 %v6143_v26  ;;  %v6144_v38 = vld [vmem:[%s8007_s2 + $0x11c] ss:$20 sps:$4 sm:$0xff]   ;;  %v6158_v40 = vld [vmem:[%s8007_s2 + $0xd4] ss:$20 sps:$4 sm:$0xff]   ;;  %v2093_v42 = vld [vmem:[#allocation3] sm:$0xff] }
 0x3bc   : > { %2412 = vmatprep.subr.bf16.mxu1 %v6146_v28  ;;  %v2094_v57 = vld [vmem:[#allocation3 + $0x8] sm:$0xff]  ;;  %v6160_v43 = vld [vmem:[%s8007_s2 + $0xd0] ss:$20 sps:$4 sm:$0xff]   ;;  %v6168_v51 = vld [vmem:[%s8007_s2 + $0x120] ss:$20 sps:$4 sm:$0xff]  }
 0x3bd   : > { %2370 = vmatpush1.bf16.msra.mxu0 %v6125_v20  ;;  %v6162_v44 = vld [vmem:[%s8007_s2 + $0xfc] ss:$20 sps:$4 sm:$0xff]   ;;  %v2095_v45 = vpack.c.bf16 %v2094_v57, %v2093_v42  ;;  %v6164_v47 = vld [vmem:[%s8007_s2 + $0xf8] ss:$20 sps:$4 sm:$0xff]   ;;  %v6161_v52 = vld [vmem:[%s8007_s2 + $0x60] ss:$20 sps:$4 sm:$0xff]  }
 0x3be   : > { %2371 = vmatprep.subr.bf16.mxu0 %v6126_v21  ;;  %v6153_v46 = vld [vmem:[%s8007_s2 + $0x10] ss:$20 sps:$4 sm:$0xff]   ;;  %v6157_v50 = vld [vmem:[%s8007_s2 + $0x38] ss:$20 sps:$4 sm:$0xff]   ;;  %v6165_v53 = vld [vmem:[%s8007_s2 + $0x88] ss:$20 sps:$4 sm:$0xff]  }
 0x3bf   : > { %2413 = vmatpush1.bf16.msra.mxu1 %v6149_v30  ;;  %v6166_v49 = vld [vmem:[%s8007_s2 + $0x124] ss:$20 sps:$4 sm:$0xff]   ;;  %v6171_v56 = vld [vmem:[%s8007_s2 + $0x100] ss:$20 sps:$4 sm:$0xff]   ;;  %v6172_v58 = vld [vmem:[%s8007_s2 + $0x128] ss:$20 sps:$4 sm:$0xff]  }
 0x3c0   : > { %2414 = vmatprep.subr.bf16.mxu1 %v6150_v32  ;;  %v6169_v54 = vld [vmem:[%s8007_s2 + $0xb0] ss:$20 sps:$4 sm:$0xff]   ;;  %v6170_v55 = vld [vmem:[%s8007_s2 + $0xd8] ss:$20 sps:$4 sm:$0xff]  }
 0x3c1   : > { %2372 = vmatpush1.bf16.msra.mxu0 %v6128_v24  ;;  %v2099_v59 = vld [vmem:[#allocation2 + $0xa0] sm:$0xff]  ;;  %v2100_v60 = vld [vmem:[#allocation2 + $0xa8] sm:$0xff]  ;;  %v2105_v5 = vld [vmem:[#allocation2 + $0xd0] sm:$0xff] }
 0x3c2   : > { %2373 = vmatprep.subr.bf16.mxu0 %v6129_v27  ;;  %v2104_v2 = vld [vmem:[#allocation2 + $0xc8] sm:$0xff]  ;;  %v2101_v16 = vld [vmem:[#allocation2 + $0xb0] sm:$0xff]  ;;  %v2106_v18 = vld [vmem:[#allocation2 + $0xd8] sm:$0xff] }
 0x3c3   : > { %2415 = vmatpush1.bf16.msra.mxu1 %v6152_v35  ;;  %v2103_v30 = vld [vmem:[#allocation2 + $0xc0] sm:$0xff] }
 0x3c4   : > { %2416 = vmatprep.subr.bf16.mxu1 %v6154_v36  ;;  %v2107_v32 = vld [vmem:[#allocation2 + $0xe0] sm:$0xff] }
 0x3c5   : > { %2374 = vmatpush1.bf16.msra.mxu0 %v6131_v29  ;;  %v2102_v29 = vld [vmem:[#allocation2 + $0xb8] sm:$0xff] }
 0x3c6   : > { %2375 = vmatprep.subr.bf16.mxu0 %v6132_v31 }
 0x3c7   : > { %2417 = vmatpush1.bf16.msra.mxu1 %v6156_v39 }
 0x3c8   : > { %2418 = vmatprep.subr.bf16.mxu1 %v6158_v40  ;;  %v2542_v40 = vld [vmem:[#allocation4] sm:$0xff] }
 0x3c9   : > { %2376 = vmatpush1.bf16.msra.mxu0 %v6136_v33 }
 0x3ca   : > { %2377 = vmatprep.subr.bf16.mxu0 %v6138_v34  ;;  %v2108_v34 = vld [vmem:[#allocation2 + $0xe8] sm:$0xff] }
 0x3cb   : > { %2419 = vmatpush1.bf16.msra.mxu1 %v6160_v43 }
 0x3cc   : > { %2420 = vmatprep.subr.bf16.mxu1 %v6162_v44 }
 0x3cd   : > { %2378 = vmatpush1.bf16.msra.mxu0 %v6142_v37 }
 0x3ce   : > { %2379 = vmatprep.subr.bf16.mxu0 %v6144_v38 }
 0x3cf   : > { %2421 = vmatpush1.bf16.msra.mxu1 %v6164_v47 }
 0x3d0   : > { %2422 = vmatprep.subr.bf16.mxu1 %v6166_v49 }
 0x3d1   : > { %2380 = vmatpush1.bf16.msra.mxu0 %v6148_v41 }
 0x3d2   : > { %5700 = vmatprep.subr.bf16.mxu0 %v6653_v48 }
 0x3d3   : > { %2423 = vmatpush1.bf16.msra.mxu1 %v6168_v51 }
 0x3d4   : > { %2398 = vmatmul.mubr.bf16.vlgmr.msra.gmra.mrb[0].mxu0 %v2095_v45 }
 0x3d5   : > { %5701 = vmatpush3.bf16.msra.mxu0 %v6153_v46  ;;  %5716 = vmatprep.mubr.msk.bf16.mxu0 %vm6654_vm2, %v6653_v48 }
 0x3d6   : > { %5702 = vmatprep.subr.bf16.mxu0 %v6653_v48  ;;  %2441 = vmatmul.mubr.bf16.vlgmr.msra.gmra.mrb[0].mxu1 %v2095_v45 }
 0x3d9   : > { %5703 = vmatpush3.bf16.msra.mxu0 %v6157_v50 }
 0x3da   : > { %5704 = vmatprep.subr.bf16.mxu0 %v6653_v48 }
 0x3dd   : > { %5705 = vmatpush3.bf16.msra.mxu0 %v6161_v52 }
 0x3de   : > { %5706 = vmatprep.subr.bf16.mxu0 %v6653_v48 }
 0x3e1   : > { %5707 = vmatpush3.bf16.msra.mxu0 %v6165_v53 }
 0x3e2   : > { %5708 = vmatprep.subr.bf16.mxu0 %v6653_v48 }
 0x3e5   : > { %5709 = vmatpush3.bf16.msra.mxu0 %v6169_v54 }
 0x3e6   : > { %5710 = vmatprep.subr.bf16.mxu0 %v6653_v48 }
 0x3e9   : > { %5711 = vmatpush3.bf16.msra.mxu0 %v6170_v55 }
 0x3ea   : > { %5712 = vmatprep.subr.bf16.mxu0 %v6653_v48 }
 0x3ed   : > { %5713 = vmatpush3.bf16.msra.mxu0 %v6171_v56 }
 0x3ee   : > { %5714 = vmatprep.subr.bf16.mxu0 %v6653_v48  ;;  %v2543_v48 = vld [vmem:[#allocation4 + $0x8] sm:$0xff] }
 0x3f1   : > { %5715 = vmatpush3.bf16.msra.mxu0 %v6172_v58 }
 0x3f4   : > { %5717 = vmatmul.mubr.bf16.vlgmr.msra.gmra.mrb[4].mxu0 %v2095_v45 }
 0x4a7   : > { %v2399_v61 = vpop.f32.mrb[0].mxu0 }
 0x4a8   : > { %v2492_v3 = vadd.f32 %v2399_v61, %v2099_v59  ;;  %v2401_v4 = vpop.f32.mrb[1].mxu0 }
 0x4a9   : > { %v2493_v6 = vadd.f32 %v2401_v4, %v2100_v60  ;;  %v2403_v7 = vpop.f32.mrb[2].mxu0  ;;  %v2442_v62 = vpop.f32.mrb[0].mxu1 }
 0x4aa   : > { %v2497_v8 = vadd.f32 %v2403_v7, %v2104_v2  ;;  %v2405_v9 = vpop.f32.mrb[3].mxu0  ;;  %v5280_v10 = vmul.f32 -1.442695, %v2492_v3  ;;  %v2444_v15 = vpop.f32.mrb[1].mxu1  ;;  %v2494_v0 = vadd.f32 %v2442_v62, %v2101_v16 }
 0x4ab   : > { %v5281_v11 = vmul.f32 -1.442695, %v2493_v6  ;;  %v2498_v12 = vadd.f32 %v2405_v9, %v2105_v5  ;;  %v2446_v63 = vpop.f32.mrb[2].mxu1  ;;  %v2495_v36 = vadd.f32 %v2444_v15, %v2102_v29 }
 0x4ac   : > { %v5283_v14 = vmul.f32 -1.442695, %v2497_v8  ;;  %v2448_v17 = vpop.f32.mrb[3].mxu1  ;;  %v2499_v1 = vadd.f32 %v2446_v63, %v2106_v18  ;;  %v5282_v21 = vmul.f32 -1.442695, %v2494_v0 }
 0x4ad   : > { %v5284_v13 = vmul.f32 -1.442695, %v2498_v12  ;;  %6173 = vpow2.f32 %v5281_v11  ;;  %v2500_v43 = vadd.f32 %v2448_v17, %v2107_v32 }
 0x4ae   : > { %6175 = vpow2.f32 %v5280_v10  ;;  %v5285_v23 = vmul.f32 -1.442695, %v2499_v1 }
 0x4af   : > { %6177 = vpow2.f32 %v5284_v13 }
 0x4b0   : > { %6179 = vpow2.f32 %v5283_v14 }
 0x4b1   : > { %6181 = vpow2.f32 %v5282_v21 }
 0x4b2   : > { %6183 = vpow2.f32 %v5285_v23 }
 0x4b7   : > { %v6174_v19 = vpop.eup %6173 }
 0x4b8   : > { %v6176_v20 = vpop.eup %6175  ;;  %v2521_v24 = vadd.f32 1.0, %v6174_v19 }
 0x4b9   : > { %v6178_v22 = vpop.eup %6177  ;;  %v2520_v26 = vadd.f32 1.0, %v6176_v20 }
 0x4ba   : > { %v6180_v25 = vpop.eup %6179  ;;  %v2524_v27 = vadd.f32 1.0, %v6178_v22  ;;  %6185 = vrcp.f32 %v2521_v24 }
 0x4bb   : > { %v2523_v28 = vadd.f32 1.0, %v6180_v25  ;;  %6187 = vrcp.f32 %v2520_v26  ;;  %v6182_v31 = vpop.eup %6181 }
 0x4bc   : > { %6189 = vrcp.f32 %v2524_v27  ;;  %v6184_v35 = vpop.eup %6183  ;;  %v2522_v57 = vadd.f32 1.0, %v6182_v31 }
 0x4bd   : > { %6191 = vrcp.f32 %v2523_v28  ;;  %v2525_v53 = vadd.f32 1.0, %v6184_v35 }
 0x4be   : > { %6193 = vrcp.f32 %v2522_v57 }
 0x4c4   : > { %v6186_v39 = vpop.eup %6185 }
 0x4c5   : > { %v6188_v42 = vpop.eup %6187  ;;  %v2544_v50 = vmul.f32 %v6186_v39, %v2542_v40 }
 0x4c6   : > { %v6190_v47 = vpop.eup %6189 }
 0x4c7   : > { %v2485_v33 = vpop.f32.mrb[4].mxu0  ;;  %v6192_v52 = vpop.eup %6191  ;;  %v2545_v56 = vmul.f32 %v6190_v47, %v2543_v48 }
 0x4c8   : > { %v2496_v37 = vadd.f32 %v2485_v33, %v2103_v30  ;;  %v5718_v38 = vpop.f32.mrb[5].mxu0  ;;  %v6194_v59 = vpop.eup %6193 }
 0x4c9   : > { %v2488_v41 = vpop.f32.mrb[6].mxu0 }
 0x4ca   : > { %v2538_v44 = vmax.f32 %v2495_v36, %v2496_v37  ;;  %v2501_v45 = vadd.f32 %v2488_v41, %v2108_v34  ;;  %v5719_v46 = vpop.f32.mrb[7].mxu0 }
 0x4cc   : > { %v2540_v49 = vmul.f32 %v6188_v42, %v2538_v44  ;;  %v2539_v51 = vmax.f32 %v2500_v43, %v2501_v45 }
 0x4ce   : > { %v2546_v54 = vadd.f32 %v2544_v50, %v2540_v49  ;;  %v2541_v55 = vmul.f32 %v6192_v52, %v2539_v51 }
 0x4d0   : > { %6195 = vtanh.f32 %v2546_v54  ;;  %2552 = vst [vmem:[#allocation4] sm:$0xff] %v2546_v54  ;;  %v2547_v58 = vadd.f32 %v2545_v56, %v2541_v55 }
 0x4d1   : > { %6197 = vrcp.f32 %v2525_v53 }
 0x4d2   : > { %6199 = vtanh.f32 %v2547_v58  ;;  %2553 = vst [vmem:[#allocation4 + $0x8] sm:$0xff] %v2547_v58 }
 0x4da   : > { %v6196_v60 = vpop.eup %6195 }
 0x4db   : > { %v6198_v61 = vpop.eup %6197  ;;  %v2550_v2 = vmul.f32 %v6196_v60, %v6194_v59 }
 0x4dc   : > { %v6200_v3 = vpop.eup %6199 }
 0x4dd   : > { %2554 = vst [vmem:[#allocation3] sm:$0xff] %v2550_v2  ;;  %5286 = vst [vmem:[%s6743_s14 + $0x20] sm:$0xff] %v2550_v2  ;;  %v2551_v4 = vmul.f32 %v6200_v3, %v6198_v61 }
 0x4df   : > { %2555 = vst [vmem:[#allocation3 + $0x8] sm:$0xff] %v2551_v4  ;;  %5287 = vst [vmem:[%s6743_s14 + $0x28] sm:$0xff] %v2551_v4 }
 0x4e0 PF: > { %s2559_s10 = sadd.s32 3, %s6731_s28 }
 0x4e1   : > { %p5288_p9 = scmp.ge.s32.totalorder %s2559_s10, 10 }
 0x4e2   : > { %v6201_v5 = vld [vmem:[%s8007_s2 + $0x4] ss:$20 sps:$4 sm:$0xff] (!%p5288_p9)   ;;  %v6203_v6 = vld [vmem:[%s8007_s2] ss:$20 sps:$4 sm:$0xff] (!%p5288_p9)   ;;  %v6655_v7 = vmov (!%p5288_p9), 0   ;;  %v6656_v36 = vmov (!%p5288_p9), 0.0  }
 0x4e3   : > { %2563 = sbr.rel (%p5288_p9) target bundleno = 1552 (0x610), region = 64  ;;  %2868 = vmatprep.mubr.bf16.mxu0 (!%p5288_p9), %v6655_v7  ;;  %2911 = vmatprep.mubr.bf16.mxu1 (!%p5288_p9), %v6655_v7  ;;  %v6204_v8 = vld [vmem:[%s8007_s2 + $0x2c] ss:$20 sps:$4 sm:$0xff] (!%p5288_p9)   ;;  %v6206_v9 = vld [vmem:[%s8007_s2 + $0x28] ss:$20 sps:$4 sm:$0xff] (!%p5288_p9)   ;;  %vm6657_vm3 = vmmov (!%p5288_p9), 0  }
 0x4e4   : > { %2836 = vmatprep.subr.bf16.mxu0 (!%p5288_p9), %v6201_v5  ;;  %v6207_v10 = vld [vmem:[%s8007_s2 + $0x54] ss:$20 sps:$4 sm:$0xff] (!%p5288_p9)   ;;  %v6209_v11 = vld [vmem:[%s8007_s2 + $0x50] ss:$20 sps:$4 sm:$0xff] (!%p5288_p9)   ;;  %v6218_v13 = vld [vmem:[%s8007_s2 + $0xc] ss:$20 sps:$4 sm:$0xff] (!%p5288_p9)  }
 0x4e5   : > { %2837 = vmatpush1.bf16.msra.mxu0 (!%p5288_p9), %v6203_v6  ;;  %v6210_v12 = vld [vmem:[%s8007_s2 + $0x7c] ss:$20 sps:$4 sm:$0xff] (!%p5288_p9)   ;;  %2879 = vmatprep.subr.bf16.mxu1 (!%p5288_p9), %v6218_v13  ;;  %v6212_v62 = vld [vmem:[%s8007_s2 + $0x78] ss:$20 sps:$4 sm:$0xff] (!%p5288_p9)   ;;  %v6224_v15 = vld [vmem:[%s8007_s2 + $0x34] ss:$20 sps:$4 sm:$0xff] (!%p5288_p9)  }
 0x4e6   : > { %2838 = vmatprep.subr.bf16.mxu0 (!%p5288_p9), %v6204_v8  ;;  %v6221_v14 = vld [vmem:[%s8007_s2 + $0x8] ss:$20 sps:$4 sm:$0xff] (!%p5288_p9)   ;;  %v6227_v63 = vld [vmem:[%s8007_s2 + $0x30] ss:$20 sps:$4 sm:$0xff] (!%p5288_p9)   ;;  %v6215_v18 = vld [vmem:[%s8007_s2 + $0xa0] ss:$20 sps:$4 sm:$0xff] (!%p5288_p9)  }
 0x4e7   : > { %2880 = vmatpush1.bf16.msra.mxu1 (!%p5288_p9), %v6221_v14  ;;  %v6213_v16 = vld [vmem:[%s8007_s2 + $0xa4] ss:$20 sps:$4 sm:$0xff] (!%p5288_p9)   ;;  %v6230_v17 = vld [vmem:[%s8007_s2 + $0x5c] ss:$20 sps:$4 sm:$0xff] (!%p5288_p9)   ;;  %v6216_v1 = vld [vmem:[%s8007_s2 + $0xcc] ss:$20 sps:$4 sm:$0xff] (!%p5288_p9)  }
 0x4e8   : > { %2881 = vmatprep.subr.bf16.mxu1 (!%p5288_p9), %v6224_v15  ;;  %v6233_v0 = vld [vmem:[%s8007_s2 + $0x58] ss:$20 sps:$4 sm:$0xff] (!%p5288_p9)   ;;  %v6220_v20 = vld [vmem:[%s8007_s2 + $0xc8] ss:$20 sps:$4 sm:$0xff] (!%p5288_p9)   ;;  %v6236_v22 = vld [vmem:[%s8007_s2 + $0x80] ss:$20 sps:$4 sm:$0xff] (!%p5288_p9)  }
 0x4e9   : > { %2839 = vmatpush1.bf16.msra.mxu0 (!%p5288_p9), %v6206_v9  ;;  %v6234_v19 = vld [vmem:[%s8007_s2 + $0x84] ss:$20 sps:$4 sm:$0xff] (!%p5288_p9)   ;;  %v6222_v21 = vld [vmem:[%s8007_s2 + $0xf4] ss:$20 sps:$4 sm:$0xff] (!%p5288_p9)   ;;  %v6238_v23 = vld [vmem:[%s8007_s2 + $0xac] ss:$20 sps:$4 sm:$0xff] (!%p5288_p9)  }
 0x4ea   : > { %2840 = vmatprep.subr.bf16.mxu0 %v6207_v10  ;;  %v6226_v24 = vld [vmem:[%s8007_s2 + $0xf0] ss:$20 sps:$4 sm:$0xff]   ;;  %v6240_v26 = vld [vmem:[%s8007_s2 + $0xa8] ss:$20 sps:$4 sm:$0xff]   ;;  %v6232_v28 = vld [vmem:[%s8007_s2 + $0x118] ss:$20 sps:$4 sm:$0xff]  }
 0x4eb   : > { %2882 = vmatpush1.bf16.msra.mxu1 %v6227_v63  ;;  %v6228_v25 = vld [vmem:[%s8007_s2 + $0x11c] ss:$20 sps:$4 sm:$0xff]   ;;  %v6242_v27 = vld [vmem:[%s8007_s2 + $0xd4] ss:$20 sps:$4 sm:$0xff]   ;;  %v2564_v29 = vld [vmem:[#allocation3] sm:$0xff] }
 0x4ec   : > { %2883 = vmatprep.subr.bf16.mxu1 %v6230_v17  ;;  %v2565_v30 = vld [vmem:[#allocation3 + $0x8] sm:$0xff]  ;;  %v6244_v31 = vld [vmem:[%s8007_s2 + $0xd0] ss:$20 sps:$4 sm:$0xff]   ;;  %v6252_v39 = vld [vmem:[%s8007_s2 + $0x120] ss:$20 sps:$4 sm:$0xff]  }
 0x4ed   : > { %2841 = vmatpush1.bf16.msra.mxu0 %v6209_v11  ;;  %v6246_v32 = vld [vmem:[%s8007_s2 + $0xfc] ss:$20 sps:$4 sm:$0xff]   ;;  %v2566_v33 = vpack.c.bf16 %v2565_v30, %v2564_v29  ;;  %v6248_v35 = vld [vmem:[%s8007_s2 + $0xf8] ss:$20 sps:$4 sm:$0xff]   ;;  %v6245_v40 = vld [vmem:[%s8007_s2 + $0x60] ss:$20 sps:$4 sm:$0xff]  }
 0x4ee   : > { %2842 = vmatprep.subr.bf16.mxu0 %v6210_v12  ;;  %v6237_v34 = vld [vmem:[%s8007_s2 + $0x10] ss:$20 sps:$4 sm:$0xff]   ;;  %v6241_v38 = vld [vmem:[%s8007_s2 + $0x38] ss:$20 sps:$4 sm:$0xff]   ;;  %v6249_v41 = vld [vmem:[%s8007_s2 + $0x88] ss:$20 sps:$4 sm:$0xff]  }
 0x4ef   : > { %2884 = vmatpush1.bf16.msra.mxu1 %v6233_v0  ;;  %v6250_v37 = vld [vmem:[%s8007_s2 + $0x124] ss:$20 sps:$4 sm:$0xff]   ;;  %v6255_v43 = vld [vmem:[%s8007_s2 + $0x100] ss:$20 sps:$4 sm:$0xff]   ;;  %v6256_v44 = vld [vmem:[%s8007_s2 + $0x128] ss:$20 sps:$4 sm:$0xff]  }
 0x4f0   : > { %2885 = vmatprep.subr.bf16.mxu1 %v6234_v19  ;;  %v6253_v42 = vld [vmem:[%s8007_s2 + $0xb0] ss:$20 sps:$4 sm:$0xff]   ;;  %v6254_v57 = vld [vmem:[%s8007_s2 + $0xd8] ss:$20 sps:$4 sm:$0xff]  }
 0x4f1   : > { %2843 = vmatpush1.bf16.msra.mxu0 %v6212_v62  ;;  %v2570_v45 = vld [vmem:[#allocation2 + $0xf0] sm:$0xff]  ;;  %v2571_v46 = vld [vmem:[#allocation2 + $0xf8] sm:$0xff]  ;;  %v2576_v51 = vld [vmem:[#allocation2 + $0x120] sm:$0xff] }
 0x4f2   : > { %2844 = vmatprep.subr.bf16.mxu0 %v6213_v16  ;;  %v2575_v48 = vld [vmem:[#allocation2 + $0x118] sm:$0xff]  ;;  %v2572_v5 = vld [vmem:[#allocation2 + $0x100] sm:$0xff]  ;;  %v2577_v7 = vld [vmem:[#allocation2 + $0x128] sm:$0xff] }
 0x4f3   : > { %2886 = vmatpush1.bf16.msra.mxu1 %v6236_v22  ;;  %v2574_v0 = vld [vmem:[#allocation2 + $0x110] sm:$0xff] }
 0x4f4   : > { %2887 = vmatprep.subr.bf16.mxu1 %v6238_v23  ;;  %v2578_v19 = vld [vmem:[#allocation2 + $0x130] sm:$0xff] }
 0x4f5   : > { %2845 = vmatpush1.bf16.msra.mxu0 %v6215_v18  ;;  %v2573_v18 = vld [vmem:[#allocation2 + $0x108] sm:$0xff] }
 0x4f6   : > { %2846 = vmatprep.subr.bf16.mxu0 %v6216_v1 }
 0x4f7   : > { %2888 = vmatpush1.bf16.msra.mxu1 %v6240_v26 }
 0x4f8   : > { %2889 = vmatprep.subr.bf16.mxu1 %v6242_v27  ;;  %v3013_v27 = vld [vmem:[#allocation4] sm:$0xff] }
 0x4f9   : > { %2847 = vmatpush1.bf16.msra.mxu0 %v6220_v20 }
 0x4fa   : > { %2848 = vmatprep.subr.bf16.mxu0 %v6222_v21  ;;  %v2579_v21 = vld [vmem:[#allocation2 + $0x138] sm:$0xff] }
 0x4fb   : > { %2890 = vmatpush1.bf16.msra.mxu1 %v6244_v31 }
 0x4fc   : > { %2891 = vmatprep.subr.bf16.mxu1 %v6246_v32 }
 0x4fd   : > { %2849 = vmatpush1.bf16.msra.mxu0 %v6226_v24 }
 0x4fe   : > { %2850 = vmatprep.subr.bf16.mxu0 %v6228_v25 }
 0x4ff   : > { %2892 = vmatpush1.bf16.msra.mxu1 %v6248_v35 }
 0x500   : > { %2893 = vmatprep.subr.bf16.mxu1 %v6250_v37 }
 0x501   : > { %2851 = vmatpush1.bf16.msra.mxu0 %v6232_v28 }
 0x502   : > { %5720 = vmatprep.subr.bf16.mxu0 %v6656_v36 }
 0x503   : > { %2894 = vmatpush1.bf16.msra.mxu1 %v6252_v39 }
 0x504   : > { %2869 = vmatmul.mubr.bf16.vlgmr.msra.gmra.mrb[0].mxu0 %v2566_v33 }
 0x505   : > { %5721 = vmatpush3.bf16.msra.mxu0 %v6237_v34  ;;  %5736 = vmatprep.mubr.msk.bf16.mxu0 %vm6657_vm3, %v6656_v36 }
 0x506   : > { %5722 = vmatprep.subr.bf16.mxu0 %v6656_v36  ;;  %2912 = vmatmul.mubr.bf16.vlgmr.msra.gmra.mrb[0].mxu1 %v2566_v33 }
 0x509   : > { %5723 = vmatpush3.bf16.msra.mxu0 %v6241_v38 }
 0x50a   : > { %5724 = vmatprep.subr.bf16.mxu0 %v6656_v36 }
 0x50d   : > { %5725 = vmatpush3.bf16.msra.mxu0 %v6245_v40 }
 0x50e   : > { %5726 = vmatprep.subr.bf16.mxu0 %v6656_v36 }
 0x511   : > { %5727 = vmatpush3.bf16.msra.mxu0 %v6249_v41 }
 0x512   : > { %5728 = vmatprep.subr.bf16.mxu0 %v6656_v36 }
 0x515   : > { %5729 = vmatpush3.bf16.msra.mxu0 %v6253_v42 }
 0x516   : > { %5730 = vmatprep.subr.bf16.mxu0 %v6656_v36 }
 0x519   : > { %5731 = vmatpush3.bf16.msra.mxu0 %v6254_v57 }
 0x51a   : > { %5732 = vmatprep.subr.bf16.mxu0 %v6656_v36 }
 0x51d   : > { %5733 = vmatpush3.bf16.msra.mxu0 %v6255_v43 }
 0x51e   : > { %5734 = vmatprep.subr.bf16.mxu0 %v6656_v36  ;;  %v3014_v36 = vld [vmem:[#allocation4 + $0x8] sm:$0xff] }
 0x521   : > { %5735 = vmatpush3.bf16.msra.mxu0 %v6256_v44 }
 0x524   : > { %5737 = vmatmul.mubr.bf16.vlgmr.msra.gmra.mrb[4].mxu0 %v2566_v33 }
 0x5d7   : > { %v2870_v47 = vpop.f32.mrb[0].mxu0 }
 0x5d8   : > { %v2963_v49 = vadd.f32 %v2870_v47, %v2570_v45  ;;  %v2872_v50 = vpop.f32.mrb[1].mxu0 }
 0x5d9   : > { %v2964_v52 = vadd.f32 %v2872_v50, %v2571_v46  ;;  %v2874_v53 = vpop.f32.mrb[2].mxu0  ;;  %v2913_v2 = vpop.f32.mrb[0].mxu1 }
 0x5da   : > { %v2968_v54 = vadd.f32 %v2874_v53, %v2575_v48  ;;  %v2876_v55 = vpop.f32.mrb[3].mxu0  ;;  %v5329_v56 = vmul.f32 -1.442695, %v2963_v49  ;;  %v2915_v3 = vpop.f32.mrb[1].mxu1  ;;  %v2965_v8 = vadd.f32 %v2913_v2, %v2572_v5 }
 0x5db   : > { %v5330_v58 = vmul.f32 -1.442695, %v2964_v52  ;;  %v2969_v59 = vadd.f32 %v2876_v55, %v2576_v51  ;;  %v2917_v4 = vpop.f32.mrb[2].mxu1  ;;  %v2966_v23 = vadd.f32 %v2915_v3, %v2573_v18 }
 0x5dc   : > { %v5332_v61 = vmul.f32 -1.442695, %v2968_v54  ;;  %v2919_v6 = vpop.f32.mrb[3].mxu1  ;;  %v2970_v9 = vadd.f32 %v2917_v4, %v2577_v7  ;;  %v5331_v12 = vmul.f32 -1.442695, %v2965_v8 }
 0x5dd   : > { %v5333_v60 = vmul.f32 -1.442695, %v2969_v59  ;;  %6257 = vpow2.f32 %v5330_v58  ;;  %v2971_v31 = vadd.f32 %v2919_v6, %v2578_v19 }
 0x5de   : > { %6259 = vpow2.f32 %v5329_v56  ;;  %v5334_v14 = vmul.f32 -1.442695, %v2970_v9 }
 0x5df   : > { %6261 = vpow2.f32 %v5333_v60 }
 0x5e0   : > { %6263 = vpow2.f32 %v5332_v61 }
 0x5e1   : > { %6265 = vpow2.f32 %v5331_v12 }
 0x5e2   : > { %6267 = vpow2.f32 %v5334_v14 }
 0x5e7   : > { %v6258_v10 = vpop.eup %6257 }
 0x5e8   : > { %v6260_v11 = vpop.eup %6259  ;;  %v2992_v62 = vadd.f32 1.0, %v6258_v10 }
 0x5e9   : > { %v6262_v13 = vpop.eup %6261  ;;  %v2991_v63 = vadd.f32 1.0, %v6260_v11 }
 0x5ea   : > { %v6264_v15 = vpop.eup %6263  ;;  %v2995_v16 = vadd.f32 1.0, %v6262_v13  ;;  %6269 = vrcp.f32 %v2992_v62 }
 0x5eb   : > { %v2994_v17 = vadd.f32 1.0, %v6264_v15  ;;  %6271 = vrcp.f32 %v2991_v63  ;;  %v6266_v1 = vpop.eup %6265 }
 0x5ec   : > { %6273 = vrcp.f32 %v2995_v16  ;;  %v6268_v22 = vpop.eup %6267  ;;  %v2993_v30 = vadd.f32 1.0, %v6266_v1 }
 0x5ed   : > { %6275 = vrcp.f32 %v2994_v17  ;;  %v2996_v41 = vadd.f32 1.0, %v6268_v22 }
 0x5ee   : > { %6277 = vrcp.f32 %v2993_v30 }
 0x5f4   : > { %v6270_v26 = vpop.eup %6269 }
 0x5f5   : > { %v6272_v29 = vpop.eup %6271  ;;  %v3015_v38 = vmul.f32 %v6270_v26, %v3013_v27 }
 0x5f6   : > { %v6274_v35 = vpop.eup %6273 }
 0x5f7   : > { %v2956_v20 = vpop.f32.mrb[4].mxu0  ;;  %v6276_v40 = vpop.eup %6275  ;;  %v3016_v43 = vmul.f32 %v6274_v35, %v3014_v36 }
 0x5f8   : > { %v2967_v24 = vadd.f32 %v2956_v20, %v2574_v0  ;;  %v5738_v25 = vpop.f32.mrb[5].mxu0  ;;  %v6278_v45 = vpop.eup %6277 }
 0x5f9   : > { %v2959_v28 = vpop.f32.mrb[6].mxu0 }
 0x5fa   : > { %v3009_v32 = vmax.f32 %v2966_v23, %v2967_v24  ;;  %v2972_v33 = vadd.f32 %v2959_v28, %v2579_v21  ;;  %v5739_v34 = vpop.f32.mrb[7].mxu0 }
 0x5fc   : > { %v3011_v37 = vmul.f32 %v6272_v29, %v3009_v32  ;;  %v3010_v39 = vmax.f32 %v2971_v31, %v2972_v33 }
 0x5fe   : > { %v3017_v42 = vadd.f32 %v3015_v38, %v3011_v37  ;;  %v3012_v57 = vmul.f32 %v6276_v40, %v3010_v39 }
 0x600   : > { %6279 = vtanh.f32 %v3017_v42  ;;  %3023 = vst [vmem:[#allocation4] sm:$0xff] %v3017_v42  ;;  %v3018_v44 = vadd.f32 %v3016_v43, %v3012_v57 }
 0x601   : > { %6281 = vrcp.f32 %v2996_v41 }
 0x602   : > { %6283 = vtanh.f32 %v3018_v44  ;;  %3024 = vst [vmem:[#allocation4 + $0x8] sm:$0xff] %v3018_v44 }
 0x60a   : > { %v6280_v46 = vpop.eup %6279 }
 0x60b   : > { %v6282_v47 = vpop.eup %6281  ;;  %v3021_v48 = vmul.f32 %v6280_v46, %v6278_v45 }
 0x60c   : > { %v6284_v49 = vpop.eup %6283 }
 0x60d   : > { %3025 = vst [vmem:[#allocation3] sm:$0xff] %v3021_v48  ;;  %5335 = vst [vmem:[%s6743_s14 + $0x30] sm:$0xff] %v3021_v48  ;;  %v3022_v50 = vmul.f32 %v6284_v49, %v6282_v47 }
 0x60f   : > { %3026 = vst [vmem:[#allocation3 + $0x8] sm:$0xff] %v3022_v50  ;;  %5336 = vst [vmem:[%s6743_s14 + $0x38] sm:$0xff] %v3022_v50 }
 0x610 PF: > { %s3030_s11 = sadd.s32 4, %s6731_s28 }
 0x611   : > { %p5337_p10 = scmp.ge.s32.totalorder %s3030_s11, 10 }
 0x612   : > { %v6285_v51 = vld [vmem:[%s8007_s2 + $0x4] ss:$20 sps:$4 sm:$0xff] (!%p5337_p10)   ;;  %v6287_v52 = vld [vmem:[%s8007_s2] ss:$20 sps:$4 sm:$0xff] (!%p5337_p10)   ;;  %v6658_v53 = vmov (!%p5337_p10), 0   ;;  %v6659_v23 = vmov (!%p5337_p10), 0.0  }
 0x613   : > { %3034 = sbr.rel (%p5337_p10) target bundleno = 1856 (0x740), region = 68  ;;  %3339 = vmatprep.mubr.bf16.mxu0 (!%p5337_p10), %v6658_v53  ;;  %3382 = vmatprep.mubr.bf16.mxu1 (!%p5337_p10), %v6658_v53  ;;  %v6288_v54 = vld [vmem:[%s8007_s2 + $0x2c] ss:$20 sps:$4 sm:$0xff] (!%p5337_p10)   ;;  %v6290_v55 = vld [vmem:[%s8007_s2 + $0x28] ss:$20 sps:$4 sm:$0xff] (!%p5337_p10)   ;;  %vm6660_vm4 = vmmov (!%p5337_p10), 0  }
 0x614   : > { %3307 = vmatprep.subr.bf16.mxu0 (!%p5337_p10), %v6285_v51  ;;  %v6291_v56 = vld [vmem:[%s8007_s2 + $0x54] ss:$20 sps:$4 sm:$0xff] (!%p5337_p10)   ;;  %v6293_v58 = vld [vmem:[%s8007_s2 + $0x50] ss:$20 sps:$4 sm:$0xff] (!%p5337_p10)   ;;  %v6302_v60 = vld [vmem:[%s8007_s2 + $0xc] ss:$20 sps:$4 sm:$0xff] (!%p5337_p10)  }
 0x615   : > { %3308 = vmatpush1.bf16.msra.mxu0 (!%p5337_p10), %v6287_v52  ;;  %v6294_v59 = vld [vmem:[%s8007_s2 + $0x7c] ss:$20 sps:$4 sm:$0xff] (!%p5337_p10)   ;;  %3350 = vmatprep.subr.bf16.mxu1 (!%p5337_p10), %v6302_v60  ;;  %v6296_v2 = vld [vmem:[%s8007_s2 + $0x78] ss:$20 sps:$4 sm:$0xff] (!%p5337_p10)   ;;  %v6308_v3 = vld [vmem:[%s8007_s2 + $0x34] ss:$20 sps:$4 sm:$0xff] (!%p5337_p10)  }
 0x616   : > { %3309 = vmatprep.subr.bf16.mxu0 (!%p5337_p10), %v6288_v54  ;;  %v6305_v61 = vld [vmem:[%s8007_s2 + $0x8] ss:$20 sps:$4 sm:$0xff] (!%p5337_p10)   ;;  %v6311_v4 = vld [vmem:[%s8007_s2 + $0x30] ss:$20 sps:$4 sm:$0xff] (!%p5337_p10)   ;;  %v6299_v7 = vld [vmem:[%s8007_s2 + $0xa0] ss:$20 sps:$4 sm:$0xff] (!%p5337_p10)  }
 0x617   : > { %3351 = vmatpush1.bf16.msra.mxu1 (!%p5337_p10), %v6305_v61  ;;  %v6297_v5 = vld [vmem:[%s8007_s2 + $0xa4] ss:$20 sps:$4 sm:$0xff] (!%p5337_p10)   ;;  %v6314_v6 = vld [vmem:[%s8007_s2 + $0x5c] ss:$20 sps:$4 sm:$0xff] (!%p5337_p10)   ;;  %v6300_v9 = vld [vmem:[%s8007_s2 + $0xcc] ss:$20 sps:$4 sm:$0xff] (!%p5337_p10)  }
 0x618   : > { %3352 = vmatprep.subr.bf16.mxu1 (!%p5337_p10), %v6308_v3  ;;  %v6317_v8 = vld [vmem:[%s8007_s2 + $0x58] ss:$20 sps:$4 sm:$0xff] (!%p5337_p10)   ;;  %v6304_v11 = vld [vmem:[%s8007_s2 + $0xc8] ss:$20 sps:$4 sm:$0xff] (!%p5337_p10)   ;;  %v6320_v13 = vld [vmem:[%s8007_s2 + $0x80] ss:$20 sps:$4 sm:$0xff] (!%p5337_p10)  }
 0x619   : > { %3310 = vmatpush1.bf16.msra.mxu0 (!%p5337_p10), %v6290_v55  ;;  %v6318_v10 = vld [vmem:[%s8007_s2 + $0x84] ss:$20 sps:$4 sm:$0xff] (!%p5337_p10)   ;;  %v6306_v12 = vld [vmem:[%s8007_s2 + $0xf4] ss:$20 sps:$4 sm:$0xff] (!%p5337_p10)   ;;  %v6322_v14 = vld [vmem:[%s8007_s2 + $0xac] ss:$20 sps:$4 sm:$0xff] (!%p5337_p10)  }
 0x61a   : > { %3311 = vmatprep.subr.bf16.mxu0 %v6291_v56  ;;  %v6310_v62 = vld [vmem:[%s8007_s2 + $0xf0] ss:$20 sps:$4 sm:$0xff]   ;;  %v6324_v63 = vld [vmem:[%s8007_s2 + $0xa8] ss:$20 sps:$4 sm:$0xff]   ;;  %v6316_v17 = vld [vmem:[%s8007_s2 + $0x118] ss:$20 sps:$4 sm:$0xff]  }
 0x61b   : > { %3353 = vmatpush1.bf16.msra.mxu1 %v6311_v4  ;;  %v6312_v15 = vld [vmem:[%s8007_s2 + $0x11c] ss:$20 sps:$4 sm:$0xff]   ;;  %v6326_v16 = vld [vmem:[%s8007_s2 + $0xd4] ss:$20 sps:$4 sm:$0xff]   ;;  %v3035_v18 = vld [vmem:[#allocation3] sm:$0xff] }
 0x61c   : > { %3354 = vmatprep.subr.bf16.mxu1 %v6314_v6  ;;  %v3036_v0 = vld [vmem:[#allocation3 + $0x8] sm:$0xff]  ;;  %v6328_v1 = vld [vmem:[%s8007_s2 + $0xd0] ss:$20 sps:$4 sm:$0xff]   ;;  %v6336_v26 = vld [vmem:[%s8007_s2 + $0x120] ss:$20 sps:$4 sm:$0xff]  }
 0x61d   : > { %3312 = vmatpush1.bf16.msra.mxu0 %v6293_v58  ;;  %v6330_v19 = vld [vmem:[%s8007_s2 + $0xfc] ss:$20 sps:$4 sm:$0xff]   ;;  %v3037_v20 = vpack.c.bf16 %v3036_v0, %v3035_v18  ;;  %v6332_v22 = vld [vmem:[%s8007_s2 + $0xf8] ss:$20 sps:$4 sm:$0xff]   ;;  %v6329_v27 = vld [vmem:[%s8007_s2 + $0x60] ss:$20 sps:$4 sm:$0xff]  }
 0x61e   : > { %3313 = vmatprep.subr.bf16.mxu0 %v6294_v59  ;;  %v6321_v21 = vld [vmem:[%s8007_s2 + $0x10] ss:$20 sps:$4 sm:$0xff]   ;;  %v6325_v25 = vld [vmem:[%s8007_s2 + $0x38] ss:$20 sps:$4 sm:$0xff]   ;;  %v6333_v28 = vld [vmem:[%s8007_s2 + $0x88] ss:$20 sps:$4 sm:$0xff]  }
 0x61f   : > { %3355 = vmatpush1.bf16.msra.mxu1 %v6317_v8  ;;  %v6334_v24 = vld [vmem:[%s8007_s2 + $0x124] ss:$20 sps:$4 sm:$0xff]   ;;  %v6339_v31 = vld [vmem:[%s8007_s2 + $0x100] ss:$20 sps:$4 sm:$0xff]   ;;  %v6340_v32 = vld [vmem:[%s8007_s2 + $0x128] ss:$20 sps:$4 sm:$0xff]  }
 0x620   : > { %3356 = vmatprep.subr.bf16.mxu1 %v6318_v10  ;;  %v6337_v29 = vld [vmem:[%s8007_s2 + $0xb0] ss:$20 sps:$4 sm:$0xff]   ;;  %v6338_v30 = vld [vmem:[%s8007_s2 + $0xd8] ss:$20 sps:$4 sm:$0xff]  }
 0x621   : > { %3314 = vmatpush1.bf16.msra.mxu0 %v6296_v2  ;;  %v3041_v33 = vld [vmem:[#allocation2 + $0x140] sm:$0xff]  ;;  %v3042_v34 = vld [vmem:[#allocation2 + $0x148] sm:$0xff]  ;;  %v3047_v39 = vld [vmem:[#allocation2 + $0x170] sm:$0xff] }
 0x622   : > { %3315 = vmatprep.subr.bf16.mxu0 %v6297_v5  ;;  %v3046_v36 = vld [vmem:[#allocation2 + $0x168] sm:$0xff]  ;;  %v3043_v51 = vld [vmem:[#allocation2 + $0x150] sm:$0xff]  ;;  %v3048_v53 = vld [vmem:[#allocation2 + $0x178] sm:$0xff] }
 0x623   : > { %3357 = vmatpush1.bf16.msra.mxu1 %v6320_v13  ;;  %v3045_v8 = vld [vmem:[#allocation2 + $0x160] sm:$0xff] }
 0x624   : > { %3358 = vmatprep.subr.bf16.mxu1 %v6322_v14  ;;  %v3049_v10 = vld [vmem:[#allocation2 + $0x180] sm:$0xff] }
 0x625   : > { %3316 = vmatpush1.bf16.msra.mxu0 %v6299_v7  ;;  %v3044_v7 = vld [vmem:[#allocation2 + $0x158] sm:$0xff] }
 0x626   : > { %3317 = vmatprep.subr.bf16.mxu0 %v6300_v9 }
 0x627   : > { %3359 = vmatpush1.bf16.msra.mxu1 %v6324_v63 }
 0x628   : > { %3360 = vmatprep.subr.bf16.mxu1 %v6326_v16  ;;  %v3484_v16 = vld [vmem:[#allocation4] sm:$0xff] }
 0x629   : > { %3318 = vmatpush1.bf16.msra.mxu0 %v6304_v11 }
 0x62a   : > { %3319 = vmatprep.subr.bf16.mxu0 %v6306_v12  ;;  %v3050_v12 = vld [vmem:[#allocation2 + $0x188] sm:$0xff] }
 0x62b   : > { %3361 = vmatpush1.bf16.msra.mxu1 %v6328_v1 }
 0x62c   : > { %3362 = vmatprep.subr.bf16.mxu1 %v6330_v19 }
 0x62d   : > { %3320 = vmatpush1.bf16.msra.mxu0 %v6310_v62 }
 0x62e   : > { %3321 = vmatprep.subr.bf16.mxu0 %v6312_v15 }
 0x62f   : > { %3363 = vmatpush1.bf16.msra.mxu1 %v6332_v22 }
 0x630   : > { %3364 = vmatprep.subr.bf16.mxu1 %v6334_v24 }
 0x631   : > { %3322 = vmatpush1.bf16.msra.mxu0 %v6316_v17 }
 0x632   : > { %5740 = vmatprep.subr.bf16.mxu0 %v6659_v23 }
 0x633   : > { %3365 = vmatpush1.bf16.msra.mxu1 %v6336_v26 }
 0x634   : > { %3340 = vmatmul.mubr.bf16.vlgmr.msra.gmra.mrb[0].mxu0 %v3037_v20 }
 0x635   : > { %5741 = vmatpush3.bf16.msra.mxu0 %v6321_v21  ;;  %5756 = vmatprep.mubr.msk.bf16.mxu0 %vm6660_vm4, %v6659_v23 }
 0x636   : > { %5742 = vmatprep.subr.bf16.mxu0 %v6659_v23  ;;  %3383 = vmatmul.mubr.bf16.vlgmr.msra.gmra.mrb[0].mxu1 %v3037_v20 }
 0x639   : > { %5743 = vmatpush3.bf16.msra.mxu0 %v6325_v25 }
 0x63a   : > { %5744 = vmatprep.subr.bf16.mxu0 %v6659_v23 }
 0x63d   : > { %5745 = vmatpush3.bf16.msra.mxu0 %v6329_v27 }
 0x63e   : > { %5746 = vmatprep.subr.bf16.mxu0 %v6659_v23 }
 0x641   : > { %5747 = vmatpush3.bf16.msra.mxu0 %v6333_v28 }
 0x642   : > { %5748 = vmatprep.subr.bf16.mxu0 %v6659_v23 }
 0x645   : > { %5749 = vmatpush3.bf16.msra.mxu0 %v6337_v29 }
 0x646   : > { %5750 = vmatprep.subr.bf16.mxu0 %v6659_v23 }
 0x649   : > { %5751 = vmatpush3.bf16.msra.mxu0 %v6338_v30 }
 0x64a   : > { %5752 = vmatprep.subr.bf16.mxu0 %v6659_v23 }
 0x64d   : > { %5753 = vmatpush3.bf16.msra.mxu0 %v6339_v31 }
 0x64e   : > { %5754 = vmatprep.subr.bf16.mxu0 %v6659_v23  ;;  %v3485_v23 = vld [vmem:[#allocation4 + $0x8] sm:$0xff] }
 0x651   : > { %5755 = vmatpush3.bf16.msra.mxu0 %v6340_v32 }
 0x654   : > { %5757 = vmatmul.mubr.bf16.vlgmr.msra.gmra.mrb[4].mxu0 %v3037_v20 }
 0x707   : > { %v3341_v35 = vpop.f32.mrb[0].mxu0 }
 0x708   : > { %v3434_v37 = vadd.f32 %v3341_v35, %v3041_v33  ;;  %v3343_v38 = vpop.f32.mrb[1].mxu0 }
 0x709   : > { %v3435_v40 = vadd.f32 %v3343_v38, %v3042_v34  ;;  %v3345_v41 = vpop.f32.mrb[2].mxu0  ;;  %v3384_v48 = vpop.f32.mrb[0].mxu1 }
 0x70a   : > { %v3439_v42 = vadd.f32 %v3345_v41, %v3046_v36  ;;  %v3347_v57 = vpop.f32.mrb[3].mxu0  ;;  %v5378_v43 = vmul.f32 -1.442695, %v3434_v37  ;;  %v3386_v49 = vpop.f32.mrb[1].mxu1  ;;  %v3436_v54 = vadd.f32 %v3384_v48, %v3043_v51 }
 0x70b   : > { %v5379_v44 = vmul.f32 -1.442695, %v3435_v40  ;;  %v3440_v45 = vadd.f32 %v3347_v57, %v3047_v39  ;;  %v3388_v50 = vpop.f32.mrb[2].mxu1  ;;  %v3437_v14 = vadd.f32 %v3386_v49, %v3044_v7 }
 0x70c   : > { %v5381_v47 = vmul.f32 -1.442695, %v3439_v42  ;;  %v3390_v52 = vpop.f32.mrb[3].mxu1  ;;  %v3441_v55 = vadd.f32 %v3388_v50, %v3048_v53  ;;  %v5380_v59 = vmul.f32 -1.442695, %v3436_v54 }
 0x70d   : > { %v5382_v46 = vmul.f32 -1.442695, %v3440_v45  ;;  %6341 = vpow2.f32 %v5379_v44  ;;  %v3442_v1 = vadd.f32 %v3390_v52, %v3049_v10 }
 0x70e   : > { %6343 = vpow2.f32 %v5378_v43  ;;  %v5383_v61 = vmul.f32 -1.442695, %v3441_v55 }
 0x70f   : > { %6345 = vpow2.f32 %v5382_v46 }
 0x710   : > { %6347 = vpow2.f32 %v5381_v47 }
 0x711   : > { %6349 = vpow2.f32 %v5380_v59 }
 0x712   : > { %6351 = vpow2.f32 %v5383_v61 }
 0x717   : > { %v6342_v56 = vpop.eup %6341 }
 0x718   : > { %v6344_v58 = vpop.eup %6343  ;;  %v3463_v2 = vadd.f32 1.0, %v6342_v56 }
 0x719   : > { %v6346_v60 = vpop.eup %6345  ;;  %v3462_v4 = vadd.f32 1.0, %v6344_v58 }
 0x71a   : > { %v6348_v3 = vpop.eup %6347  ;;  %v3466_v5 = vadd.f32 1.0, %v6346_v60  ;;  %6353 = vrcp.f32 %v3463_v2 }
 0x71b   : > { %v3465_v6 = vadd.f32 1.0, %v6348_v3  ;;  %6355 = vrcp.f32 %v3462_v4  ;;  %v6350_v9 = vpop.eup %6349 }
 0x71c   : > { %6357 = vrcp.f32 %v3466_v5  ;;  %v6352_v13 = vpop.eup %6351  ;;  %v3464_v0 = vadd.f32 1.0, %v6350_v9 }
 0x71d   : > { %6359 = vrcp.f32 %v3465_v6  ;;  %v3467_v28 = vadd.f32 1.0, %v6352_v13 }
 0x71e   : > { %6361 = vrcp.f32 %v3464_v0 }
 0x724   : > { %v6354_v63 = vpop.eup %6353 }
 0x725   : > { %v6356_v18 = vpop.eup %6355  ;;  %v3486_v25 = vmul.f32 %v6354_v63, %v3484_v16 }
 0x726   : > { %v6358_v22 = vpop.eup %6357 }
 0x727   : > { %v3427_v11 = vpop.f32.mrb[4].mxu0  ;;  %v6360_v27 = vpop.eup %6359  ;;  %v3487_v31 = vmul.f32 %v6358_v22, %v3485_v23 }
 0x728   : > { %v3438_v62 = vadd.f32 %v3427_v11, %v3045_v8  ;;  %v5758_v15 = vpop.f32.mrb[5].mxu0  ;;  %v6362_v33 = vpop.eup %6361 }
 0x729   : > { %v3430_v17 = vpop.f32.mrb[6].mxu0 }
 0x72a   : > { %v3480_v19 = vmax.f32 %v3437_v14, %v3438_v62  ;;  %v3443_v20 = vadd.f32 %v3430_v17, %v3050_v12  ;;  %v5759_v21 = vpop.f32.mrb[7].mxu0 }
 0x72c   : > { %v3482_v24 = vmul.f32 %v6356_v18, %v3480_v19  ;;  %v3481_v26 = vmax.f32 %v3442_v1, %v3443_v20 }
 0x72e   : > { %v3488_v29 = vadd.f32 %v3486_v25, %v3482_v24  ;;  %v3483_v30 = vmul.f32 %v6360_v27, %v3481_v26 }
 0x730   : > { %6363 = vtanh.f32 %v3488_v29  ;;  %3494 = vst [vmem:[#allocation4] sm:$0xff] %v3488_v29  ;;  %v3489_v32 = vadd.f32 %v3487_v31, %v3483_v30 }
 0x731   : > { %6365 = vrcp.f32 %v3467_v28 }
 0x732   : > { %6367 = vtanh.f32 %v3489_v32  ;;  %3495 = vst [vmem:[#allocation4 + $0x8] sm:$0xff] %v3489_v32 }
 0x73a   : > { %v6364_v34 = vpop.eup %6363 }
 0x73b   : > { %v6366_v35 = vpop.eup %6365  ;;  %v3492_v36 = vmul.f32 %v6364_v34, %v6362_v33 }
 0x73c   : > { %v6368_v37 = vpop.eup %6367 }
 0x73d   : > { %3496 = vst [vmem:[#allocation3] sm:$0xff] %v3492_v36  ;;  %5384 = vst [vmem:[%s6743_s14 + $0x40] sm:$0xff] %v3492_v36  ;;  %v3493_v38 = vmul.f32 %v6368_v37, %v6366_v35 }
 0x73f   : > { %3497 = vst [vmem:[#allocation3 + $0x8] sm:$0xff] %v3493_v38  ;;  %5385 = vst [vmem:[%s6743_s14 + $0x48] sm:$0xff] %v3493_v38 }
 0x740 PF: > { %s3501_s21 = sadd.s32 5, %s6731_s28 }
 0x741   : > { %p5386_p11 = scmp.ge.s32.totalorder %s3501_s21, 10 }
 0x742   : > { %v6369_v39 = vld [vmem:[%s8007_s2 + $0x4] ss:$20 sps:$4 sm:$0xff] (!%p5386_p11)   ;;  %v6371_v40 = vld [vmem:[%s8007_s2] ss:$20 sps:$4 sm:$0xff] (!%p5386_p11)   ;;  %v6661_v41 = vmov (!%p5386_p11), 0   ;;  %v6662_v14 = vmov (!%p5386_p11), 0.0  }
 0x743   : > { %3505 = sbr.rel (%p5386_p11) target bundleno = 2160 (0x870), region = 72  ;;  %3810 = vmatprep.mubr.bf16.mxu0 (!%p5386_p11), %v6661_v41  ;;  %3853 = vmatprep.mubr.bf16.mxu1 (!%p5386_p11), %v6661_v41  ;;  %v6372_v42 = vld [vmem:[%s8007_s2 + $0x2c] ss:$20 sps:$4 sm:$0xff] (!%p5386_p11)   ;;  %v6374_v57 = vld [vmem:[%s8007_s2 + $0x28] ss:$20 sps:$4 sm:$0xff] (!%p5386_p11)   ;;  %vm6663_vm5 = vmmov (!%p5386_p11), 0  }
 0x744   : > { %3778 = vmatprep.subr.bf16.mxu0 (!%p5386_p11), %v6369_v39  ;;  %v6375_v43 = vld [vmem:[%s8007_s2 + $0x54] ss:$20 sps:$4 sm:$0xff] (!%p5386_p11)   ;;  %v6377_v44 = vld [vmem:[%s8007_s2 + $0x50] ss:$20 sps:$4 sm:$0xff] (!%p5386_p11)   ;;  %v6386_v46 = vld [vmem:[%s8007_s2 + $0xc] ss:$20 sps:$4 sm:$0xff] (!%p5386_p11)  }
 0x745   : > { %3779 = vmatpush1.bf16.msra.mxu0 (!%p5386_p11), %v6371_v40  ;;  %v6378_v45 = vld [vmem:[%s8007_s2 + $0x7c] ss:$20 sps:$4 sm:$0xff] (!%p5386_p11)   ;;  %3821 = vmatprep.subr.bf16.mxu1 (!%p5386_p11), %v6386_v46  ;;  %v6380_v48 = vld [vmem:[%s8007_s2 + $0x78] ss:$20 sps:$4 sm:$0xff] (!%p5386_p11)   ;;  %v6392_v49 = vld [vmem:[%s8007_s2 + $0x34] ss:$20 sps:$4 sm:$0xff] (!%p5386_p11)  }
 0x746   : > { %3780 = vmatprep.subr.bf16.mxu0 (!%p5386_p11), %v6372_v42  ;;  %v6389_v47 = vld [vmem:[%s8007_s2 + $0x8] ss:$20 sps:$4 sm:$0xff] (!%p5386_p11)   ;;  %v6395_v50 = vld [vmem:[%s8007_s2 + $0x30] ss:$20 sps:$4 sm:$0xff] (!%p5386_p11)   ;;  %v6383_v53 = vld [vmem:[%s8007_s2 + $0xa0] ss:$20 sps:$4 sm:$0xff] (!%p5386_p11)  }
 0x747   : > { %3822 = vmatpush1.bf16.msra.mxu1 (!%p5386_p11), %v6389_v47  ;;  %v6381_v51 = vld [vmem:[%s8007_s2 + $0xa4] ss:$20 sps:$4 sm:$0xff] (!%p5386_p11)   ;;  %v6398_v52 = vld [vmem:[%s8007_s2 + $0x5c] ss:$20 sps:$4 sm:$0xff] (!%p5386_p11)   ;;  %v6384_v55 = vld [vmem:[%s8007_s2 + $0xcc] ss:$20 sps:$4 sm:$0xff] (!%p5386_p11)  }
 0x748   : > { %3823 = vmatprep.subr.bf16.mxu1 (!%p5386_p11), %v6392_v49  ;;  %v6401_v54 = vld [vmem:[%s8007_s2 + $0x58] ss:$20 sps:$4 sm:$0xff] (!%p5386_p11)   ;;  %v6388_v58 = vld [vmem:[%s8007_s2 + $0xc8] ss:$20 sps:$4 sm:$0xff] (!%p5386_p11)   ;;  %v6404_v60 = vld [vmem:[%s8007_s2 + $0x80] ss:$20 sps:$4 sm:$0xff] (!%p5386_p11)  }
 0x749   : > { %3781 = vmatpush1.bf16.msra.mxu0 (!%p5386_p11), %v6374_v57  ;;  %v6402_v56 = vld [vmem:[%s8007_s2 + $0x84] ss:$20 sps:$4 sm:$0xff] (!%p5386_p11)   ;;  %v6390_v59 = vld [vmem:[%s8007_s2 + $0xf4] ss:$20 sps:$4 sm:$0xff] (!%p5386_p11)   ;;  %v6406_v61 = vld [vmem:[%s8007_s2 + $0xac] ss:$20 sps:$4 sm:$0xff] (!%p5386_p11)  }
 0x74a   : > { %3782 = vmatprep.subr.bf16.mxu0 %v6375_v43  ;;  %v6394_v2 = vld [vmem:[%s8007_s2 + $0xf0] ss:$20 sps:$4 sm:$0xff]   ;;  %v6408_v4 = vld [vmem:[%s8007_s2 + $0xa8] ss:$20 sps:$4 sm:$0xff]   ;;  %v6400_v6 = vld [vmem:[%s8007_s2 + $0x118] ss:$20 sps:$4 sm:$0xff]  }
 0x74b   : > { %3824 = vmatpush1.bf16.msra.mxu1 %v6395_v50  ;;  %v6396_v3 = vld [vmem:[%s8007_s2 + $0x11c] ss:$20 sps:$4 sm:$0xff]   ;;  %v6410_v5 = vld [vmem:[%s8007_s2 + $0xd4] ss:$20 sps:$4 sm:$0xff]   ;;  %v3506_v7 = vld [vmem:[#allocation3] sm:$0xff] }
 0x74c   : > { %3825 = vmatprep.subr.bf16.mxu1 %v6398_v52  ;;  %v3507_v8 = vld [vmem:[#allocation3 + $0x8] sm:$0xff]  ;;  %v6412_v9 = vld [vmem:[%s8007_s2 + $0xd0] ss:$20 sps:$4 sm:$0xff]   ;;  %v6420_v63 = vld [vmem:[%s8007_s2 + $0x120] ss:$20 sps:$4 sm:$0xff]  }
 0x74d   : > { %3783 = vmatpush1.bf16.msra.mxu0 %v6377_v44  ;;  %v6414_v10 = vld [vmem:[%s8007_s2 + $0xfc] ss:$20 sps:$4 sm:$0xff]   ;;  %v3508_v11 = vpack.c.bf16 %v3507_v8, %v3506_v7  ;;  %v6416_v13 = vld [vmem:[%s8007_s2 + $0xf8] ss:$20 sps:$4 sm:$0xff]   ;;  %v6413_v16 = vld [vmem:[%s8007_s2 + $0x60] ss:$20 sps:$4 sm:$0xff]  }
 0x74e   : > { %3784 = vmatprep.subr.bf16.mxu0 %v6378_v45  ;;  %v6405_v12 = vld [vmem:[%s8007_s2 + $0x10] ss:$20 sps:$4 sm:$0xff]   ;;  %v6409_v15 = vld [vmem:[%s8007_s2 + $0x38] ss:$20 sps:$4 sm:$0xff]   ;;  %v6417_v17 = vld [vmem:[%s8007_s2 + $0x88] ss:$20 sps:$4 sm:$0xff]  }
 0x74f   : > { %3826 = vmatpush1.bf16.msra.mxu1 %v6401_v54  ;;  %v6418_v62 = vld [vmem:[%s8007_s2 + $0x124] ss:$20 sps:$4 sm:$0xff]   ;;  %v6423_v1 = vld [vmem:[%s8007_s2 + $0x100] ss:$20 sps:$4 sm:$0xff]   ;;  %v6424_v19 = vld [vmem:[%s8007_s2 + $0x128] ss:$20 sps:$4 sm:$0xff]  }
 0x750   : > { %3827 = vmatprep.subr.bf16.mxu1 %v6402_v56  ;;  %v6421_v18 = vld [vmem:[%s8007_s2 + $0xb0] ss:$20 sps:$4 sm:$0xff]   ;;  %v6422_v0 = vld [vmem:[%s8007_s2 + $0xd8] ss:$20 sps:$4 sm:$0xff]  }
 0x751   : > { %3785 = vmatpush1.bf16.msra.mxu0 %v6380_v48  ;;  %v3512_v20 = vld [vmem:[#allocation2 + $0x190] sm:$0xff]  ;;  %v3513_v21 = vld [vmem:[#allocation2 + $0x198] sm:$0xff]  ;;  %v3518_v26 = vld [vmem:[#allocation2 + $0x1c0] sm:$0xff] }
 0x752   : > { %3786 = vmatprep.subr.bf16.mxu0 %v6381_v51  ;;  %v3517_v23 = vld [vmem:[#allocation2 + $0x1b8] sm:$0xff]  ;;  %v3514_v39 = vld [vmem:[#allocation2 + $0x1a0] sm:$0xff]  ;;  %v3519_v41 = vld [vmem:[#allocation2 + $0x1c8] sm:$0xff] }
 0x753   : > { %3828 = vmatpush1.bf16.msra.mxu1 %v6404_v60  ;;  %v3516_v54 = vld [vmem:[#allocation2 + $0x1b0] sm:$0xff] }
 0x754   : > { %3829 = vmatprep.subr.bf16.mxu1 %v6406_v61  ;;  %v3520_v56 = vld [vmem:[#allocation2 + $0x1d0] sm:$0xff] }
 0x755   : > { %3787 = vmatpush1.bf16.msra.mxu0 %v6383_v53  ;;  %v3515_v53 = vld [vmem:[#allocation2 + $0x1a8] sm:$0xff] }
 0x756   : > { %3788 = vmatprep.subr.bf16.mxu0 %v6384_v55 }
 0x757   : > { %3830 = vmatpush1.bf16.msra.mxu1 %v6408_v4 }
 0x758   : > { %3831 = vmatprep.subr.bf16.mxu1 %v6410_v5  ;;  %v3955_v5 = vld [vmem:[#allocation4] sm:$0xff] }
 0x759   : > { %3789 = vmatpush1.bf16.msra.mxu0 %v6388_v58 }
 0x75a   : > { %3790 = vmatprep.subr.bf16.mxu0 %v6390_v59  ;;  %v3521_v59 = vld [vmem:[#allocation2 + $0x1d8] sm:$0xff] }
 0x75b   : > { %3832 = vmatpush1.bf16.msra.mxu1 %v6412_v9 }
 0x75c   : > { %3833 = vmatprep.subr.bf16.mxu1 %v6414_v10 }
 0x75d   : > { %3791 = vmatpush1.bf16.msra.mxu0 %v6394_v2 }
 0x75e   : > { %3792 = vmatprep.subr.bf16.mxu0 %v6396_v3 }
 0x75f   : > { %3834 = vmatpush1.bf16.msra.mxu1 %v6416_v13 }
 0x760   : > { %3835 = vmatprep.subr.bf16.mxu1 %v6418_v62 }
 0x761   : > { %3793 = vmatpush1.bf16.msra.mxu0 %v6400_v6 }
 0x762   : > { %5760 = vmatprep.subr.bf16.mxu0 %v6662_v14 }
 0x763   : > { %3836 = vmatpush1.bf16.msra.mxu1 %v6420_v63 }
 0x764   : > { %3811 = vmatmul.mubr.bf16.vlgmr.msra.gmra.mrb[0].mxu0 %v3508_v11 }
 0x765   : > { %5761 = vmatpush3.bf16.msra.mxu0 %v6405_v12  ;;  %5776 = vmatprep.mubr.msk.bf16.mxu0 %vm6663_vm5, %v6662_v14 }
 0x766   : > { %5762 = vmatprep.subr.bf16.mxu0 %v6662_v14  ;;  %3854 = vmatmul.mubr.bf16.vlgmr.msra.gmra.mrb[0].mxu1 %v3508_v11 }
 0x769   : > { %5763 = vmatpush3.bf16.msra.mxu0 %v6409_v15 }
 0x76a   : > { %5764 = vmatprep.subr.bf16.mxu0 %v6662_v14 }
 0x76d   : > { %5765 = vmatpush3.bf16.msra.mxu0 %v6413_v16 }
 0x76e   : > { %5766 = vmatprep.subr.bf16.mxu0 %v6662_v14 }
 0x771   : > { %5767 = vmatpush3.bf16.msra.mxu0 %v6417_v17 }
 0x772   : > { %5768 = vmatprep.subr.bf16.mxu0 %v6662_v14 }
 0x775   : > { %5769 = vmatpush3.bf16.msra.mxu0 %v6421_v18 }
 0x776   : > { %5770 = vmatprep.subr.bf16.mxu0 %v6662_v14 }
 0x779   : > { %5771 = vmatpush3.bf16.msra.mxu0 %v6422_v0 }
 0x77a   : > { %5772 = vmatprep.subr.bf16.mxu0 %v6662_v14 }
 0x77d   : > { %5773 = vmatpush3.bf16.msra.mxu0 %v6423_v1 }
 0x77e   : > { %5774 = vmatprep.subr.bf16.mxu0 %v6662_v14  ;;  %v3956_v14 = vld [vmem:[#allocation4 + $0x8] sm:$0xff] }
 0x781   : > { %5775 = vmatpush3.bf16.msra.mxu0 %v6424_v19 }
 0x784   : > { %5777 = vmatmul.mubr.bf16.vlgmr.msra.gmra.mrb[4].mxu0 %v3508_v11 }
 0x837   : > { %v3812_v22 = vpop.f32.mrb[0].mxu0 }
 0x838   : > { %v3905_v24 = vadd.f32 %v3812_v22, %v3512_v20  ;;  %v3814_v25 = vpop.f32.mrb[1].mxu0 }
 0x839   : > { %v3906_v27 = vadd.f32 %v3814_v25, %v3513_v21  ;;  %v3816_v28 = vpop.f32.mrb[2].mxu0  ;;  %v3855_v36 = vpop.f32.mrb[0].mxu1 }
 0x83a   : > { %v3910_v29 = vadd.f32 %v3816_v28, %v3517_v23  ;;  %v3818_v30 = vpop.f32.mrb[3].mxu0  ;;  %v5427_v31 = vmul.f32 -1.442695, %v3905_v24  ;;  %v3857_v37 = vpop.f32.mrb[1].mxu1  ;;  %v3907_v42 = vadd.f32 %v3855_v36, %v3514_v39 }
 0x83b   : > { %v5428_v32 = vmul.f32 -1.442695, %v3906_v27  ;;  %v3911_v33 = vadd.f32 %v3818_v30, %v3518_v26  ;;  %v3859_v38 = vpop.f32.mrb[2].mxu1  ;;  %v3908_v61 = vadd.f32 %v3857_v37, %v3515_v53 }
 0x83c   : > { %v5430_v35 = vmul.f32 -1.442695, %v3910_v29  ;;  %v3861_v40 = vpop.f32.mrb[3].mxu1  ;;  %v3912_v57 = vadd.f32 %v3859_v38, %v3519_v41  ;;  %v5429_v45 = vmul.f32 -1.442695, %v3907_v42 }
 0x83d   : > { %v5431_v34 = vmul.f32 -1.442695, %v3911_v33  ;;  %6425 = vpow2.f32 %v5428_v32  ;;  %v3913_v9 = vadd.f32 %v3861_v40, %v3520_v56 }
 0x83e   : > { %6427 = vpow2.f32 %v5427_v31  ;;  %v5432_v47 = vmul.f32 -1.442695, %v3912_v57 }
 0x83f   : > { %6429 = vpow2.f32 %v5431_v34 }
 0x840   : > { %6431 = vpow2.f32 %v5430_v35 }
 0x841   : > { %6433 = vpow2.f32 %v5429_v45 }
 0x842   : > { %6435 = vpow2.f32 %v5432_v47 }
 0x847   : > { %v6426_v43 = vpop.eup %6425 }
 0x848   : > { %v6428_v44 = vpop.eup %6427  ;;  %v3934_v48 = vadd.f32 1.0, %v6426_v43 }
 0x849   : > { %v6430_v46 = vpop.eup %6429  ;;  %v3933_v50 = vadd.f32 1.0, %v6428_v44 }
 0x84a   : > { %v6432_v49 = vpop.eup %6431  ;;  %v3937_v51 = vadd.f32 1.0, %v6430_v46  ;;  %6437 = vrcp.f32 %v3934_v48 }
 0x84b   : > { %v3936_v52 = vadd.f32 1.0, %v6432_v49  ;;  %6439 = vrcp.f32 %v3933_v50  ;;  %v6434_v55 = vpop.eup %6433 }
 0x84c   : > { %6441 = vrcp.f32 %v3937_v51  ;;  %v6436_v60 = vpop.eup %6435  ;;  %v3935_v8 = vadd.f32 1.0, %v6434_v55 }
 0x84d   : > { %6443 = vrcp.f32 %v3936_v52  ;;  %v3938_v17 = vadd.f32 1.0, %v6436_v60 }
 0x84e   : > { %6445 = vrcp.f32 %v3935_v8 }
 0x854   : > { %v6438_v4 = vpop.eup %6437 }
 0x855   : > { %v6440_v7 = vpop.eup %6439  ;;  %v3957_v15 = vmul.f32 %v6438_v4, %v3955_v5 }
 0x856   : > { %v6442_v13 = vpop.eup %6441 }
 0x857   : > { %v3898_v58 = vpop.f32.mrb[4].mxu0  ;;  %v6444_v16 = vpop.eup %6443  ;;  %v3958_v1 = vmul.f32 %v6442_v13, %v3956_v14 }
 0x858   : > { %v3909_v2 = vadd.f32 %v3898_v58, %v3516_v54  ;;  %v5778_v3 = vpop.f32.mrb[5].mxu0  ;;  %v6446_v20 = vpop.eup %6445 }
 0x859   : > { %v3901_v6 = vpop.f32.mrb[6].mxu0 }
 0x85a   : > { %v3951_v10 = vmax.f32 %v3908_v61, %v3909_v2  ;;  %v3914_v11 = vadd.f32 %v3901_v6, %v3521_v59  ;;  %v5779_v12 = vpop.f32.mrb[7].mxu0 }
 0x85c   : > { %v3953_v62 = vmul.f32 %v6440_v7, %v3951_v10  ;;  %v3952_v63 = vmax.f32 %v3913_v9, %v3914_v11 }
 0x85e   : > { %v3959_v18 = vadd.f32 %v3957_v15, %v3953_v62  ;;  %v3954_v0 = vmul.f32 %v6444_v16, %v3952_v63 }
 0x860   : > { %6447 = vtanh.f32 %v3959_v18  ;;  %3965 = vst [vmem:[#allocation4] sm:$0xff] %v3959_v18  ;;  %v3960_v19 = vadd.f32 %v3958_v1, %v3954_v0 }
 0x861   : > { %6449 = vrcp.f32 %v3938_v17 }
 0x862   : > { %6451 = vtanh.f32 %v3960_v19  ;;  %3966 = vst [vmem:[#allocation4 + $0x8] sm:$0xff] %v3960_v19 }
 0x86a   : > { %v6448_v21 = vpop.eup %6447 }
 0x86b   : > { %v6450_v22 = vpop.eup %6449  ;;  %v3963_v23 = vmul.f32 %v6448_v21, %v6446_v20 }
 0x86c   : > { %v6452_v24 = vpop.eup %6451 }
 0x86d   : > { %3967 = vst [vmem:[#allocation3] sm:$0xff] %v3963_v23  ;;  %5433 = vst [vmem:[%s6743_s14 + $0x50] sm:$0xff] %v3963_v23  ;;  %v3964_v25 = vmul.f32 %v6452_v24, %v6450_v22 }
 0x86f   : > { %3968 = vst [vmem:[#allocation3 + $0x8] sm:$0xff] %v3964_v25  ;;  %5434 = vst [vmem:[%s6743_s14 + $0x58] sm:$0xff] %v3964_v25 }
 0x870 PF: > { %s3972_s17 = sadd.s32 6, %s6731_s28 }
 0x871   : > { %p5435_p12 = scmp.ge.s32.totalorder %s3972_s17, 10 }
 0x872   : > { %v6453_v26 = vld [vmem:[%s8007_s2 + $0x4] ss:$20 sps:$4 sm:$0xff] (!%p5435_p12)   ;;  %v6455_v27 = vld [vmem:[%s8007_s2] ss:$20 sps:$4 sm:$0xff] (!%p5435_p12)   ;;  %v6664_v28 = vmov (!%p5435_p12), 0   ;;  %v6665_v61 = vmov (!%p5435_p12), 0.0  }
 0x873   : > { %3976 = sbr.rel (%p5435_p12) target bundleno = 2464 (0x9a0), region = 76  ;;  %4281 = vmatprep.mubr.bf16.mxu0 (!%p5435_p12), %v6664_v28  ;;  %4324 = vmatprep.mubr.bf16.mxu1 (!%p5435_p12), %v6664_v28  ;;  %v6456_v29 = vld [vmem:[%s8007_s2 + $0x2c] ss:$20 sps:$4 sm:$0xff] (!%p5435_p12)   ;;  %v6458_v30 = vld [vmem:[%s8007_s2 + $0x28] ss:$20 sps:$4 sm:$0xff] (!%p5435_p12)   ;;  %vm6666_vm6 = vmmov (!%p5435_p12), 0  }
 0x874   : > { %4249 = vmatprep.subr.bf16.mxu0 (!%p5435_p12), %v6453_v26  ;;  %v6459_v31 = vld [vmem:[%s8007_s2 + $0x54] ss:$20 sps:$4 sm:$0xff] (!%p5435_p12)   ;;  %v6461_v32 = vld [vmem:[%s8007_s2 + $0x50] ss:$20 sps:$4 sm:$0xff] (!%p5435_p12)   ;;  %v6470_v34 = vld [vmem:[%s8007_s2 + $0xc] ss:$20 sps:$4 sm:$0xff] (!%p5435_p12)  }
 0x875   : > { %4250 = vmatpush1.bf16.msra.mxu0 (!%p5435_p12), %v6455_v27  ;;  %v6462_v33 = vld [vmem:[%s8007_s2 + $0x7c] ss:$20 sps:$4 sm:$0xff] (!%p5435_p12)   ;;  %4292 = vmatprep.subr.bf16.mxu1 (!%p5435_p12), %v6470_v34  ;;  %v6464_v36 = vld [vmem:[%s8007_s2 + $0x78] ss:$20 sps:$4 sm:$0xff] (!%p5435_p12)   ;;  %v6476_v37 = vld [vmem:[%s8007_s2 + $0x34] ss:$20 sps:$4 sm:$0xff] (!%p5435_p12)  }
 0x876   : > { %4251 = vmatprep.subr.bf16.mxu0 (!%p5435_p12), %v6456_v29  ;;  %v6473_v35 = vld [vmem:[%s8007_s2 + $0x8] ss:$20 sps:$4 sm:$0xff] (!%p5435_p12)   ;;  %v6479_v38 = vld [vmem:[%s8007_s2 + $0x30] ss:$20 sps:$4 sm:$0xff] (!%p5435_p12)   ;;  %v6467_v41 = vld [vmem:[%s8007_s2 + $0xa0] ss:$20 sps:$4 sm:$0xff] (!%p5435_p12)  }
 0x877   : > { %4293 = vmatpush1.bf16.msra.mxu1 (!%p5435_p12), %v6473_v35  ;;  %v6465_v39 = vld [vmem:[%s8007_s2 + $0xa4] ss:$20 sps:$4 sm:$0xff] (!%p5435_p12)   ;;  %v6482_v40 = vld [vmem:[%s8007_s2 + $0x5c] ss:$20 sps:$4 sm:$0xff] (!%p5435_p12)   ;;  %v6468_v57 = vld [vmem:[%s8007_s2 + $0xcc] ss:$20 sps:$4 sm:$0xff] (!%p5435_p12)  }
 0x878   : > { %4294 = vmatprep.subr.bf16.mxu1 (!%p5435_p12), %v6476_v37  ;;  %v6485_v42 = vld [vmem:[%s8007_s2 + $0x58] ss:$20 sps:$4 sm:$0xff] (!%p5435_p12)   ;;  %v6472_v44 = vld [vmem:[%s8007_s2 + $0xc8] ss:$20 sps:$4 sm:$0xff] (!%p5435_p12)   ;;  %v6488_v46 = vld [vmem:[%s8007_s2 + $0x80] ss:$20 sps:$4 sm:$0xff] (!%p5435_p12)  }
 0x879   : > { %4252 = vmatpush1.bf16.msra.mxu0 (!%p5435_p12), %v6458_v30  ;;  %v6486_v43 = vld [vmem:[%s8007_s2 + $0x84] ss:$20 sps:$4 sm:$0xff] (!%p5435_p12)   ;;  %v6474_v45 = vld [vmem:[%s8007_s2 + $0xf4] ss:$20 sps:$4 sm:$0xff] (!%p5435_p12)   ;;  %v6490_v47 = vld [vmem:[%s8007_s2 + $0xac] ss:$20 sps:$4 sm:$0xff] (!%p5435_p12)  }
 0x87a   : > { %4253 = vmatprep.subr.bf16.mxu0 %v6459_v31  ;;  %v6478_v48 = vld [vmem:[%s8007_s2 + $0xf0] ss:$20 sps:$4 sm:$0xff]   ;;  %v6492_v50 = vld [vmem:[%s8007_s2 + $0xa8] ss:$20 sps:$4 sm:$0xff]   ;;  %v6484_v52 = vld [vmem:[%s8007_s2 + $0x118] ss:$20 sps:$4 sm:$0xff]  }
 0x87b   : > { %4295 = vmatpush1.bf16.msra.mxu1 %v6479_v38  ;;  %v6480_v49 = vld [vmem:[%s8007_s2 + $0x11c] ss:$20 sps:$4 sm:$0xff]   ;;  %v6494_v51 = vld [vmem:[%s8007_s2 + $0xd4] ss:$20 sps:$4 sm:$0xff]   ;;  %v3977_v53 = vld [vmem:[#allocation3] sm:$0xff] }
 0x87c   : > { %4296 = vmatprep.subr.bf16.mxu1 %v6482_v40  ;;  %v3978_v54 = vld [vmem:[#allocation3 + $0x8] sm:$0xff]  ;;  %v6496_v55 = vld [vmem:[%s8007_s2 + $0xd0] ss:$20 sps:$4 sm:$0xff]   ;;  %v6504_v4 = vld [vmem:[%s8007_s2 + $0x120] ss:$20 sps:$4 sm:$0xff]  }
 0x87d   : > { %4254 = vmatpush1.bf16.msra.mxu0 %v6461_v32  ;;  %v6498_v56 = vld [vmem:[%s8007_s2 + $0xfc] ss:$20 sps:$4 sm:$0xff]   ;;  %v3979_v58 = vpack.c.bf16 %v3978_v54, %v3977_v53  ;;  %v6500_v60 = vld [vmem:[%s8007_s2 + $0xf8] ss:$20 sps:$4 sm:$0xff]   ;;  %v6497_v5 = vld [vmem:[%s8007_s2 + $0x60] ss:$20 sps:$4 sm:$0xff]  }
 0x87e   : > { %4255 = vmatprep.subr.bf16.mxu0 %v6462_v33  ;;  %v6489_v59 = vld [vmem:[%s8007_s2 + $0x10] ss:$20 sps:$4 sm:$0xff]   ;;  %v6493_v3 = vld [vmem:[%s8007_s2 + $0x38] ss:$20 sps:$4 sm:$0xff]   ;;  %v6501_v6 = vld [vmem:[%s8007_s2 + $0x88] ss:$20 sps:$4 sm:$0xff]  }
 0x87f   : > { %4297 = vmatpush1.bf16.msra.mxu1 %v6485_v42  ;;  %v6502_v2 = vld [vmem:[%s8007_s2 + $0x124] ss:$20 sps:$4 sm:$0xff]   ;;  %v6507_v9 = vld [vmem:[%s8007_s2 + $0x100] ss:$20 sps:$4 sm:$0xff]   ;;  %v6508_v10 = vld [vmem:[%s8007_s2 + $0x128] ss:$20 sps:$4 sm:$0xff]  }
 0x880   : > { %4298 = vmatprep.subr.bf16.mxu1 %v6486_v43  ;;  %v6505_v7 = vld [vmem:[%s8007_s2 + $0xb0] ss:$20 sps:$4 sm:$0xff]   ;;  %v6506_v8 = vld [vmem:[%s8007_s2 + $0xd8] ss:$20 sps:$4 sm:$0xff]  }
 0x881   : > { %4256 = vmatpush1.bf16.msra.mxu0 %v6464_v36  ;;  %v3983_v11 = vld [vmem:[#allocation2 + $0x1e0] sm:$0xff]  ;;  %v3984_v12 = vld [vmem:[#allocation2 + $0x1e8] sm:$0xff]  ;;  %v3989_v63 = vld [vmem:[#allocation2 + $0x210] sm:$0xff] }
 0x882   : > { %4257 = vmatprep.subr.bf16.mxu0 %v6465_v39  ;;  %v3988_v14 = vld [vmem:[#allocation2 + $0x208] sm:$0xff]  ;;  %v3985_v26 = vld [vmem:[#allocation2 + $0x1f0] sm:$0xff]  ;;  %v3990_v28 = vld [vmem:[#allocation2 + $0x218] sm:$0xff] }
 0x883   : > { %4299 = vmatpush1.bf16.msra.mxu1 %v6488_v46  ;;  %v3987_v42 = vld [vmem:[#allocation2 + $0x200] sm:$0xff] }
 0x884   : > { %4300 = vmatprep.subr.bf16.mxu1 %v6490_v47  ;;  %v3991_v43 = vld [vmem:[#allocation2 + $0x220] sm:$0xff] }
 0x885   : > { %4258 = vmatpush1.bf16.msra.mxu0 %v6467_v41  ;;  %v3986_v41 = vld [vmem:[#allocation2 + $0x1f8] sm:$0xff] }
 0x886   : > { %4259 = vmatprep.subr.bf16.mxu0 %v6468_v57 }
 0x887   : > { %4301 = vmatpush1.bf16.msra.mxu1 %v6492_v50 }
 0x888   : > { %4302 = vmatprep.subr.bf16.mxu1 %v6494_v51  ;;  %v4426_v51 = vld [vmem:[#allocation4] sm:$0xff] }
 0x889   : > { %4260 = vmatpush1.bf16.msra.mxu0 %v6472_v44 }
 0x88a   : > { %4261 = vmatprep.subr.bf16.mxu0 %v6474_v45  ;;  %v3992_v45 = vld [vmem:[#allocation2 + $0x228] sm:$0xff] }
 0x88b   : > { %4303 = vmatpush1.bf16.msra.mxu1 %v6496_v55 }
 0x88c   : > { %4304 = vmatprep.subr.bf16.mxu1 %v6498_v56 }
 0x88d   : > { %4262 = vmatpush1.bf16.msra.mxu0 %v6478_v48 }
 0x88e   : > { %4263 = vmatprep.subr.bf16.mxu0 %v6480_v49 }
 0x88f   : > { %4305 = vmatpush1.bf16.msra.mxu1 %v6500_v60 }
 0x890   : > { %4306 = vmatprep.subr.bf16.mxu1 %v6502_v2 }
 0x891   : > { %4264 = vmatpush1.bf16.msra.mxu0 %v6484_v52 }
 0x892   : > { %5780 = vmatprep.subr.bf16.mxu0 %v6665_v61 }
 0x893   : > { %4307 = vmatpush1.bf16.msra.mxu1 %v6504_v4 }
 0x894   : > { %4282 = vmatmul.mubr.bf16.vlgmr.msra.gmra.mrb[0].mxu0 %v3979_v58 }
 0x895   : > { %5781 = vmatpush3.bf16.msra.mxu0 %v6489_v59  ;;  %5796 = vmatprep.mubr.msk.bf16.mxu0 %vm6666_vm6, %v6665_v61 }
 0x896   : > { %5782 = vmatprep.subr.bf16.mxu0 %v6665_v61  ;;  %4325 = vmatmul.mubr.bf16.vlgmr.msra.gmra.mrb[0].mxu1 %v3979_v58 }
 0x899   : > { %5783 = vmatpush3.bf16.msra.mxu0 %v6493_v3 }
 0x89a   : > { %5784 = vmatprep.subr.bf16.mxu0 %v6665_v61 }
 0x89d   : > { %5785 = vmatpush3.bf16.msra.mxu0 %v6497_v5 }
 0x89e   : > { %5786 = vmatprep.subr.bf16.mxu0 %v6665_v61 }
 0x8a1   : > { %5787 = vmatpush3.bf16.msra.mxu0 %v6501_v6 }
 0x8a2   : > { %5788 = vmatprep.subr.bf16.mxu0 %v6665_v61 }
 0x8a5   : > { %5789 = vmatpush3.bf16.msra.mxu0 %v6505_v7 }
 0x8a6   : > { %5790 = vmatprep.subr.bf16.mxu0 %v6665_v61 }
 0x8a9   : > { %5791 = vmatpush3.bf16.msra.mxu0 %v6506_v8 }
 0x8aa   : > { %5792 = vmatprep.subr.bf16.mxu0 %v6665_v61 }
 0x8ad   : > { %5793 = vmatpush3.bf16.msra.mxu0 %v6507_v9 }
 0x8ae   : > { %5794 = vmatprep.subr.bf16.mxu0 %v6665_v61  ;;  %v4427_v61 = vld [vmem:[#allocation4 + $0x8] sm:$0xff] }
 0x8b1   : > { %5795 = vmatpush3.bf16.msra.mxu0 %v6508_v10 }
 0x8b4   : > { %5797 = vmatmul.mubr.bf16.vlgmr.msra.gmra.mrb[4].mxu0 %v3979_v58 }
 0x967   : > { %v4283_v13 = vpop.f32.mrb[0].mxu0 }
 0x968   : > { %v4376_v62 = vadd.f32 %v4283_v13, %v3983_v11  ;;  %v4285_v15 = vpop.f32.mrb[1].mxu0 }
 0x969   : > { %v4377_v16 = vadd.f32 %v4285_v15, %v3984_v12  ;;  %v4287_v17 = vpop.f32.mrb[2].mxu0  ;;  %v4326_v23 = vpop.f32.mrb[0].mxu1 }
 0x96a   : > { %v4381_v18 = vadd.f32 %v4287_v17, %v3988_v14  ;;  %v4289_v0 = vpop.f32.mrb[3].mxu0  ;;  %v5476_v1 = vmul.f32 -1.442695, %v4376_v62  ;;  %v4328_v24 = vpop.f32.mrb[1].mxu1  ;;  %v4378_v29 = vadd.f32 %v4326_v23, %v3985_v26 }
 0x96b   : > { %v5477_v19 = vmul.f32 -1.442695, %v4377_v16  ;;  %v4382_v20 = vadd.f32 %v4289_v0, %v3989_v63  ;;  %v4330_v25 = vpop.f32.mrb[2].mxu1  ;;  %v4379_v47 = vadd.f32 %v4328_v24, %v3986_v41 }
 0x96c   : > { %v5479_v22 = vmul.f32 -1.442695, %v4381_v18  ;;  %v4332_v27 = vpop.f32.mrb[3].mxu1  ;;  %v4383_v30 = vadd.f32 %v4330_v25, %v3990_v28  ;;  %v5478_v33 = vmul.f32 -1.442695, %v4378_v29 }
 0x96d   : > { %v5480_v21 = vmul.f32 -1.442695, %v4382_v20  ;;  %6509 = vpow2.f32 %v5477_v19  ;;  %v4384_v55 = vadd.f32 %v4332_v27, %v3991_v43 }
 0x96e   : > { %6511 = vpow2.f32 %v5476_v1  ;;  %v5481_v35 = vmul.f32 -1.442695, %v4383_v30 }
 0x96f   : > { %6513 = vpow2.f32 %v5480_v21 }
 0x970   : > { %6515 = vpow2.f32 %v5479_v22 }
 0x971   : > { %6517 = vpow2.f32 %v5478_v33 }
 0x972   : > { %6519 = vpow2.f32 %v5481_v35 }
 0x977   : > { %v6510_v31 = vpop.eup %6509 }
 0x978   : > { %v6512_v32 = vpop.eup %6511  ;;  %v4405_v36 = vadd.f32 1.0, %v6510_v31 }
 0x979   : > { %v6514_v34 = vpop.eup %6513  ;;  %v4404_v38 = vadd.f32 1.0, %v6512_v32 }
 0x97a   : > { %v6516_v37 = vpop.eup %6515  ;;  %v4408_v39 = vadd.f32 1.0, %v6514_v34  ;;  %6521 = vrcp.f32 %v4405_v36 }
 0x97b   : > { %v4407_v40 = vadd.f32 1.0, %v6516_v37  ;;  %6523 = vrcp.f32 %v4404_v38  ;;  %v6518_v57 = vpop.eup %6517 }
 0x97c   : > { %6525 = vrcp.f32 %v4408_v39  ;;  %v6520_v46 = vpop.eup %6519  ;;  %v4406_v54 = vadd.f32 1.0, %v6518_v57 }
 0x97d   : > { %6527 = vrcp.f32 %v4407_v40  ;;  %v4409_v6 = vadd.f32 1.0, %v6520_v46 }
 0x97e   : > { %6529 = vrcp.f32 %v4406_v54 }
 0x984   : > { %v6522_v50 = vpop.eup %6521 }
 0x985   : > { %v6524_v53 = vpop.eup %6523  ;;  %v4428_v3 = vmul.f32 %v6522_v50, %v4426_v51 }
 0x986   : > { %v6526_v60 = vpop.eup %6525 }
 0x987   : > { %v4369_v44 = vpop.f32.mrb[4].mxu0  ;;  %v6528_v5 = vpop.eup %6527  ;;  %v4429_v9 = vmul.f32 %v6526_v60, %v4427_v61 }
 0x988   : > { %v4380_v48 = vadd.f32 %v4369_v44, %v3987_v42  ;;  %v5798_v49 = vpop.f32.mrb[5].mxu0  ;;  %v6530_v11 = vpop.eup %6529 }
 0x989   : > { %v4372_v52 = vpop.f32.mrb[6].mxu0 }
 0x98a   : > { %v4422_v56 = vmax.f32 %v4379_v47, %v4380_v48  ;;  %v4385_v58 = vadd.f32 %v4372_v52, %v3992_v45  ;;  %v5799_v59 = vpop.f32.mrb[7].mxu0 }
 0x98c   : > { %v4424_v2 = vmul.f32 %v6524_v53, %v4422_v56  ;;  %v4423_v4 = vmax.f32 %v4384_v55, %v4385_v58 }
 0x98e   : > { %v4430_v7 = vadd.f32 %v4428_v3, %v4424_v2  ;;  %v4425_v8 = vmul.f32 %v6528_v5, %v4423_v4 }
 0x990   : > { %6531 = vtanh.f32 %v4430_v7  ;;  %4436 = vst [vmem:[#allocation4] sm:$0xff] %v4430_v7  ;;  %v4431_v10 = vadd.f32 %v4429_v9, %v4425_v8 }
 0x991   : > { %6533 = vrcp.f32 %v4409_v6 }
 0x992   : > { %6535 = vtanh.f32 %v4431_v10  ;;  %4437 = vst [vmem:[#allocation4 + $0x8] sm:$0xff] %v4431_v10 }
 0x99a   : > { %v6532_v12 = vpop.eup %6531 }
 0x99b   : > { %v6534_v13 = vpop.eup %6533  ;;  %v4434_v14 = vmul.f32 %v6532_v12, %v6530_v11 }
 0x99c   : > { %v6536_v62 = vpop.eup %6535 }
 0x99d   : > { %4438 = vst [vmem:[#allocation3] sm:$0xff] %v4434_v14  ;;  %5482 = vst [vmem:[%s6743_s14 + $0x60] sm:$0xff] %v4434_v14  ;;  %v4435_v15 = vmul.f32 %v6536_v62, %v6534_v13 }
 0x99f   : > { %4439 = vst [vmem:[#allocation3 + $0x8] sm:$0xff] %v4435_v15  ;;  %5483 = vst [vmem:[%s6743_s14 + $0x68] sm:$0xff] %v4435_v15 }
 0x9a0 PF: > { %s4443_s12 = sadd.s32 7, %s6731_s28 }
 0x9a1   : > { %p5484_p13 = scmp.ge.s32.totalorder %s4443_s12, 10 }
 0x9a2   : > { %v6537_v63 = vld [vmem:[%s8007_s2 + $0x4] ss:$20 sps:$4 sm:$0xff] (!%p5484_p13)   ;;  %v6539_v16 = vld [vmem:[%s8007_s2] ss:$20 sps:$4 sm:$0xff] (!%p5484_p13)   ;;  %v6667_v17 = vmov (!%p5484_p13), 0   ;;  %v6668_v47 = vmov (!%p5484_p13), 0.0  }
 0x9a3   : > { %4447 = sbr.rel (%p5484_p13) target bundleno = 2768 (0xad0), region = 80  ;;  %4752 = vmatprep.mubr.bf16.mxu0 (!%p5484_p13), %v6667_v17  ;;  %4795 = vmatprep.mubr.bf16.mxu1 (!%p5484_p13), %v6667_v17  ;;  %v6540_v18 = vld [vmem:[%s8007_s2 + $0x2c] ss:$20 sps:$4 sm:$0xff] (!%p5484_p13)   ;;  %v6542_v0 = vld [vmem:[%s8007_s2 + $0x28] ss:$20 sps:$4 sm:$0xff] (!%p5484_p13)   ;;  %vm6669_vm7 = vmmov (!%p5484_p13), 0  }
 0x9a4   : > { %4720 = vmatprep.subr.bf16.mxu0 (!%p5484_p13), %v6537_v63  ;;  %v6543_v1 = vld [vmem:[%s8007_s2 + $0x54] ss:$20 sps:$4 sm:$0xff] (!%p5484_p13)   ;;  %v6545_v19 = vld [vmem:[%s8007_s2 + $0x50] ss:$20 sps:$4 sm:$0xff] (!%p5484_p13)   ;;  %v6554_v21 = vld [vmem:[%s8007_s2 + $0xc] ss:$20 sps:$4 sm:$0xff] (!%p5484_p13)  }
 0x9a5   : > { %4721 = vmatpush1.bf16.msra.mxu0 (!%p5484_p13), %v6539_v16  ;;  %v6546_v20 = vld [vmem:[%s8007_s2 + $0x7c] ss:$20 sps:$4 sm:$0xff] (!%p5484_p13)   ;;  %4763 = vmatprep.subr.bf16.mxu1 (!%p5484_p13), %v6554_v21  ;;  %v6548_v23 = vld [vmem:[%s8007_s2 + $0x78] ss:$20 sps:$4 sm:$0xff] (!%p5484_p13)   ;;  %v6560_v24 = vld [vmem:[%s8007_s2 + $0x34] ss:$20 sps:$4 sm:$0xff] (!%p5484_p13)  }
 0x9a6   : > { %4722 = vmatprep.subr.bf16.mxu0 (!%p5484_p13), %v6540_v18  ;;  %v6557_v22 = vld [vmem:[%s8007_s2 + $0x8] ss:$20 sps:$4 sm:$0xff] (!%p5484_p13)   ;;  %v6563_v25 = vld [vmem:[%s8007_s2 + $0x30] ss:$20 sps:$4 sm:$0xff] (!%p5484_p13)   ;;  %v6551_v28 = vld [vmem:[%s8007_s2 + $0xa0] ss:$20 sps:$4 sm:$0xff] (!%p5484_p13)  }
 0x9a7   : > { %4764 = vmatpush1.bf16.msra.mxu1 (!%p5484_p13), %v6557_v22  ;;  %v6549_v26 = vld [vmem:[%s8007_s2 + $0xa4] ss:$20 sps:$4 sm:$0xff] (!%p5484_p13)   ;;  %v6566_v27 = vld [vmem:[%s8007_s2 + $0x5c] ss:$20 sps:$4 sm:$0xff] (!%p5484_p13)   ;;  %v6552_v30 = vld [vmem:[%s8007_s2 + $0xcc] ss:$20 sps:$4 sm:$0xff] (!%p5484_p13)  }
 0x9a8   : > { %4765 = vmatprep.subr.bf16.mxu1 (!%p5484_p13), %v6560_v24  ;;  %v6569_v29 = vld [vmem:[%s8007_s2 + $0x58] ss:$20 sps:$4 sm:$0xff] (!%p5484_p13)   ;;  %v6556_v32 = vld [vmem:[%s8007_s2 + $0xc8] ss:$20 sps:$4 sm:$0xff] (!%p5484_p13)   ;;  %v6572_v34 = vld [vmem:[%s8007_s2 + $0x80] ss:$20 sps:$4 sm:$0xff] (!%p5484_p13)  }
 0x9a9   : > { %4723 = vmatpush1.bf16.msra.mxu0 (!%p5484_p13), %v6542_v0  ;;  %v6570_v31 = vld [vmem:[%s8007_s2 + $0x84] ss:$20 sps:$4 sm:$0xff] (!%p5484_p13)   ;;  %v6558_v33 = vld [vmem:[%s8007_s2 + $0xf4] ss:$20 sps:$4 sm:$0xff] (!%p5484_p13)   ;;  %v6574_v35 = vld [vmem:[%s8007_s2 + $0xac] ss:$20 sps:$4 sm:$0xff] (!%p5484_p13)  }
 0x9aa   : > { %4724 = vmatprep.subr.bf16.mxu0 %v6543_v1  ;;  %v6562_v36 = vld [vmem:[%s8007_s2 + $0xf0] ss:$20 sps:$4 sm:$0xff]   ;;  %v6576_v38 = vld [vmem:[%s8007_s2 + $0xa8] ss:$20 sps:$4 sm:$0xff]   ;;  %v6568_v40 = vld [vmem:[%s8007_s2 + $0x118] ss:$20 sps:$4 sm:$0xff]  }
 0x9ab   : > { %4766 = vmatpush1.bf16.msra.mxu1 %v6563_v25  ;;  %v6564_v37 = vld [vmem:[%s8007_s2 + $0x11c] ss:$20 sps:$4 sm:$0xff]   ;;  %v6578_v39 = vld [vmem:[%s8007_s2 + $0xd4] ss:$20 sps:$4 sm:$0xff]   ;;  %v4448_v41 = vld [vmem:[#allocation3] sm:$0xff] }
 0x9ac   : > { %4767 = vmatprep.subr.bf16.mxu1 %v6566_v27  ;;  %v4449_v42 = vld [vmem:[#allocation3 + $0x8] sm:$0xff]  ;;  %v6580_v57 = vld [vmem:[%s8007_s2 + $0xd0] ss:$20 sps:$4 sm:$0xff]   ;;  %v6588_v50 = vld [vmem:[%s8007_s2 + $0x120] ss:$20 sps:$4 sm:$0xff]  }
 0x9ad   : > { %4725 = vmatpush1.bf16.msra.mxu0 %v6545_v19  ;;  %v6582_v43 = vld [vmem:[%s8007_s2 + $0xfc] ss:$20 sps:$4 sm:$0xff]   ;;  %v4450_v44 = vpack.c.bf16 %v4449_v42, %v4448_v41  ;;  %v6584_v46 = vld [vmem:[%s8007_s2 + $0xf8] ss:$20 sps:$4 sm:$0xff]   ;;  %v6581_v51 = vld [vmem:[%s8007_s2 + $0x60] ss:$20 sps:$4 sm:$0xff]  }
 0x9ae   : > { %4726 = vmatprep.subr.bf16.mxu0 %v6546_v20  ;;  %v6573_v45 = vld [vmem:[%s8007_s2 + $0x10] ss:$20 sps:$4 sm:$0xff]   ;;  %v6577_v49 = vld [vmem:[%s8007_s2 + $0x38] ss:$20 sps:$4 sm:$0xff]   ;;  %v6585_v52 = vld [vmem:[%s8007_s2 + $0x88] ss:$20 sps:$4 sm:$0xff]  }
 0x9af   : > { %4768 = vmatpush1.bf16.msra.mxu1 %v6569_v29  ;;  %v6586_v48 = vld [vmem:[%s8007_s2 + $0x124] ss:$20 sps:$4 sm:$0xff]   ;;  %v6591_v55 = vld [vmem:[%s8007_s2 + $0x100] ss:$20 sps:$4 sm:$0xff]   ;;  %v6592_v56 = vld [vmem:[%s8007_s2 + $0x128] ss:$20 sps:$4 sm:$0xff]  }
 0x9b0   : > { %4769 = vmatprep.subr.bf16.mxu1 %v6570_v31  ;;  %v6589_v53 = vld [vmem:[%s8007_s2 + $0xb0] ss:$20 sps:$4 sm:$0xff]   ;;  %v6590_v54 = vld [vmem:[%s8007_s2 + $0xd8] ss:$20 sps:$4 sm:$0xff]  }
 0x9b1   : > { %4727 = vmatpush1.bf16.msra.mxu0 %v6548_v23  ;;  %v4454_v58 = vld [vmem:[#allocation2 + $0x230] sm:$0xff]  ;;  %v4455_v59 = vld [vmem:[#allocation2 + $0x238] sm:$0xff]  ;;  %v4460_v4 = vld [vmem:[#allocation2 + $0x260] sm:$0xff] }
 0x9b2   : > { %4728 = vmatprep.subr.bf16.mxu0 %v6549_v26  ;;  %v4459_v61 = vld [vmem:[#allocation2 + $0x258] sm:$0xff]  ;;  %v4456_v63 = vld [vmem:[#allocation2 + $0x240] sm:$0xff]  ;;  %v4461_v17 = vld [vmem:[#allocation2 + $0x268] sm:$0xff] }
 0x9b3   : > { %4770 = vmatpush1.bf16.msra.mxu1 %v6572_v34  ;;  %v4458_v29 = vld [vmem:[#allocation2 + $0x250] sm:$0xff] }
 0x9b4   : > { %4771 = vmatprep.subr.bf16.mxu1 %v6574_v35  ;;  %v4462_v31 = vld [vmem:[#allocation2 + $0x270] sm:$0xff] }
 0x9b5   : > { %4729 = vmatpush1.bf16.msra.mxu0 %v6551_v28  ;;  %v4457_v28 = vld [vmem:[#allocation2 + $0x248] sm:$0xff] }
 0x9b6   : > { %4730 = vmatprep.subr.bf16.mxu0 %v6552_v30 }
 0x9b7   : > { %4772 = vmatpush1.bf16.msra.mxu1 %v6576_v38 }
 0x9b8   : > { %4773 = vmatprep.subr.bf16.mxu1 %v6578_v39  ;;  %v4897_v39 = vld [vmem:[#allocation4] sm:$0xff] }
 0x9b9   : > { %4731 = vmatpush1.bf16.msra.mxu0 %v6556_v32 }
 0x9ba   : > { %4732 = vmatprep.subr.bf16.mxu0 %v6558_v33  ;;  %v4463_v33 = vld [vmem:[#allocation2 + $0x278] sm:$0xff] }
 0x9bb   : > { %4774 = vmatpush1.bf16.msra.mxu1 %v6580_v57 }
 0x9bc   : > { %4775 = vmatprep.subr.bf16.mxu1 %v6582_v43 }
 0x9bd   : > { %4733 = vmatpush1.bf16.msra.mxu0 %v6562_v36 }
 0x9be   : > { %4734 = vmatprep.subr.bf16.mxu0 %v6564_v37 }
 0x9bf   : > { %4776 = vmatpush1.bf16.msra.mxu1 %v6584_v46 }
 0x9c0   : > { %4777 = vmatprep.subr.bf16.mxu1 %v6586_v48 }
 0x9c1   : > { %4735 = vmatpush1.bf16.msra.mxu0 %v6568_v40 }
 0x9c2   : > { %5800 = vmatprep.subr.bf16.mxu0 %v6668_v47 }
 0x9c3   : > { %4778 = vmatpush1.bf16.msra.mxu1 %v6588_v50 }
 0x9c4   : > { %4753 = vmatmul.mubr.bf16.vlgmr.msra.gmra.mrb[0].mxu0 %v4450_v44 }
 0x9c5   : > { %5801 = vmatpush3.bf16.msra.mxu0 %v6573_v45  ;;  %5816 = vmatprep.mubr.msk.bf16.mxu0 %vm6669_vm7, %v6668_v47 }
 0x9c6   : > { %5802 = vmatprep.subr.bf16.mxu0 %v6668_v47  ;;  %4796 = vmatmul.mubr.bf16.vlgmr.msra.gmra.mrb[0].mxu1 %v4450_v44 }
 0x9c9   : > { %5803 = vmatpush3.bf16.msra.mxu0 %v6577_v49 }
 0x9ca   : > { %5804 = vmatprep.subr.bf16.mxu0 %v6668_v47 }
 0x9cd   : > { %5805 = vmatpush3.bf16.msra.mxu0 %v6581_v51 }
 0x9ce   : > { %5806 = vmatprep.subr.bf16.mxu0 %v6668_v47 }
 0x9d1   : > { %5807 = vmatpush3.bf16.msra.mxu0 %v6585_v52 }
 0x9d2   : > { %5808 = vmatprep.subr.bf16.mxu0 %v6668_v47 }
 0x9d5   : > { %5809 = vmatpush3.bf16.msra.mxu0 %v6589_v53 }
 0x9d6   : > { %5810 = vmatprep.subr.bf16.mxu0 %v6668_v47 }
 0x9d9   : > { %5811 = vmatpush3.bf16.msra.mxu0 %v6590_v54 }
 0x9da   : > { %5812 = vmatprep.subr.bf16.mxu0 %v6668_v47 }
 0x9dd   : > { %5813 = vmatpush3.bf16.msra.mxu0 %v6591_v55 }
 0x9de   : > { %5814 = vmatprep.subr.bf16.mxu0 %v6668_v47  ;;  %v4898_v47 = vld [vmem:[#allocation4 + $0x8] sm:$0xff] }
 0x9e1   : > { %5815 = vmatpush3.bf16.msra.mxu0 %v6592_v56 }
 0x9e4   : > { %5817 = vmatmul.mubr.bf16.vlgmr.msra.gmra.mrb[4].mxu0 %v4450_v44 }
 0xa97   : > { %v4754_v60 = vpop.f32.mrb[0].mxu0 }
 0xa98   : > { %v4847_v2 = vadd.f32 %v4754_v60, %v4454_v58  ;;  %v4756_v3 = vpop.f32.mrb[1].mxu0 }
 0xa99   : > { %v4848_v5 = vadd.f32 %v4756_v3, %v4455_v59  ;;  %v4758_v6 = vpop.f32.mrb[2].mxu0  ;;  %v4797_v14 = vpop.f32.mrb[0].mxu1 }
 0xa9a   : > { %v4852_v7 = vadd.f32 %v4758_v6, %v4459_v61  ;;  %v4760_v8 = vpop.f32.mrb[3].mxu0  ;;  %v5525_v9 = vmul.f32 -1.442695, %v4847_v2  ;;  %v4799_v62 = vpop.f32.mrb[1].mxu1  ;;  %v4849_v18 = vadd.f32 %v4797_v14, %v4456_v63 }
 0xa9b   : > { %v5526_v10 = vmul.f32 -1.442695, %v4848_v5  ;;  %v4853_v11 = vadd.f32 %v4760_v8, %v4460_v4  ;;  %v4801_v15 = vpop.f32.mrb[2].mxu1  ;;  %v4850_v35 = vadd.f32 %v4799_v62, %v4457_v28 }
 0xa9c   : > { %v5528_v13 = vmul.f32 -1.442695, %v4852_v7  ;;  %v4803_v16 = vpop.f32.mrb[3].mxu1  ;;  %v4854_v0 = vadd.f32 %v4801_v15, %v4461_v17  ;;  %v5527_v20 = vmul.f32 -1.442695, %v4849_v18 }
 0xa9d   : > { %v5529_v12 = vmul.f32 -1.442695, %v4853_v11  ;;  %6593 = vpow2.f32 %v5526_v10  ;;  %v4855_v57 = vadd.f32 %v4803_v16, %v4462_v31 }
 0xa9e   : > { %6595 = vpow2.f32 %v5525_v9  ;;  %v5530_v22 = vmul.f32 -1.442695, %v4854_v0 }
 0xa9f   : > { %6597 = vpow2.f32 %v5529_v12 }
 0xaa0   : > { %6599 = vpow2.f32 %v5528_v13 }
 0xaa1   : > { %6601 = vpow2.f32 %v5527_v20 }
 0xaa2   : > { %6603 = vpow2.f32 %v5530_v22 }
 0xaa7   : > { %v6594_v1 = vpop.eup %6593 }
 0xaa8   : > { %v6596_v19 = vpop.eup %6595  ;;  %v4876_v23 = vadd.f32 1.0, %v6594_v1 }
 0xaa9   : > { %v6598_v21 = vpop.eup %6597  ;;  %v4875_v25 = vadd.f32 1.0, %v6596_v19 }
 0xaaa   : > { %v6600_v24 = vpop.eup %6599  ;;  %v4879_v26 = vadd.f32 1.0, %v6598_v21  ;;  %6605 = vrcp.f32 %v4876_v23 }
 0xaab   : > { %v4878_v27 = vadd.f32 1.0, %v6600_v24  ;;  %6607 = vrcp.f32 %v4875_v25  ;;  %v6602_v30 = vpop.eup %6601 }
 0xaac   : > { %6609 = vrcp.f32 %v4879_v26  ;;  %v6604_v34 = vpop.eup %6603  ;;  %v4877_v42 = vadd.f32 1.0, %v6602_v30 }
 0xaad   : > { %6611 = vrcp.f32 %v4878_v27  ;;  %v4880_v52 = vadd.f32 1.0, %v6604_v34 }
 0xaae   : > { %6613 = vrcp.f32 %v4877_v42 }
 0xab4   : > { %v6606_v38 = vpop.eup %6605 }
 0xab5   : > { %v6608_v41 = vpop.eup %6607  ;;  %v4899_v49 = vmul.f32 %v6606_v38, %v4897_v39 }
 0xab6   : > { %v6610_v46 = vpop.eup %6609 }
 0xab7   : > { %v4840_v32 = vpop.f32.mrb[4].mxu0  ;;  %v6612_v51 = vpop.eup %6611  ;;  %v4900_v55 = vmul.f32 %v6610_v46, %v4898_v47 }
 0xab8   : > { %v4851_v36 = vadd.f32 %v4840_v32, %v4458_v29  ;;  %v5818_v37 = vpop.f32.mrb[5].mxu0  ;;  %v6614_v58 = vpop.eup %6613 }
 0xab9   : > { %v4843_v40 = vpop.f32.mrb[6].mxu0 }
 0xaba   : > { %v4893_v43 = vmax.f32 %v4850_v35, %v4851_v36  ;;  %v4856_v44 = vadd.f32 %v4843_v40, %v4463_v33  ;;  %v5819_v45 = vpop.f32.mrb[7].mxu0 }
 0xabc   : > { %v4895_v48 = vmul.f32 %v6608_v41, %v4893_v43  ;;  %v4894_v50 = vmax.f32 %v4855_v57, %v4856_v44 }
 0xabe   : > { %v4901_v53 = vadd.f32 %v4899_v49, %v4895_v48  ;;  %v4896_v54 = vmul.f32 %v6612_v51, %v4894_v50 }
 0xac0   : > { %6615 = vtanh.f32 %v4901_v53  ;;  %4907 = vst [vmem:[#allocation4] sm:$0xff] %v4901_v53  ;;  %v4902_v56 = vadd.f32 %v4900_v55, %v4896_v54 }
 0xac1   : > { %6617 = vrcp.f32 %v4880_v52 }
 0xac2   : > { %6619 = vtanh.f32 %v4902_v56  ;;  %4908 = vst [vmem:[#allocation4 + $0x8] sm:$0xff] %v4902_v56 }
 0xaca   : > { %v6616_v59 = vpop.eup %6615 }
 0xacb   : > { %v6618_v60 = vpop.eup %6617  ;;  %v4905_v61 = vmul.f32 %v6616_v59, %v6614_v58 }
 0xacc   : > { %v6620_v2 = vpop.eup %6619 }
 0xacd   : > { %4909 = vst [vmem:[#allocation3] sm:$0xff] %v4905_v61  ;;  %5531 = vst [vmem:[%s6743_s14 + $0x70] sm:$0xff] %v4905_v61  ;;  %v4906_v3 = vmul.f32 %v6620_v2, %v6618_v60 }
 0xacf   : > { %4910 = vst [vmem:[#allocation3 + $0x8] sm:$0xff] %v4906_v3  ;;  %5532 = vst [vmem:[%s6743_s14 + $0x78] sm:$0xff] %v4906_v3 }
 0xad0 PF: > { %p5533_p0 = scmp.ne.s32.totalorder %s6635_s24, 1 }
 0xad1   : > { %v4918_v4 = vld [vmem:[#allocation4] sm:$0xff] (!%p5533_p0)  ;;  %v4919_v5 = vld [vmem:[#allocation4 + $0x8] sm:$0xff] (!%p5533_p0) }
 0xad2   : > { %4917 = sbr.rel (%p5533_p0) target bundleno = 2777 (0xad9), region = 84  ;;  %4920 = vst [vmem:[%s8012_s7] sm:$0xff] (!%p5533_p0), %v4918_v4  ;;  %4921 = vst [vmem:[%s8012_s7 + $0x8] sm:$0xff] (!%p5533_p0), %v4919_v5 }
 0xad9 PF: > { %s18_s26 = sadd.s32 1, %s6643_s26   ;;  %s8013_s24 = smov %s6639_s25 }
 0xada   : > { %p15_p1 = scmp.ge.s32.totalorder %s18_s26, 4   ;;  %s8014_s25 = smov %s8016_s27 }
 0xadc   :  { %17 = sbr.rel (!%p15_p1) target bundleno = 2 (0x2), region = 147 }

</bundles_post_ra>
